<compile_context>
chip_gen: v7x
topology: tpu7x:2x2x1
jax: 0.10.0
libtpu: 0.0.40
codegen_flags: <defaults>
</compile_context>

<pallas_src>
import jax
import jax.numpy as jnp
from jax.experimental import pallas as pl
from jax.experimental.pallas import tpu as pltpu

EPS = 1e-5
LANE = 128

# Generation-aware VMEM limit: 3/4 of physical (48 MiB on v7x, 96 MiB on
# v5e/v6e); conservative fallback that is safe on every generation.
try:
    _VMEM_LIMIT = int(pltpu.get_tpu_info().vmem_capacity_bytes) * 3 // 4
except Exception:
    _VMEM_LIMIT = 48 * 1024 * 1024


def _cparams(grid_rank):
    return pltpu.CompilerParams(
        dimension_semantics=("parallel",) * grid_rank,
        vmem_limit_bytes=_VMEM_LIMIT)


def _round_up(x, m):
    return (x + m - 1) // m * m


def _largest_divisor(x, cap):
    """Largest d <= cap with x % d == 0 (>= 1)."""
    for d in range(min(cap, x), 0, -1):
        if x % d == 0:
            return d
    return 1


def _stats2(y2d):
    """Per-channel [sum; sum_sq] of a (rows, C) f32 tile -> (2, C) f32."""
    return jnp.concatenate(
        [jnp.sum(y2d, axis=0, keepdims=True),
         jnp.sum(y2d * y2d, axis=0, keepdims=True)], axis=0)


# --------------------------------------------------------------------------- #
# Kernels
# --------------------------------------------------------------------------- #
def _conv1x1_stats_kernel(x_ref, w_ref, y_ref, st_ref):
    """1x1 conv (row tile) + partial BN stats.  x is f32 (cast in-kernel)."""
    y = jax.lax.dot_general(
        x_ref[...].astype(jnp.bfloat16), w_ref[...],
        dimension_numbers=(((1,), (0,)), ((), ())),
        preferred_element_type=jnp.float32)
    y_ref[...] = y.astype(y_ref.dtype)          # bf16 store (halved HBM)
    st_ref[...] = _stats2(y)[None]


def _bn_relu_conv1x1_stats_kernel(y_ref, sc_ref, sh_ref, w_ref, o_ref, st_ref):
    """Fused affine(BN)+ReLU then 1x1 conv (row tile) + partial BN stats."""
    a = jnp.maximum(y_ref[...].astype(jnp.float32) * sc_ref[...] + sh_ref[...],
                    0.0)
    o = jax.lax.dot_general(
        a.astype(jnp.bfloat16), w_ref[...],
        dimension_numbers=(((1,), (0,)), ((), ())),
        preferred_element_type=jnp.float32)
    o_ref[...] = o.astype(o_ref.dtype)
    st_ref[...] = _stats2(o)[None]


def _bn_relu_conv3x3_stats_kernel(ym_ref, yt_ref, yb_ref, sc_ref, sh_ref,
                                  w_ref, o_ref, st_ref, ap_ref):
    """Fused affine(BN1)+ReLU then 3x3 'same' conv on one row strip + stats.

    ym_ref: (strip_h*W, Cp) bf16   un-normalized conv1 rows of this strip
    yt_ref: (W, Cp)        bf16    image row above the strip (junk if s==0)
    yb_ref: (W, Cp)        bf16    image row below the strip (junk if last)
    w_ref : (3, 3*Cp, Cp)  bf16    dx-taps folded along K
    ap_ref: (strip_h+2, W+2, Cp) bf16 VMEM scratch: zero-bordered activation
    """
    s_idx = pl.program_id(1)
    n_strips = pl.num_programs(1)

    base, ci = ym_ref.shape
    wdim = yt_ref.shape[0]
    strip_h = base // wdim
    hp, wp = strip_h + 2, wdim + 2

    sc = sc_ref[...]                             # (1, Cp) f32
    shb = sh_ref[...]

    def act(v):                                  # bf16 (rows, Cp) -> bf16
        return jnp.maximum(v.astype(jnp.float32) * sc + shb, 0.0
                           ).astype(jnp.bfloat16)

    zero_row = jnp.zeros((wdim, ci), jnp.bfloat16)
    top = jnp.where(s_idx > 0, act(yt_ref[...]), zero_row)
    bot = jnp.where(s_idx < n_strips - 1, act(yb_ref[...]), zero_row)

    # Stage the zero-bordered strip in VMEM (only the 1-px border is zeroed).
    zcol = jnp.zeros((hp, 1, ci), jnp.bfloat16)
    ap_ref[:, 0:1, :] = zcol
    ap_ref[:, wp - 1:wp, :] = zcol
    ap_ref[0:1, 1:wdim + 1, :] = top[None]
    ap_ref[hp - 1:hp, 1:wdim + 1, :] = bot[None]
    ap_ref[1:strip_h + 1, 1:wdim + 1, :] = act(ym_ref[...]).reshape(
        strip_h, wdim, ci)

    ap = ap_ref[...]                             # (strip_h+2, W+2, Cp)
    wk = w_ref[...]                              # (3, 3*Cp, Cp)

    acc = None
    for dy in range(3):
        # Fold the three dx-shifts along the contraction axis: K = 3*Cp.
        slab = jnp.concatenate(
            [ap[dy:dy + strip_h, dx:dx + wdim, :] for dx in range(3)], axis=-1)
        part = jax.lax.dot_general(
            slab, wk[dy],
            dimension_numbers=(((2,), (0,)), ((), ())),
            preferred_element_type=jnp.float32)
        acc = part if acc is None else acc + part

    acc2d = acc.reshape(base, ci)
    o_ref[...] = acc2d.astype(o_ref.dtype)
    st_ref[...] = _stats2(acc2d)[None, None]


def _bn_add_relu_kernel(y_ref, res_ref, sc_ref, sh_ref, o_ref):
    """Fused affine(BN3) + identity residual + ReLU (row tile)."""
    o_ref[...] = jnp.maximum(
        y_ref[...].astype(jnp.float32) * sc_ref[...] + sh_ref[...]
        + res_ref[...], 0.0)


# --------------------------------------------------------------------------- #
# Wrapper
# --------------------------------------------------------------------------- #
def _finalize_bn(partial_stats, gamma_p, beta_p, count):
    """Reduce per-tile (sum, sum_sq) -> folded scale/shift (train-mode BN)."""
    c = partial_stats.shape[-1]
    tot = jnp.sum(partial_stats.reshape(-1, 2, c), axis=0)   # (2, C)
    mean = tot[0] / count
    var = jnp.maximum(tot[1] / count - mean * mean, 0.0)     # biased variance
    scale = gamma_p * jax.lax.rsqrt(var + EPS)
    shift = beta_p - mean * scale
    return (scale.reshape(1, -1).astype(jnp.float32),
            shift.reshape(1, -1).astype(jnp.float32))


def bottleneck_forward(x_nchw, w1, g1, b1, w2, g2, b2, w3, g3, b3):
    """BottleneckBlock forward.  x: NCHW f32.  w1:(Cin,P), w2:(3,3,P,P) HWIO,
    w3:(P,4P).  Returns NCHW."""
    x = jnp.transpose(x_nchw, (0, 2, 3, 1)).astype(jnp.float32)   # NHWC
    n, h, w, cin = x.shape
    p = w1.shape[1]
    c4 = w3.shape[1]
    assert c4 == 4 * p, "expansion must be 4"
    # TODO(synk): stride>1 / learned downsample branch not implemented
    # (identity residual requires inplanes == planes*4 and stride == 1).
    assert cin == c4
    # TODO(synk): strip BlockSpecs require W % 8 == 0; generalize for odd W.
    assert w % 8 == 0

    cin_p = _round_up(cin, LANE)
    p_p = _round_up(p, LANE)
    c4_p = _round_up(c4, LANE)
    m = n * h * w
    count = jnp.float32(m)

    # 3x3 row-strip tiling (bounds VMEM per step, deepens grid for megacore).
    strip_h = _largest_divisor(h, 8)
    ns = h // strip_h
    base = strip_h * w                      # flattened rows per strip block

    # Row tile for the 1x1 / elementwise stages: a multiple of `base` that
    # divides m exactly (no tm=m fallback, no tails), targeting ~1024 rows.
    k = _largest_divisor(n * ns, max(1, 1024 // base))
    tm = base * k
    nt = m // tm

    # Channel-pad params; MXU weights in bf16 (f32 accumulation in-kernel).
    w1p = jnp.pad(w1, ((0, cin_p - cin), (0, p_p - p))).astype(jnp.bfloat16)
    w2p = jnp.pad(w2, ((0, 0), (0, 0), (0, p_p - p), (0, p_p - p))
                  ).astype(jnp.bfloat16)                       # (3,3,Cp,Cp)
    # Fold dx taps along the contraction axis -> (3, 3*Cp, Cp), K = 3*Cp.
    w2k = jnp.stack([jnp.concatenate([w2p[dy, dx] for dx in range(3)], axis=0)
                     for dy in range(3)])
    w3p = jnp.pad(w3, ((0, p_p - p), (0, c4_p - c4))).astype(jnp.bfloat16)
    g1p, b1p = jnp.pad(g1, (0, p_p - p)), jnp.pad(b1, (0, p_p - p))
    g2p, b2p = jnp.pad(g2, (0, p_p - p)), jnp.pad(b2, (0, p_p - p))
    g3p, b3p = jnp.pad(g3, (0, c4_p - c4)), jnp.pad(b3, (0, c4_p - c4))

    x2d = jnp.pad(x.reshape(m, cin), ((0, 0), (0, cin_p - cin)))  # f32 residual

    # ---- stage 1: conv1 (1x1) + bn1 partial stats --------------------------
    y1, st1 = pl.pallas_call(
        _conv1x1_stats_kernel,
        out_shape=(jax.ShapeDtypeStruct((m, p_p), jnp.bfloat16),
                   jax.ShapeDtypeStruct((nt, 2, p_p), jnp.float32)),
        grid=(nt,),
        in_specs=[pl.BlockSpec((tm, cin_p), lambda i: (i, 0)),
                  pl.BlockSpec((cin_p, p_p), lambda i: (0, 0))],
        out_specs=(pl.BlockSpec((tm, p_p), lambda i: (i, 0)),
                   pl.BlockSpec((1, 2, p_p), lambda i: (i, 0, 0))),
        compiler_params=_cparams(1),
    )(x2d, w1p)
    scale1, shift1 = _finalize_bn(st1, g1p, b1p, count)

    # ---- stage 2: bn1+relu -> conv2 (3x3, pad 1) + bn2 partial stats --------
    # y1 stays in its flat (m, Cp) layout; strips are blocks of strip_h*W rows,
    # the 1-row halos are separate single-row blocks with clamped index maps.
    def _main_map(b, s):
        return (b * ns + s, 0)

    def _top_map(b, s):
        return (jnp.maximum((b * ns + s) * strip_h - 1, 0), 0)

    def _bot_map(b, s):
        return (jnp.minimum((b * ns + s + 1) * strip_h, n * h - 1), 0)

    y2, st2 = pl.pallas_call(
        _bn_relu_conv3x3_stats_kernel,
        out_shape=(jax.ShapeDtypeStruct((m, p_p), jnp.bfloat16),
                   jax.ShapeDtypeStruct((n, ns, 2, p_p), jnp.float32)),
        grid=(n, ns),
        in_specs=[pl.BlockSpec((base, p_p), _main_map),
                  pl.BlockSpec((w, p_p), _top_map),
                  pl.BlockSpec((w, p_p), _bot_map),
                  pl.BlockSpec((1, p_p), lambda b, s: (0, 0)),
                  pl.BlockSpec((1, p_p), lambda b, s: (0, 0)),
                  pl.BlockSpec((3, 3 * p_p, p_p), lambda b, s: (0, 0, 0))],
        out_specs=(pl.BlockSpec((base, p_p), _main_map),
                   pl.BlockSpec((1, 1, 2, p_p), lambda b, s: (b, s, 0, 0))),
        scratch_shapes=[pltpu.VMEM((strip_h + 2, w + 2, p_p), jnp.bfloat16)],
        compiler_params=_cparams(2),
    )(y1, y1, y1, scale1, shift1, w2k)
    scale2, shift2 = _finalize_bn(st2, g2p, b2p, count)

    # ---- stage 3: bn2+relu -> conv3 (1x1) + bn3 partial stats ---------------
    y3, st3 = pl.pallas_call(
        _bn_relu_conv1x1_stats_kernel,
        out_shape=(jax.ShapeDtypeStruct((m, c4_p), jnp.bfloat16),
                   jax.ShapeDtypeStruct((nt, 2, c4_p), jnp.float32)),
        grid=(nt,),
        in_specs=[pl.BlockSpec((tm, p_p), lambda i: (i, 0)),
                  pl.BlockSpec((1, p_p), lambda i: (0, 0)),
                  pl.BlockSpec((1, p_p), lambda i: (0, 0)),
                  pl.BlockSpec((p_p, c4_p), lambda i: (0, 0))],
        out_specs=(pl.BlockSpec((tm, c4_p), lambda i: (i, 0)),
                   pl.BlockSpec((1, 2, c4_p), lambda i: (i, 0, 0))),
        compiler_params=_cparams(1),
    )(y2, scale2, shift2, w3p)
    scale3, shift3 = _finalize_bn(st3, g3p, b3p, count)

    # ---- stage 4: bn3 + identity residual + relu ----------------------------
    out2d = pl.pallas_call(
        _bn_add_relu_kernel,
        out_shape=jax.ShapeDtypeStruct((m, c4_p), jnp.float32),
        grid=(nt,),
        in_specs=[pl.BlockSpec((tm, c4_p), lambda i: (i, 0)),
                  pl.BlockSpec((tm, c4_p), lambda i: (i, 0)),
                  pl.BlockSpec((1, c4_p), lambda i: (0, 0)),
                  pl.BlockSpec((1, c4_p), lambda i: (0, 0))],
        out_specs=pl.BlockSpec((tm, c4_p), lambda i: (i, 0)),
        compiler_params=_cparams(1),
    )(y3, x2d, scale3, shift3)

    out = out2d[:, :c4].reshape(n, h, w, c4)
    return jnp.transpose(out, (0, 3, 1, 2)).astype(x_nchw.dtype)


# --------------------------------------------------------------------------- #
# Pure-JAX reference (f32, same train-mode semantics)
# --------------------------------------------------------------------------- #
def reference_forward(x_nchw, w1, g1, b1, w2, g2, b2, w3, g3, b3):
    x = jnp.transpose(x_nchw, (0, 2, 3, 1)).astype(jnp.float32)

    def bn(v, g, b):
        mu = jnp.mean(v, axis=(0, 1, 2))
        var = jnp.mean((v - mu) ** 2, axis=(0, 1, 2))
        return (v - mu) * jax.lax.rsqrt(var + EPS) * g + b

    out = jnp.maximum(bn(jnp.einsum('nhwc,cp->nhwp', x, w1), g1, b1), 0.0)
    out = jax.lax.conv_general_dilated(
        out, w2, window_strides=(1, 1), padding="SAME",
        dimension_numbers=("NHWC", "HWIO", "NHWC"))
    out = jnp.maximum(bn(out, g2, b2), 0.0)
    out = jnp.einsum('nhwp,pq->nhwq', out, w3)
    out = jnp.maximum(bn(out, g3, b3) + x, 0.0)
    return jnp.transpose(out, (0, 3, 1, 2))


if __name__ == "__main__":
    # Small shapes consistent with the module: planes=4, inplanes=planes*4=16.
    N, PLANES, HDIM, WDIM = 2, 4, 16, 16
    CIN = PLANES * 4
    C4 = PLANES * 4

    key = jax.random.PRNGKey(0)
    ks = jax.random.split(key, 10)
    x = jax.random.normal(ks[0], (N, CIN, HDIM, WDIM), jnp.float32)
    w1 = 0.1 * jax.random.normal(ks[1], (CIN, PLANES), jnp.float32)
    w2 = 0.1 * jax.random.normal(ks[2], (3, 3, PLANES, PLANES), jnp.float32)
    w3 = 0.1 * jax.random.normal(ks[3], (PLANES, C4), jnp.float32)
    g1 = 1.0 + 0.1 * jax.random.normal(ks[4], (PLANES,), jnp.float32)
    b1 = 0.1 * jax.random.normal(ks[5], (PLANES,), jnp.float32)
    g2 = 1.0 + 0.1 * jax.random.normal(ks[6], (PLANES,), jnp.float32)
    b2 = 0.1 * jax.random.normal(ks[7], (PLANES,), jnp.float32)
    g3 = 1.0 + 0.1 * jax.random.normal(ks[8], (C4,), jnp.float32)
    b3 = 0.1 * jax.random.normal(ks[9], (C4,), jnp.float32)

    out = jax.block_until_ready(
        jax.jit(bottleneck_forward)(x, w1, g1, b1, w2, g2, b2, w3, g3, b3))
    ref = jax.block_until_ready(
        reference_forward(x, w1, g1, b1, w2, g2, b2, w3, g3, b3))

    assert out.shape == (N, C4, HDIM, WDIM)
    max_err = float(jnp.max(jnp.abs(out - ref)))
    # bf16 MXU operands and bf16 intermediate storage through three
    # batch-normalized layers vs an f32 reference: a few-percent deviation is
    # expected and accepted.
    assert jnp.allclose(out, ref, atol=1e-1, rtol=1e-1), max_err
    print("KERNEL_OK")
</pallas_src>

<mosaic_0001>
module attributes {stable_mosaic.version = 11 : i64} {
  func.func @_conv1x1_stats_kernel(%arg0: i32, %arg1: memref<512x128xf32, #tpu.memory_space<vmem>>, %arg2: memref<128x128xbf16, #tpu.memory_space<vmem>>, %arg3: memref<512x128xbf16, #tpu.memory_space<vmem>>, %arg4: memref<1x2x128xf32, #tpu.memory_space<vmem>>) attributes {dimension_semantics = [#tpu.dimension_semantics<parallel>], iteration_bounds = array<i64: 1>, scalar_prefetch = 0 : i64, scratch_operands = 0 : i64, tpu.core_type = #tpu.core_type<tc>, window_params = [{transform_indices = @transform_0, window_bounds = array<i64: 512, 128>}, {pipeline_mode = #tpu.pipeline_mode<synchronous>, transform_indices = @transform_1, window_bounds = array<i64: 128, 128>}, {transform_indices = @transform_2, window_bounds = array<i64: 512, 128>}, {transform_indices = @transform_3, window_bounds = array<i64: 1, 2, 128>}]} {
    %c0 = arith.constant 0 : index
    %c0_0 = arith.constant 0 : index
    %0 = vector.load %arg1[%c0, %c0_0] : memref<512x128xf32, #tpu.memory_space<vmem>>, vector<512x128xf32>
    %1 = arith.truncf %0 : vector<512x128xf32> to vector<512x128xbf16>
    %c0_1 = arith.constant 0 : index
    %c0_2 = arith.constant 0 : index
    %2 = vector.load %arg2[%c0_1, %c0_2] : memref<128x128xbf16, #tpu.memory_space<vmem>>, vector<128x128xbf16>
    %cst = arith.constant dense<0.000000e+00> : vector<512x128xf32>
    %3 = tpu.matmul %1, %2, %cst {dimension_numbers = #tpu.dot_dimension_numbers<[1], [0], [0], [1], [0, 0, 1, 1], [], []>} : vector<512x128xbf16>, vector<128x128xbf16>, vector<512x128xf32> -> vector<512x128xf32>
    %4 = arith.truncf %3 : vector<512x128xf32> to vector<512x128xbf16>
    %c0_3 = arith.constant 0 : index
    %c0_4 = arith.constant 0 : index
    %5 = vector.load %arg3[%c0_3, %c0_4] : memref<512x128xbf16, #tpu.memory_space<vmem>>, vector<512x128xbf16>
    tpu.vector_store %arg3[%c0_3, %c0_4], %4 {strides = array<i32>} : memref<512x128xbf16, #tpu.memory_space<vmem>>, vector<512x128xbf16>,
    %cst_5 = arith.constant dense<0.000000e+00> : vector<128xf32>
    %6 = vector.multi_reduction <add>, %3, %cst_5 [0] : vector<512x128xf32> to vector<128xf32>
    %7 = vector.shape_cast %6 : vector<128xf32> to vector<1x128xf32>
    %8 = arith.mulf %3, %3 : vector<512x128xf32>
    %cst_6 = arith.constant dense<0.000000e+00> : vector<128xf32>
    %9 = vector.multi_reduction <add>, %8, %cst_6 [0] : vector<512x128xf32> to vector<128xf32>
    %10 = vector.shape_cast %9 : vector<128xf32> to vector<1x128xf32>
    %11 = tpu.concatenate %7, %10 in 0 : vector<1x128xf32>, vector<1x128xf32> -> vector<2x128xf32>
    %12 = vector.shape_cast %11 : vector<2x128xf32> to vector<1x2x128xf32>
    %c0_7 = arith.constant 0 : index
    %c0_8 = arith.constant 0 : index
    %c0_9 = arith.constant 0 : index
    %13 = vector.load %arg4[%c0_7, %c0_8, %c0_9] : memref<1x2x128xf32, #tpu.memory_space<vmem>>, vector<1x2x128xf32>
    tpu.vector_store %arg4[%c0_7, %c0_8, %c0_9], %12 {strides = array<i32>} : memref<1x2x128xf32, #tpu.memory_space<vmem>>, vector<1x2x128xf32>,
    return
  }
  func.func @transform_0(%arg0: i32) -> (i32, i32) {
    %c0_i32 = arith.constant 0 : i32
    %c0_i32_0 = arith.constant 0 : i32
    return %arg0, %c0_i32 : i32, i32
  }
  func.func @transform_1(%arg0: i32) -> (i32, i32) {
    %c0_i32 = arith.constant 0 : i32
    %c0_i32_0 = arith.constant 0 : i32
    %c0_i32_1 = arith.constant 0 : i32
    return %c0_i32, %c0_i32_0 : i32, i32
  }
  func.func @transform_2(%arg0: i32) -> (i32, i32) {
    %c0_i32 = arith.constant 0 : i32
    %c0_i32_0 = arith.constant 0 : i32
    return %arg0, %c0_i32 : i32, i32
  }
  func.func @transform_3(%arg0: i32) -> (i32, i32, i32) {
    %c0_i32 = arith.constant 0 : i32
    %c0_i32_0 = arith.constant 0 : i32
    %c0_i32_1 = arith.constant 0 : i32
    return %arg0, %c0_i32, %c0_i32_0 : i32, i32, i32
  }
}

module attributes {stable_mosaic.version = 11 : i64} {
  func.func @_bn_relu_conv3x3_stats_kernel(%arg0: i32, %arg1: i32, %arg2: memref<128x128xbf16, #tpu.memory_space<vmem>>, %arg3: memref<16x128xbf16, #tpu.memory_space<vmem>>, %arg4: memref<16x128xbf16, #tpu.memory_space<vmem>>, %arg5: memref<1x128xf32, #tpu.memory_space<vmem>>, %arg6: memref<1x128xf32, #tpu.memory_space<vmem>>, %arg7: memref<3x384x128xbf16, #tpu.memory_space<vmem>>, %arg8: memref<128x128xbf16, #tpu.memory_space<vmem>>, %arg9: memref<1x1x2x128xf32, #tpu.memory_space<vmem>>, %arg10: memref<10x18x128xbf16, #tpu.memory_space<vmem>>) attributes {dimension_semantics = [#tpu.dimension_semantics<parallel>, #tpu.dimension_semantics<parallel>], iteration_bounds = array<i64: 2, 2>, scalar_prefetch = 0 : i64, scratch_operands = 1 : i64, tpu.core_type = #tpu.core_type<tc>, window_params = [{transform_indices = @transform_0, window_bounds = array<i64: 128, 128>}, {transform_indices = @transform_1, window_bounds = array<i64: 16, 128>}, {transform_indices = @transform_2, window_bounds = array<i64: 16, 128>}, {pipeline_mode = #tpu.pipeline_mode<synchronous>, transform_indices = @transform_3, window_bounds = array<i64: 1, 128>}, {pipeline_mode = #tpu.pipeline_mode<synchronous>, transform_indices = @transform_4, window_bounds = array<i64: 1, 128>}, {pipeline_mode = #tpu.pipeline_mode<synchronous>, transform_indices = @transform_5, window_bounds = array<i64: 3, 384, 128>}, {transform_indices = @transform_6, window_bounds = array<i64: 128, 128>}, {transform_indices = @transform_7, window_bounds = array<i64: 1, 1, 2, 128>}]} {
    %c0 = arith.constant 0 : index
    %c0_0 = arith.constant 0 : index
    %0 = vector.load %arg5[%c0, %c0_0] : memref<1x128xf32, #tpu.memory_space<vmem>>, vector<1x128xf32>
    %c0_1 = arith.constant 0 : index
    %c0_2 = arith.constant 0 : index
    %1 = vector.load %arg6[%c0_1, %c0_2] : memref<1x128xf32, #tpu.memory_space<vmem>>, vector<1x128xf32>
    %cst = arith.constant 0.000000e+00 : bf16
    %2 = vector.broadcast %cst : bf16 to vector<16x128xbf16>
    %c0_i32 = arith.constant 0 : i32
    %3 = arith.cmpi sgt, %arg1, %c0_i32 : i32
    %c0_3 = arith.constant 0 : index
    %c0_4 = arith.constant 0 : index
    %4 = vector.load %arg3[%c0_3, %c0_4] : memref<16x128xbf16, #tpu.memory_space<vmem>>, vector<16x128xbf16>
    %5 = arith.extf %4 : vector<16x128xbf16> to vector<16x128xf32>
    %6 = vector.broadcast %0 : vector<1x128xf32> to vector<16x128xf32>
    %7 = arith.mulf %5, %6 : vector<16x128xf32>
    %8 = vector.broadcast %1 : vector<1x128xf32> to vector<16x128xf32>
    %9 = arith.addf %7, %8 : vector<16x128xf32>
    %cst_5 = arith.constant 0.000000e+00 : f32
    %10 = vector.broadcast %cst_5 : f32 to vector<16x128xf32>
    %11 = arith.maximumf %9, %10 : vector<16x128xf32>
    %12 = arith.truncf %11 : vector<16x128xf32> to vector<16x128xbf16>
    %13 = arith.select %3, %12, %2 : vector<16x128xbf16>
    %c1_i32 = arith.constant 1 : i32
    %14 = arith.cmpi slt, %arg1, %c1_i32 : i32
    %c0_6 = arith.constant 0 : index
    %c0_7 = arith.constant 0 : index
    %15 = vector.load %arg4[%c0_6, %c0_7] : memref<16x128xbf16, #tpu.memory_space<vmem>>, vector<16x128xbf16>
    %16 = arith.extf %15 : vector<16x128xbf16> to vector<16x128xf32>
    %17 = vector.broadcast %0 : vector<1x128xf32> to vector<16x128xf32>
    %18 = arith.mulf %16, %17 : vector<16x128xf32>
    %19 = vector.broadcast %1 : vector<1x128xf32> to vector<16x128xf32>
    %20 = arith.addf %18, %19 : vector<16x128xf32>
    %cst_8 = arith.constant 0.000000e+00 : f32
    %21 = vector.broadcast %cst_8 : f32 to vector<16x128xf32>
    %22 = arith.maximumf %20, %21 : vector<16x128xf32>
    %23 = arith.truncf %22 : vector<16x128xf32> to vector<16x128xbf16>
    %24 = arith.select %14, %23, %2 : vector<16x128xbf16>
    %cst_9 = arith.constant 0.000000e+00 : bf16
    %25 = vector.broadcast %cst_9 : bf16 to vector<10x1x128xbf16>
    %c0_10 = arith.constant 0 : index
    %c0_11 = arith.constant 0 : index
    %c0_12 = arith.constant 0 : index
    %26 = vector.load %arg10[%c0_10, %c0_11, %c0_12] : memref<10x18x128xbf16, #tpu.memory_space<vmem>>, vector<10x1x128xbf16>
    tpu.vector_store %arg10[%c0_10, %c0_11, %c0_12], %25 {strides = array<i32>} : memref<10x18x128xbf16, #tpu.memory_space<vmem>>, vector<10x1x128xbf16>,
    %c0_13 = arith.constant 0 : index
    %c17 = arith.constant 17 : index
    %c0_14 = arith.constant 0 : index
    %27 = vector.load %arg10[%c0_13, %c17, %c0_14] : memref<10x18x128xbf16, #tpu.memory_space<vmem>>, vector<10x1x128xbf16>
    tpu.vector_store %arg10[%c0_13, %c17, %c0_14], %25 {strides = array<i32>} : memref<10x18x128xbf16, #tpu.memory_space<vmem>>, vector<10x1x128xbf16>,
    %28 = vector.shape_cast %13 : vector<16x128xbf16> to vector<1x16x128xbf16>
    %c0_15 = arith.constant 0 : index
    %c1 = arith.constant 1 : index
    %c0_16 = arith.constant 0 : index
    %29 = vector.load %arg10[%c0_15, %c1, %c0_16] : memref<10x18x128xbf16, #tpu.memory_space<vmem>>, vector<1x16x128xbf16>
    tpu.vector_store %arg10[%c0_15, %c1, %c0_16], %28 {strides = array<i32>} : memref<10x18x128xbf16, #tpu.memory_space<vmem>>, vector<1x16x128xbf16>,
    %30 = vector.shape_cast %24 : vector<16x128xbf16> to vector<1x16x128xbf16>
    %c9 = arith.constant 9 : index
    %c1_17 = arith.constant 1 : index
    %c0_18 = arith.constant 0 : index
    %31 = vector.load %arg10[%c9, %c1_17, %c0_18] : memref<10x18x128xbf16, #tpu.memory_space<vmem>>, vector<1x16x128xbf16>
    tpu.vector_store %arg10[%c9, %c1_17, %c0_18], %30 {strides = array<i32>} : memref<10x18x128xbf16, #tpu.memory_space<vmem>>, vector<1x16x128xbf16>,
    %c0_19 = arith.constant 0 : index
    %c0_20 = arith.constant 0 : index
    %32 = vector.load %arg2[%c0_19, %c0_20] : memref<128x128xbf16, #tpu.memory_space<vmem>>, vector<128x128xbf16>
    %33 = arith.extf %32 : vector<128x128xbf16> to vector<128x128xf32>
    %34 = vector.broadcast %0 : vector<1x128xf32> to vector<128x128xf32>
    %35 = arith.mulf %33, %34 : vector<128x128xf32>
    %36 = vector.broadcast %1 : vector<1x128xf32> to vector<128x128xf32>
    %37 = arith.addf %35, %36 : vector<128x128xf32>
    %cst_21 = arith.constant 0.000000e+00 : f32
    %38 = vector.broadcast %cst_21 : f32 to vector<128x128xf32>
    %39 = arith.maximumf %37, %38 : vector<128x128xf32>
    %40 = arith.truncf %39 : vector<128x128xf32> to vector<128x128xbf16>
    %41 = vector.shape_cast %40 : vector<128x128xbf16> to vector<8x16x128xbf16>
    %c1_22 = arith.constant 1 : index
    %c1_23 = arith.constant 1 : index
    %c0_24 = arith.constant 0 : index
    %42 = vector.load %arg10[%c1_22, %c1_23, %c0_24] : memref<10x18x128xbf16, #tpu.memory_space<vmem>>, vector<8x16x128xbf16>
    tpu.vector_store %arg10[%c1_22, %c1_23, %c0_24], %41 {strides = array<i32>} : memref<10x18x128xbf16, #tpu.memory_space<vmem>>, vector<8x16x128xbf16>,
    %c0_25 = arith.constant 0 : index
    %c0_26 = arith.constant 0 : index
    %c0_27 = arith.constant 0 : index
    %43 = vector.load %arg10[%c0_25, %c0_26, %c0_27] : memref<10x18x128xbf16, #tpu.memory_space<vmem>>, vector<10x18x128xbf16>
    %c0_28 = arith.constant 0 : index
    %c0_29 = arith.constant 0 : index
    %c0_30 = arith.constant 0 : index
    %44 = vector.load %arg7[%c0_28, %c0_29, %c0_30] : memref<3x384x128xbf16, #tpu.memory_space<vmem>>, vector<3x384x128xbf16>
    %45 = vector.extract_strided_slice %43 {offsets = [0, 0, 0], sizes = [8, 16, 128], strides = [1, 1, 1]} : vector<10x18x128xbf16> to vector<8x16x128xbf16>
    %46 = vector.extract_strided_slice %43 {offsets = [0, 1, 0], sizes = [8, 16, 128], strides = [1, 1, 1]} : vector<10x18x128xbf16> to vector<8x16x128xbf16>
    %47 = vector.extract_strided_slice %43 {offsets = [0, 2, 0], sizes = [8, 16, 128], strides = [1, 1, 1]} : vector<10x18x128xbf16> to vector<8x16x128xbf16>
    %48 = tpu.concatenate %45, %46, %47 in 2 : vector<8x16x128xbf16>, vector<8x16x128xbf16>, vector<8x16x128xbf16> -> vector<8x16x384xbf16>
    %49 = vector.extract_strided_slice %44 {offsets = [0, 0, 0], sizes = [1, 384, 128], strides = [1, 1, 1]} : vector<3x384x128xbf16> to vector<1x384x128xbf16>
    %50 = vector.shape_cast %49 : vector<1x384x128xbf16> to vector<384x128xbf16>
    %cst_31 = arith.constant dense<0.000000e+00> : vector<8x16x128xf32>
    %51 = tpu.matmul %48, %50, %cst_31 {dimension_numbers = #tpu.dot_dimension_numbers<[2], [0], [0, 1], [1], [0, 0, 0, 1, 1, 1], [], []>} : vector<8x16x384xbf16>, vector<384x128xbf16>, vector<8x16x128xf32> -> vector<8x16x128xf32>
    %52 = vector.extract_strided_slice %43 {offsets = [1, 0, 0], sizes = [8, 16, 128], strides = [1, 1, 1]} : vector<10x18x128xbf16> to vector<8x16x128xbf16>
    %53 = vector.extract_strided_slice %43 {offsets = [1, 1, 0], sizes = [8, 16, 128], strides = [1, 1, 1]} : vector<10x18x128xbf16> to vector<8x16x128xbf16>
    %54 = vector.extract_strided_slice %43 {offsets = [1, 2, 0], sizes = [8, 16, 128], strides = [1, 1, 1]} : vector<10x18x128xbf16> to vector<8x16x128xbf16>
    %55 = tpu.concatenate %52, %53, %54 in 2 : vector<8x16x128xbf16>, vector<8x16x128xbf16>, vector<8x16x128xbf16> -> vector<8x16x384xbf16>
    %56 = vector.extract_strided_slice %44 {offsets = [1, 0, 0], sizes = [1, 384, 128], strides = [1, 1, 1]} : vector<3x384x128xbf16> to vector<1x384x128xbf16>
    %57 = vector.shape_cast %56 : vector<1x384x128xbf16> to vector<384x128xbf16>
    %cst_32 = arith.constant dense<0.000000e+00> : vector<8x16x128xf32>
    %58 = tpu.matmul %55, %57, %cst_32 {dimension_numbers = #tpu.dot_dimension_numbers<[2], [0], [0, 1], [1], [0, 0, 0, 1, 1, 1], [], []>} : vector<8x16x384xbf16>, vector<384x128xbf16>, vector<8x16x128xf32> -> vector<8x16x128xf32>
    %59 = arith.addf %51, %58 : vector<8x16x128xf32>
    %60 = vector.extract_strided_slice %43 {offsets = [2, 0, 0], sizes = [8, 16, 128], strides = [1, 1, 1]} : vector<10x18x128xbf16> to vector<8x16x128xbf16>
    %61 = vector.extract_strided_slice %43 {offsets = [2, 1, 0], sizes = [8, 16, 128], strides = [1, 1, 1]} : vector<10x18x128xbf16> to vector<8x16x128xbf16>
    %62 = vector.extract_strided_slice %43 {offsets = [2, 2, 0], sizes = [8, 16, 128], strides = [1, 1, 1]} : vector<10x18x128xbf16> to vector<8x16x128xbf16>
    %63 = tpu.concatenate %60, %61, %62 in 2 : vector<8x16x128xbf16>, vector<8x16x128xbf16>, vector<8x16x128xbf16> -> vector<8x16x384xbf16>
    %64 = vector.extract_strided_slice %44 {offsets = [2, 0, 0], sizes = [1, 384, 128], strides = [1, 1, 1]} : vector<3x384x128xbf16> to vector<1x384x128xbf16>
    %65 = vector.shape_cast %64 : vector<1x384x128xbf16> to vector<384x128xbf16>
    %cst_33 = arith.constant dense<0.000000e+00> : vector<8x16x128xf32>
    %66 = tpu.matmul %63, %65, %cst_33 {dimension_numbers = #tpu.dot_dimension_numbers<[2], [0], [0, 1], [1], [0, 0, 0, 1, 1, 1], [], []>} : vector<8x16x384xbf16>, vector<384x128xbf16>, vector<8x16x128xf32> -> vector<8x16x128xf32>
    %67 = arith.addf %59, %66 : vector<8x16x128xf32>
    %68 = vector.shape_cast %67 : vector<8x16x128xf32> to vector<128x128xf32>
    %69 = arith.truncf %68 : vector<128x128xf32> to vector<128x128xbf16>
    %c0_34 = arith.constant 0 : index
    %c0_35 = arith.constant 0 : index
    %70 = vector.load %arg8[%c0_34, %c0_35] : memref<128x128xbf16, #tpu.memory_space<vmem>>, vector<128x128xbf16>
    tpu.vector_store %arg8[%c0_34, %c0_35], %69 {strides = array<i32>} : memref<128x128xbf16, #tpu.memory_space<vmem>>, vector<128x128xbf16>,
    %cst_36 = arith.constant dense<0.000000e+00> : vector<128xf32>
    %71 = vector.multi_reduction <add>, %68, %cst_36 [0] : vector<128x128xf32> to vector<128xf32>
    %72 = vector.shape_cast %71 : vector<128xf32> to vector<1x128xf32>
    %73 = arith.mulf %68, %68 : vector<128x128xf32>
    %cst_37 = arith.constant dense<0.000000e+00> : vector<128xf32>
    %74 = vector.multi_reduction <add>, %73, %cst_37 [0] : vector<128x128xf32> to vector<128xf32>
    %75 = vector.shape_cast %74 : vector<128xf32> to vector<1x128xf32>
    %76 = tpu.concatenate %72, %75 in 0 : vector<1x128xf32>, vector<1x128xf32> -> vector<2x128xf32>
    %77 = vector.shape_cast %76 : vector<2x128xf32> to vector<1x1x2x128xf32>
    %c0_38 = arith.constant 0 : index
    %c0_39 = arith.constant 0 : index
    %c0_40 = arith.constant 0 : index
    %c0_41 = arith.constant 0 : index
    %78 = vector.load %arg9[%c0_38, %c0_39, %c0_40, %c0_41] : memref<1x1x2x128xf32, #tpu.memory_space<vmem>>, vector<1x1x2x128xf32>
    tpu.vector_store %arg9[%c0_38, %c0_39, %c0_40, %c0_41], %77 {strides = array<i32>} : memref<1x1x2x128xf32, #tpu.memory_space<vmem>>, vector<1x1x2x128xf32>,
    return
  }
  func.func @transform_0(%arg0: i32, %arg1: i32) -> (i32, i32) {
    %c2_i32 = arith.constant 2 : i32
    %0 = arith.muli %arg0, %c2_i32 : i32
    %1 = arith.addi %0, %arg1 : i32
    %c0_i32 = arith.constant 0 : i32
    %c0_i32_0 = arith.constant 0 : i32
    return %1, %c0_i32 : i32, i32
  }
  func.func @transform_1(%arg0: i32, %arg1: i32) -> (i32, i32) {
    %c2_i32 = arith.constant 2 : i32
    %0 = arith.muli %arg0, %c2_i32 : i32
    %1 = arith.addi %0, %arg1 : i32
    %c8_i32 = arith.constant 8 : i32
    %2 = arith.muli %1, %c8_i32 : i32
    %c1_i32 = arith.constant 1 : i32
    %3 = arith.subi %2, %c1_i32 : i32
    %c0_i32 = arith.constant 0 : i32
    %4 = arith.maxsi %3, %c0_i32 : i32
    %c0_i32_0 = arith.constant 0 : i32
    %c0_i32_1 = arith.constant 0 : i32
    return %4, %c0_i32_0 : i32, i32
  }
  func.func @transform_2(%arg0: i32, %arg1: i32) -> (i32, i32) {
    %c2_i32 = arith.constant 2 : i32
    %0 = arith.muli %arg0, %c2_i32 : i32
    %1 = arith.addi %0, %arg1 : i32
    %c1_i32 = arith.constant 1 : i32
    %2 = arith.addi %1, %c1_i32 : i32
    %c8_i32 = arith.constant 8 : i32
    %3 = arith.muli %2, %c8_i32 : i32
    %c31_i32 = arith.constant 31 : i32
    %4 = arith.minsi %3, %c31_i32 : i32
    %c0_i32 = arith.constant 0 : i32
    %c0_i32_0 = arith.constant 0 : i32
    return %4, %c0_i32 : i32, i32
  }
  func.func @transform_3(%arg0: i32, %arg1: i32) -> (i32, i32) {
    %c0_i32 = arith.constant 0 : i32
    %c0_i32_0 = arith.constant 0 : i32
    %c0_i32_1 = arith.constant 0 : i32
    return %c0_i32, %c0_i32_0 : i32, i32
  }
  func.func @transform_4(%arg0: i32, %arg1: i32) -> (i32, i32) {
    %c0_i32 = arith.constant 0 : i32
    %c0_i32_0 = arith.constant 0 : i32
    %c0_i32_1 = arith.constant 0 : i32
    return %c0_i32, %c0_i32_0 : i32, i32
  }
  func.func @transform_5(%arg0: i32, %arg1: i32) -> (i32, i32, i32) {
    %c0_i32 = arith.constant 0 : i32
    %c0_i32_0 = arith.constant 0 : i32
    %c0_i32_1 = arith.constant 0 : i32
    %c0_i32_2 = arith.constant 0 : i32
    return %c0_i32, %c0_i32_0, %c0_i32_1 : i32, i32, i32
  }
  func.func @transform_6(%arg0: i32, %arg1: i32) -> (i32, i32) {
    %c2_i32 = arith.constant 2 : i32
    %0 = arith.muli %arg0, %c2_i32 : i32
    %1 = arith.addi %0, %arg1 : i32
    %c0_i32 = arith.constant 0 : i32
    %c0_i32_0 = arith.constant 0 : i32
    return %1, %c0_i32 : i32, i32
  }
  func.func @transform_7(%arg0: i32, %arg1: i32) -> (i32, i32, i32, i32) {
    %c0_i32 = arith.constant 0 : i32
    %c0_i32_0 = arith.constant 0 : i32
    %c0_i32_1 = arith.constant 0 : i32
    return %arg0, %arg1, %c0_i32, %c0_i32_0 : i32, i32, i32, i32
  }
}

module attributes {stable_mosaic.version = 11 : i64} {
  func.func @_bn_add_relu_kernel(%arg0: i32, %arg1: memref<512x128xbf16, #tpu.memory_space<vmem>>, %arg2: memref<512x128xf32, #tpu.memory_space<vmem>>, %arg3: memref<1x128xf32, #tpu.memory_space<vmem>>, %arg4: memref<1x128xf32, #tpu.memory_space<vmem>>, %arg5: memref<512x128xf32, #tpu.memory_space<vmem>>) attributes {dimension_semantics = [#tpu.dimension_semantics<parallel>], iteration_bounds = array<i64: 1>, scalar_prefetch = 0 : i64, scratch_operands = 0 : i64, tpu.core_type = #tpu.core_type<tc>, window_params = [{transform_indices = @transform_0, window_bounds = array<i64: 512, 128>}, {transform_indices = @transform_1, window_bounds = array<i64: 512, 128>}, {pipeline_mode = #tpu.pipeline_mode<synchronous>, transform_indices = @transform_2, window_bounds = array<i64: 1, 128>}, {pipeline_mode = #tpu.pipeline_mode<synchronous>, transform_indices = @transform_3, window_bounds = array<i64: 1, 128>}, {transform_indices = @transform_4, window_bounds = array<i64: 512, 128>}]} {
    %c0 = arith.constant 0 : index
    %c0_0 = arith.constant 0 : index
    %0 = vector.load %arg1[%c0, %c0_0] : memref<512x128xbf16, #tpu.memory_space<vmem>>, vector<512x128xbf16>
    %1 = arith.extf %0 : vector<512x128xbf16> to vector<512x128xf32>
    %c0_1 = arith.constant 0 : index
    %c0_2 = arith.constant 0 : index
    %2 = vector.load %arg3[%c0_1, %c0_2] : memref<1x128xf32, #tpu.memory_space<vmem>>, vector<1x128xf32>
    %3 = vector.broadcast %2 : vector<1x128xf32> to vector<512x128xf32>
    %4 = arith.mulf %1, %3 : vector<512x128xf32>
    %c0_3 = arith.constant 0 : index
    %c0_4 = arith.constant 0 : index
    %5 = vector.load %arg4[%c0_3, %c0_4] : memref<1x128xf32, #tpu.memory_space<vmem>>, vector<1x128xf32>
    %6 = vector.broadcast %5 : vector<1x128xf32> to vector<512x128xf32>
    %7 = arith.addf %4, %6 : vector<512x128xf32>
    %c0_5 = arith.constant 0 : index
    %c0_6 = arith.constant 0 : index
    %8 = vector.load %arg2[%c0_5, %c0_6] : memref<512x128xf32, #tpu.memory_space<vmem>>, vector<512x128xf32>
    %9 = arith.addf %7, %8 : vector<512x128xf32>
    %cst = arith.constant 0.000000e+00 : f32
    %10 = vector.broadcast %cst : f32 to vector<512x128xf32>
    %11 = arith.maximumf %9, %10 : vector<512x128xf32>
    %c0_7 = arith.constant 0 : index
    %c0_8 = arith.constant 0 : index
    %12 = vector.load %arg5[%c0_7, %c0_8] : memref<512x128xf32, #tpu.memory_space<vmem>>, vector<512x128xf32>
    tpu.vector_store %arg5[%c0_7, %c0_8], %11 {strides = array<i32>} : memref<512x128xf32, #tpu.memory_space<vmem>>, vector<512x128xf32>,
    return
  }
  func.func @transform_0(%arg0: i32) -> (i32, i32) {
    %c0_i32 = arith.constant 0 : i32
    %c0_i32_0 = arith.constant 0 : i32
    return %arg0, %c0_i32 : i32, i32
  }
  func.func @transform_1(%arg0: i32) -> (i32, i32) {
    %c0_i32 = arith.constant 0 : i32
    %c0_i32_0 = arith.constant 0 : i32
    return %arg0, %c0_i32 : i32, i32
  }
  func.func @transform_2(%arg0: i32) -> (i32, i32) {
    %c0_i32 = arith.constant 0 : i32
    %c0_i32_0 = arith.constant 0 : i32
    %c0_i32_1 = arith.constant 0 : i32
    return %c0_i32, %c0_i32_0 : i32, i32
  }
  func.func @transform_3(%arg0: i32) -> (i32, i32) {
    %c0_i32 = arith.constant 0 : i32
    %c0_i32_0 = arith.constant 0 : i32
    %c0_i32_1 = arith.constant 0 : i32
    return %c0_i32, %c0_i32_0 : i32, i32
  }
  func.func @transform_4(%arg0: i32) -> (i32, i32) {
    %c0_i32 = arith.constant 0 : i32
    %c0_i32_0 = arith.constant 0 : i32
    return %arg0, %c0_i32 : i32, i32
  }
}

module attributes {stable_mosaic.version = 11 : i64} {
  func.func @_bn_relu_conv1x1_stats_kernel(%arg0: i32, %arg1: memref<512x128xbf16, #tpu.memory_space<vmem>>, %arg2: memref<1x128xf32, #tpu.memory_space<vmem>>, %arg3: memref<1x128xf32, #tpu.memory_space<vmem>>, %arg4: memref<128x128xbf16, #tpu.memory_space<vmem>>, %arg5: memref<512x128xbf16, #tpu.memory_space<vmem>>, %arg6: memref<1x2x128xf32, #tpu.memory_space<vmem>>) attributes {dimension_semantics = [#tpu.dimension_semantics<parallel>], iteration_bounds = array<i64: 1>, scalar_prefetch = 0 : i64, scratch_operands = 0 : i64, tpu.core_type = #tpu.core_type<tc>, window_params = [{transform_indices = @transform_0, window_bounds = array<i64: 512, 128>}, {pipeline_mode = #tpu.pipeline_mode<synchronous>, transform_indices = @transform_1, window_bounds = array<i64: 1, 128>}, {pipeline_mode = #tpu.pipeline_mode<synchronous>, transform_indices = @transform_2, window_bounds = array<i64: 1, 128>}, {pipeline_mode = #tpu.pipeline_mode<synchronous>, transform_indices = @transform_3, window_bounds = array<i64: 128, 128>}, {transform_indices = @transform_4, window_bounds = array<i64: 512, 128>}, {transform_indices = @transform_5, window_bounds = array<i64: 1, 2, 128>}]} {
    %c0 = arith.constant 0 : index
    %c0_0 = arith.constant 0 : index
    %0 = vector.load %arg1[%c0, %c0_0] : memref<512x128xbf16, #tpu.memory_space<vmem>>, vector<512x128xbf16>
    %1 = arith.extf %0 : vector<512x128xbf16> to vector<512x128xf32>
    %c0_1 = arith.constant 0 : index
    %c0_2 = arith.constant 0 : index
    %2 = vector.load %arg2[%c0_1, %c0_2] : memref<1x128xf32, #tpu.memory_space<vmem>>, vector<1x128xf32>
    %3 = vector.broadcast %2 : vector<1x128xf32> to vector<512x128xf32>
    %4 = arith.mulf %1, %3 : vector<512x128xf32>
    %c0_3 = arith.constant 0 : index
    %c0_4 = arith.constant 0 : index
    %5 = vector.load %arg3[%c0_3, %c0_4] : memref<1x128xf32, #tpu.memory_space<vmem>>, vector<1x128xf32>
    %6 = vector.broadcast %5 : vector<1x128xf32> to vector<512x128xf32>
    %7 = arith.addf %4, %6 : vector<512x128xf32>
    %cst = arith.constant 0.000000e+00 : f32
    %8 = vector.broadcast %cst : f32 to vector<512x128xf32>
    %9 = arith.maximumf %7, %8 : vector<512x128xf32>
    %10 = arith.truncf %9 : vector<512x128xf32> to vector<512x128xbf16>
    %c0_5 = arith.constant 0 : index
    %c0_6 = arith.constant 0 : index
    %11 = vector.load %arg4[%c0_5, %c0_6] : memref<128x128xbf16, #tpu.memory_space<vmem>>, vector<128x128xbf16>
    %cst_7 = arith.constant dense<0.000000e+00> : vector<512x128xf32>
    %12 = tpu.matmul %10, %11, %cst_7 {dimension_numbers = #tpu.dot_dimension_numbers<[1], [0], [0], [1], [0, 0, 1, 1], [], []>} : vector<512x128xbf16>, vector<128x128xbf16>, vector<512x128xf32> -> vector<512x128xf32>
    %13 = arith.truncf %12 : vector<512x128xf32> to vector<512x128xbf16>
    %c0_8 = arith.constant 0 : index
    %c0_9 = arith.constant 0 : index
    %14 = vector.load %arg5[%c0_8, %c0_9] : memref<512x128xbf16, #tpu.memory_space<vmem>>, vector<512x128xbf16>
    tpu.vector_store %arg5[%c0_8, %c0_9], %13 {strides = array<i32>} : memref<512x128xbf16, #tpu.memory_space<vmem>>, vector<512x128xbf16>,
    %cst_10 = arith.constant dense<0.000000e+00> : vector<128xf32>
    %15 = vector.multi_reduction <add>, %12, %cst_10 [0] : vector<512x128xf32> to vector<128xf32>
    %16 = vector.shape_cast %15 : vector<128xf32> to vector<1x128xf32>
    %17 = arith.mulf %12, %12 : vector<512x128xf32>
    %cst_11 = arith.constant dense<0.000000e+00> : vector<128xf32>
    %18 = vector.multi_reduction <add>, %17, %cst_11 [0] : vector<512x128xf32> to vector<128xf32>
    %19 = vector.shape_cast %18 : vector<128xf32> to vector<1x128xf32>
    %20 = tpu.concatenate %16, %19 in 0 : vector<1x128xf32>, vector<1x128xf32> -> vector<2x128xf32>
    %21 = vector.shape_cast %20 : vector<2x128xf32> to vector<1x2x128xf32>
    %c0_12 = arith.constant 0 : index
    %c0_13 = arith.constant 0 : index
    %c0_14 = arith.constant 0 : index
    %22 = vector.load %arg6[%c0_12, %c0_13, %c0_14] : memref<1x2x128xf32, #tpu.memory_space<vmem>>, vector<1x2x128xf32>
    tpu.vector_store %arg6[%c0_12, %c0_13, %c0_14], %21 {strides = array<i32>} : memref<1x2x128xf32, #tpu.memory_space<vmem>>, vector<1x2x128xf32>,
    return
  }
  func.func @transform_0(%arg0: i32) -> (i32, i32) {
    %c0_i32 = arith.constant 0 : i32
    %c0_i32_0 = arith.constant 0 : i32
    return %arg0, %c0_i32 : i32, i32
  }
  func.func @transform_1(%arg0: i32) -> (i32, i32) {
    %c0_i32 = arith.constant 0 : i32
    %c0_i32_0 = arith.constant 0 : i32
    %c0_i32_1 = arith.constant 0 : i32
    return %c0_i32, %c0_i32_0 : i32, i32
  }
  func.func @transform_2(%arg0: i32) -> (i32, i32) {
    %c0_i32 = arith.constant 0 : i32
    %c0_i32_0 = arith.constant 0 : i32
    %c0_i32_1 = arith.constant 0 : i32
    return %c0_i32, %c0_i32_0 : i32, i32
  }
  func.func @transform_3(%arg0: i32) -> (i32, i32) {
    %c0_i32 = arith.constant 0 : i32
    %c0_i32_0 = arith.constant 0 : i32
    %c0_i32_1 = arith.constant 0 : i32
    return %c0_i32, %c0_i32_0 : i32, i32
  }
  func.func @transform_4(%arg0: i32) -> (i32, i32) {
    %c0_i32 = arith.constant 0 : i32
    %c0_i32_0 = arith.constant 0 : i32
    return %arg0, %c0_i32 : i32, i32
  }
  func.func @transform_5(%arg0: i32) -> (i32, i32, i32) {
    %c0_i32 = arith.constant 0 : i32
    %c0_i32_0 = arith.constant 0 : i32
    %c0_i32_1 = arith.constant 0 : i32
    return %arg0, %c0_i32, %c0_i32_0 : i32, i32, i32
  }
}

</mosaic_0001>

<bundles_post_ra>
// kernel: bottleneck_forward.4
= control target key start
LH: loop header
LB: loop body
LE: loop exit
PB: predicated region body
PF: predicated region fallthrough
CT: control target
= control target key end

     0   :  { %vm985_vm0 = vcmask 1040384   ;;  %s1994_s1 = inlined_call_operand.vmem [shape: bf16[128,128], index: 1, kind: input, shape index: {}]   ;;  %s1995_s0 = inlined_call_operand.vmem [shape: f32[512,128], index: 0, kind: input, shape index: {}]   ;;  %s1996_s2 = inlined_call_operand.vmem [shape: bf16[512,128], index: 2, kind: output, shape index: {0}]   ;;  %s1997_s3 = inlined_call_operand.vmem [shape: f32[1,2,128], index: 3, kind: output, shape index: {1}]  }
   0x1   :  { %v1459_v0 = vld [vmem:[%s1994_s1] sm:$0xff]   ;;  %v1460_v1 = vld [vmem:[%s1994_s1 + $0x8] sm:$0xff]   ;;  %v1461_v2 = vld [vmem:[%s1994_s1 + $0x10] sm:$0xff]  }
   0x2   :  { %1363 = vmatprep.subr.bf16.mxu0 %v1459_v0  ;;  %1443 = vmatprep.subr.bf16.mxu1 %v1459_v0  ;;  %v1462_v3 = vld [vmem:[%s1994_s1 + $0x18] sm:$0xff]   ;;  %v14_v4 = vld [vmem:[%s1995_s0] sm:$0xff]  ;;  %v15_v5 = vld [vmem:[%s1995_s0 + $0x8] sm:$0xff] }
   0x3   :  { %1364 = vmatpush3.bf16.msra.mxu0 %v1459_v0  ;;  %1451 = vmatpush3.bf16.msra.mxu1 %v1459_v0  ;;  %v78_v6 = vpack.c.bf16 %v15_v5, %v14_v4  ;;  %v1463_v7 = vld [vmem:[%s1994_s1 + $0x20] sm:$0xff]   ;;  %v1464_v8 = vld [vmem:[%s1994_s1 + $0x28] sm:$0xff]   ;;  %v1465_v11 = vld [vmem:[%s1994_s1 + $0x30] sm:$0xff]  }
   0x4   :  { %1365 = vmatprep.subr.bf16.mxu0 %v1460_v1  ;;  %1444 = vmatprep.subr.bf16.mxu1 %v1460_v1  ;;  %v46_v9 = vld [vmem:[%s1995_s0 + $0x100] sm:$0xff]  ;;  %v47_v10 = vld [vmem:[%s1995_s0 + $0x108] sm:$0xff]  ;;  %v1466_v13 = vld [vmem:[%s1994_s1 + $0x38] sm:$0xff]  }
   0x5   :  { %1379 = vmatprep.mubr.bf16.mxu0 %v78_v6  ;;  %v94_v12 = vpack.c.bf16 %v47_v10, %v46_v9  ;;  %v16_v14 = vld [vmem:[%s1995_s0 + $0x10] sm:$0xff]  ;;  %v17_v15 = vld [vmem:[%s1995_s0 + $0x18] sm:$0xff]  ;;  %v18_v16 = vld [vmem:[%s1995_s0 + $0x20] sm:$0xff] }
   0x6   :  { %v19_v17 = vld [vmem:[%s1995_s0 + $0x28] sm:$0xff]  ;;  %v48_v18 = vld [vmem:[%s1995_s0 + $0x110] sm:$0xff]  ;;  %v49_v19 = vld [vmem:[%s1995_s0 + $0x118] sm:$0xff]  ;;  %v79_v22 = vpack.c.bf16 %v17_v15, %v16_v14 }
   0x7   :  { %1366 = vmatpush3.bf16.msra.mxu0 %v1460_v1  ;;  %1452 = vmatpush3.bf16.msra.mxu1 %v1460_v1  ;;  %v50_v20 = vld [vmem:[%s1995_s0 + $0x120] sm:$0xff]  ;;  %v51_v21 = vld [vmem:[%s1995_s0 + $0x128] sm:$0xff]  ;;  %v80_v23 = vpack.c.bf16 %v19_v17, %v18_v16  ;;  %v95_v24 = vpack.c.bf16 %v49_v19, %v48_v18  ;;  %v20_v26 = vld [vmem:[%s1995_s0 + $0x30] sm:$0xff] }
   0x8   :  { %1367 = vmatprep.subr.bf16.mxu0 %v1461_v2  ;;  %1445 = vmatprep.subr.bf16.mxu1 %v1461_v2  ;;  %v96_v25 = vpack.c.bf16 %v51_v21, %v50_v20  ;;  %v21_v27 = vld [vmem:[%s1995_s0 + $0x38] sm:$0xff]  ;;  %v22_v28 = vld [vmem:[%s1995_s0 + $0x40] sm:$0xff]  ;;  %v23_v29 = vld [vmem:[%s1995_s0 + $0x48] sm:$0xff] }
   0x9   :  { %1411 = vmatprep.mubr.bf16.mxu1 %v94_v12  ;;  %v52_v30 = vld [vmem:[%s1995_s0 + $0x130] sm:$0xff]  ;;  %v53_v31 = vld [vmem:[%s1995_s0 + $0x138] sm:$0xff]  ;;  %v54_v32 = vld [vmem:[%s1995_s0 + $0x140] sm:$0xff]  ;;  %v81_v34 = vpack.c.bf16 %v21_v27, %v20_v26  ;;  %v82_v35 = vpack.c.bf16 %v23_v29, %v22_v28 }
   0xa   :  { %v55_v33 = vld [vmem:[%s1995_s0 + $0x148] sm:$0xff]  ;;  %v97_v36 = vpack.c.bf16 %v53_v31, %v52_v30  ;;  %v24_v38 = vld [vmem:[%s1995_s0 + $0x50] sm:$0xff]  ;;  %v25_v39 = vld [vmem:[%s1995_s0 + $0x58] sm:$0xff] }
   0xb   :  { %1368 = vmatpush3.bf16.msra.mxu0 %v1461_v2  ;;  %1453 = vmatpush3.bf16.msra.mxu1 %v1461_v2  ;;  %v98_v37 = vpack.c.bf16 %v55_v33, %v54_v32  ;;  %v26_v40 = vld [vmem:[%s1995_s0 + $0x60] sm:$0xff]  ;;  %v27_v41 = vld [vmem:[%s1995_s0 + $0x68] sm:$0xff]  ;;  %v56_v42 = vld [vmem:[%s1995_s0 + $0x150] sm:$0xff]  ;;  %v83_v46 = vpack.c.bf16 %v25_v39, %v24_v38 }
   0xc   :  { %1369 = vmatprep.subr.bf16.mxu0 %v1462_v3  ;;  %1446 = vmatprep.subr.bf16.mxu1 %v1462_v3  ;;  %v57_v43 = vld [vmem:[%s1995_s0 + $0x158] sm:$0xff]  ;;  %v58_v44 = vld [vmem:[%s1995_s0 + $0x160] sm:$0xff]  ;;  %v59_v45 = vld [vmem:[%s1995_s0 + $0x168] sm:$0xff]  ;;  %v84_v47 = vpack.c.bf16 %v27_v41, %v26_v40 }
   0xd   :  { %v99_v48 = vpack.c.bf16 %v57_v43, %v56_v42  ;;  %v100_v49 = vpack.c.bf16 %v59_v45, %v58_v44  ;;  %v28_v50 = vld [vmem:[%s1995_s0 + $0x70] sm:$0xff]  ;;  %v29_v51 = vld [vmem:[%s1995_s0 + $0x78] sm:$0xff]  ;;  %v30_v52 = vld [vmem:[%s1995_s0 + $0x80] sm:$0xff] }
   0xe   :  { %v31_v53 = vld [vmem:[%s1995_s0 + $0x88] sm:$0xff]  ;;  %v60_v54 = vld [vmem:[%s1995_s0 + $0x170] sm:$0xff]  ;;  %v61_v55 = vld [vmem:[%s1995_s0 + $0x178] sm:$0xff]  ;;  %v85_v58 = vpack.c.bf16 %v29_v51, %v28_v50 }
   0xf   :  { %1370 = vmatpush3.bf16.msra.mxu0 %v1462_v3  ;;  %1454 = vmatpush3.bf16.msra.mxu1 %v1462_v3  ;;  %v62_v56 = vld [vmem:[%s1995_s0 + $0x180] sm:$0xff]  ;;  %v63_v57 = vld [vmem:[%s1995_s0 + $0x188] sm:$0xff]  ;;  %v86_v59 = vpack.c.bf16 %v31_v53, %v30_v52  ;;  %v101_v60 = vpack.c.bf16 %v61_v55, %v60_v54  ;;  %v32_v62 = vld [vmem:[%s1995_s0 + $0x90] sm:$0xff] }
  0x10   :  { %1371 = vmatprep.subr.bf16.mxu0 %v1463_v7  ;;  %1447 = vmatprep.subr.bf16.mxu1 %v1463_v7  ;;  %v102_v61 = vpack.c.bf16 %v63_v57, %v62_v56  ;;  %v33_v63 = vld [vmem:[%s1995_s0 + $0x98] sm:$0xff]  ;;  %v34_v0 = vld [vmem:[%s1995_s0 + $0xa0] sm:$0xff]  ;;  %v35_v1 = vld [vmem:[%s1995_s0 + $0xa8] sm:$0xff] }
  0x11   :  { %v64_v2 = vld [vmem:[%s1995_s0 + $0x190] sm:$0xff]  ;;  %v65_v3 = vld [vmem:[%s1995_s0 + $0x198] sm:$0xff]  ;;  %v66_v4 = vld [vmem:[%s1995_s0 + $0x1a0] sm:$0xff]  ;;  %v87_v6 = vpack.c.bf16 %v33_v63, %v32_v62 }
  0x12   :  { %v67_v5 = vld [vmem:[%s1995_s0 + $0x1a8] sm:$0xff]  ;;  %v36_v10 = vld [vmem:[%s1995_s0 + $0xb0] sm:$0xff]  ;;  %v38_v12 = vld [vmem:[%s1995_s0 + $0xc0] sm:$0xff] }
  0x13   :  { %1372 = vmatpush3.bf16.msra.mxu0 %v1463_v7  ;;  %1455 = vmatpush3.bf16.msra.mxu1 %v1463_v7  ;;  %v88_v7 = vpack.c.bf16 %v35_v1, %v34_v0  ;;  %v104_v9 = vpack.c.bf16 %v67_v5, %v66_v4  ;;  %v68_v14 = vld [vmem:[%s1995_s0 + $0x1b0] sm:$0xff]  ;;  %v69_v15 = vld [vmem:[%s1995_s0 + $0x1b8] sm:$0xff]  ;;  %v70_v16 = vld [vmem:[%s1995_s0 + $0x1c0] sm:$0xff] }
  0x14   :  { %1373 = vmatprep.subr.bf16.mxu0 %v1464_v8  ;;  %1448 = vmatprep.subr.bf16.mxu1 %v1464_v8  ;;  %v71_v17 = vld [vmem:[%s1995_s0 + $0x1c8] sm:$0xff]  ;;  %v105_v20 = vpack.c.bf16 %v69_v15, %v68_v14  ;;  %v72_v26 = vld [vmem:[%s1995_s0 + $0x1d0] sm:$0xff]  ;;  %v73_v27 = vld [vmem:[%s1995_s0 + $0x1d8] sm:$0xff] }
  0x15   :  { %v106_v21 = vpack.c.bf16 %v71_v17, %v70_v16  ;;  %v74_v28 = vld [vmem:[%s1995_s0 + $0x1e0] sm:$0xff]  ;;  %v75_v29 = vld [vmem:[%s1995_s0 + $0x1e8] sm:$0xff]  ;;  %v107_v32 = vpack.c.bf16 %v73_v27, %v72_v26 }
  0x16   :  { %v108_v33 = vpack.c.bf16 %v75_v29, %v74_v28 }
  0x17   :  { %1374 = vmatpush3.bf16.msra.mxu0 %v1464_v8  ;;  %1456 = vmatpush3.bf16.msra.mxu1 %v1464_v8  ;;  %v103_v8 = vpack.c.bf16 %v65_v3, %v64_v2 }
  0x18   :  { %1375 = vmatprep.subr.bf16.mxu0 %v1465_v11  ;;  %1449 = vmatprep.subr.bf16.mxu1 %v1465_v11 }
  0x1b   :  { %1376 = vmatpush3.bf16.msra.mxu0 %v1465_v11  ;;  %1457 = vmatpush3.bf16.msra.mxu1 %v1465_v11  ;;  %v37_v11 = vld [vmem:[%s1995_s0 + $0xb8] sm:$0xff] }
  0x1c   :  { %1377 = vmatprep.subr.bf16.mxu0 %v1466_v13  ;;  %1450 = vmatprep.subr.bf16.mxu1 %v1466_v13  ;;  %v89_v18 = vpack.c.bf16 %v37_v11, %v36_v10 }
  0x1f   :  { %1378 = vmatpush3.bf16.msra.mxu0 %v1466_v13  ;;  %1458 = vmatpush3.bf16.msra.mxu1 %v1466_v13  ;;  %v39_v13 = vld [vmem:[%s1995_s0 + $0xc8] sm:$0xff] }
  0x20   :  { %v90_v19 = vpack.c.bf16 %v39_v13, %v38_v12 }
  0x22   :  { %1380 = vmatmul.mubr.bf16.vlgmr.msra.gmra.mrb[0].mxu0 %v79_v22  ;;  %1412 = vmatmul.mubr.bf16.vlgmr.msra.gmra.mrb[0].mxu1 %v95_v24  ;;  %v40_v22 = vld [vmem:[%s1995_s0 + $0xd0] sm:$0xff]  ;;  %v42_v24 = vld [vmem:[%s1995_s0 + $0xe0] sm:$0xff] }
  0x23   :  { %1383 = vmatprep.mubr.bf16.mxu0 %v80_v23  ;;  %1415 = vmatprep.mubr.bf16.mxu1 %v96_v25  ;;  %v41_v23 = vld [vmem:[%s1995_s0 + $0xd8] sm:$0xff]  ;;  %v43_v25 = vld [vmem:[%s1995_s0 + $0xe8] sm:$0xff] }
  0x24   :  { %v91_v30 = vpack.c.bf16 %v41_v23, %v40_v22  ;;  %v92_v31 = vpack.c.bf16 %v43_v25, %v42_v24 }
  0x2a   :  { %1384 = vmatmul.mubr.bf16.gmra.mrb[4].mxu0 %v81_v34  ;;  %1416 = vmatmul.mubr.bf16.gmra.mrb[4].mxu1 %v97_v36  ;;  %v44_v34 = vld [vmem:[%s1995_s0 + $0xf0] sm:$0xff] }
  0x2b   :  { %1387 = vmatprep.mubr.bf16.mxu0 %v82_v35  ;;  %1419 = vmatprep.mubr.bf16.mxu1 %v98_v37  ;;  %v45_v35 = vld [vmem:[%s1995_s0 + $0xf8] sm:$0xff]  ;;  %v76_v36 = vld [vmem:[%s1995_s0 + $0x1f0] sm:$0xff] }
  0x2c   :  { %v77_v37 = vld [vmem:[%s1995_s0 + $0x1f8] sm:$0xff]  ;;  %v93_v38 = vpack.c.bf16 %v45_v35, %v44_v34 }
  0x2d   :  { %v109_v39 = vpack.c.bf16 %v77_v37, %v76_v36 }
  0x32   :  { %1388 = vmatmul.mubr.bf16.gmra.mrb[8].mxu0 %v83_v46  ;;  %1420 = vmatmul.mubr.bf16.gmra.mrb[8].mxu1 %v99_v48 }
  0x33   :  { %1391 = vmatprep.mubr.bf16.mxu0 %v84_v47  ;;  %1423 = vmatprep.mubr.bf16.mxu1 %v100_v49 }
  0x3a   :  { %1392 = vmatmul.mubr.bf16.gmra.mrb[12].mxu0 %v85_v58  ;;  %1424 = vmatmul.mubr.bf16.gmra.mrb[12].mxu1 %v101_v60 }
  0x3b   :  { %1395 = vmatprep.mubr.bf16.mxu0 %v86_v59  ;;  %1427 = vmatprep.mubr.bf16.mxu1 %v102_v61 }
  0x42   :  { %1396 = vmatmul.mubr.bf16.gmra.mrb[16].mxu0 %v87_v6  ;;  %1428 = vmatmul.mubr.bf16.gmra.mrb[16].mxu1 %v103_v8 }
  0x43   :  { %1399 = vmatprep.mubr.bf16.mxu0 %v88_v7  ;;  %1431 = vmatprep.mubr.bf16.mxu1 %v104_v9 }
  0x4a   :  { %1400 = vmatmul.mubr.bf16.gmra.mrb[20].mxu0 %v89_v18  ;;  %1432 = vmatmul.mubr.bf16.gmra.mrb[20].mxu1 %v105_v20 }
  0x4b   :  { %1403 = vmatprep.mubr.bf16.mxu0 %v90_v19  ;;  %1435 = vmatprep.mubr.bf16.mxu1 %v106_v21 }
  0x52   :  { %1404 = vmatmul.mubr.bf16.gmra.mrb[24].mxu0 %v91_v30  ;;  %1436 = vmatmul.mubr.bf16.gmra.mrb[24].mxu1 %v107_v32 }
  0x53   :  { %1407 = vmatprep.mubr.bf16.mxu0 %v92_v31  ;;  %1439 = vmatprep.mubr.bf16.mxu1 %v108_v33 }
  0x5a   :  { %1408 = vmatmul.mubr.bf16.gmra.mrb[28].mxu0 %v93_v38  ;;  %1440 = vmatmul.mubr.bf16.gmra.mrb[28].mxu1 %v109_v39 }
  0xf5   :  { %v1381_v40 = vpop.f32.mrb[0].mxu0  ;;  %v1703_v42 = vpop.f32.mrb[0].mxu1 }
  0xf6   :  { %v208_v41 = vpop.f32.mrb[1].mxu0  ;;  %v1705_v44 = vpop.f32.mrb[1].mxu1  ;;  %v854_v55 = vmul.f32 %v1381_v40, %v1381_v40 }
  0xf7   :  { %v1382_v43 = vpop.f32.mrb[2].mxu0  ;;  %v852_v45 = vmul.f32 %v208_v41, %v208_v41  ;;  %v1707_v48 = vpop.f32.mrb[2].mxu1 }
  0xf8   :  { %v1140_v46 = vpack.c.bf16 %v1382_v43, %v1381_v40  ;;  %v211_v47 = vpop.f32.mrb[3].mxu0  ;;  %v1220_v52 = vpack.c.bf16 %v1707_v48, %v1703_v42  ;;  %v1711_v53 = vpop.f32.mrb[3].mxu1  ;;  %v855_v58 = vmul.f32 %v1382_v43, %v1382_v43 }
  0xf9   :  { %v1135_v49 = vpack.c.bf16 %v211_v47, %v208_v41  ;;  %v783_v50 = vadd.f32 %v211_v47, %v208_v41  ;;  %v853_v51 = vmul.f32 %v211_v47, %v211_v47  ;;  %v1215_v54 = vpack.c.bf16 %v1711_v53, %v1705_v44 }
  0xfa   :  { %1292 = vst [vmem:[%s1996_s2 + $0x8] sm:$0xff] %v1140_v46   ;;  %1308 = vst [vmem:[%s1996_s2 + $0x88] sm:$0xff] %v1220_v52  }
  0xfb   :  { %1136 = vst [vmem:[%s1996_s2] sm:$0xff] %v1135_v49   ;;  %v784_v56 = vadd.f32 %v1381_v40, %v783_v50  ;;  %v916_v57 = vadd.f32 %v853_v51, %v852_v45  ;;  %1307 = vst [vmem:[%s1996_s2 + $0x80] sm:$0xff] %v1215_v54  }
  0xfd   :  { %v917_v59 = vadd.f32 %v916_v57, %v854_v55  ;;  %v1385_v60 = vpop.f32.mrb[4].mxu0  ;;  %v785_v61 = vadd.f32 %v1382_v43, %v784_v56  ;;  %v1727_v63 = vpop.f32.mrb[4].mxu1 }
  0xfe   :  { %v224_v62 = vpop.f32.mrb[5].mxu0  ;;  %v1729_v4 = vpop.f32.mrb[5].mxu1  ;;  %v858_v15 = vmul.f32 %v1385_v60, %v1385_v60 }
  0xff   :  { %v786_v0 = vadd.f32 %v785_v61, %v224_v62  ;;  %v856_v1 = vmul.f32 %v224_v62, %v224_v62  ;;  %v918_v2 = vadd.f32 %v917_v59, %v855_v58  ;;  %v1386_v3 = vpop.f32.mrb[6].mxu0  ;;  %v1731_v7 = vpop.f32.mrb[6].mxu1 }
 0x100   :  { %v1150_v5 = vpack.c.bf16 %v1386_v3, %v1385_v60  ;;  %v227_v6 = vpop.f32.mrb[7].mxu0  ;;  %v1733_v12 = vpop.f32.mrb[7].mxu1  ;;  %v1230_v13 = vpack.c.bf16 %v1731_v7, %v1727_v63  ;;  %v859_v18 = vmul.f32 %v1386_v3, %v1386_v3 }
 0x101   :  { %v919_v8 = vadd.f32 %v918_v2, %v856_v1  ;;  %v1145_v9 = vpack.c.bf16 %v227_v6, %v224_v62  ;;  %v787_v10 = vadd.f32 %v786_v0, %v227_v6  ;;  %v857_v11 = vmul.f32 %v227_v6, %v227_v6 }
 0x102   :  { %1294 = vst [vmem:[%s1996_s2 + $0x18] sm:$0xff] %v1150_v5   ;;  %v1225_v14 = vpack.c.bf16 %v1733_v12, %v1729_v4  ;;  %1310 = vst [vmem:[%s1996_s2 + $0x98] sm:$0xff] %v1230_v13  }
 0x103   :  { %1293 = vst [vmem:[%s1996_s2 + $0x10] sm:$0xff] %v1145_v9   ;;  %v788_v16 = vadd.f32 %v1385_v60, %v787_v10  ;;  %v920_v17 = vadd.f32 %v919_v8, %v857_v11 }
 0x104   :  { %1309 = vst [vmem:[%s1996_s2 + $0x90] sm:$0xff] %v1225_v14  }
 0x105   :  { %v921_v19 = vadd.f32 %v920_v17, %v858_v15  ;;  %v1389_v20 = vpop.f32.mrb[8].mxu0  ;;  %v789_v21 = vadd.f32 %v1386_v3, %v788_v16  ;;  %v1751_v23 = vpop.f32.mrb[8].mxu1 }
 0x106   :  { %v240_v22 = vpop.f32.mrb[9].mxu0  ;;  %v1753_v28 = vpop.f32.mrb[9].mxu1  ;;  %v862_v39 = vmul.f32 %v1389_v20, %v1389_v20 }
 0x107   :  { %v790_v24 = vadd.f32 %v789_v21, %v240_v22  ;;  %v860_v25 = vmul.f32 %v240_v22, %v240_v22  ;;  %v922_v26 = vadd.f32 %v921_v19, %v859_v18  ;;  %v1390_v27 = vpop.f32.mrb[10].mxu0  ;;  %v1755_v31 = vpop.f32.mrb[10].mxu1 }
 0x108   :  { %v1160_v29 = vpack.c.bf16 %v1390_v27, %v1389_v20  ;;  %v243_v30 = vpop.f32.mrb[11].mxu0  ;;  %v1757_v36 = vpop.f32.mrb[11].mxu1  ;;  %v1240_v37 = vpack.c.bf16 %v1755_v31, %v1751_v23  ;;  %v863_v43 = vmul.f32 %v1390_v27, %v1390_v27 }
 0x109   :  { %v923_v32 = vadd.f32 %v922_v26, %v860_v25  ;;  %v1155_v33 = vpack.c.bf16 %v243_v30, %v240_v22  ;;  %v791_v34 = vadd.f32 %v790_v24, %v243_v30  ;;  %v861_v35 = vmul.f32 %v243_v30, %v243_v30 }
 0x10a   :  { %1296 = vst [vmem:[%s1996_s2 + $0x28] sm:$0xff] %v1160_v29   ;;  %v1235_v38 = vpack.c.bf16 %v1757_v36, %v1753_v28  ;;  %1312 = vst [vmem:[%s1996_s2 + $0xa8] sm:$0xff] %v1240_v37  }
 0x10b   :  { %1295 = vst [vmem:[%s1996_s2 + $0x20] sm:$0xff] %v1155_v33   ;;  %v792_v40 = vadd.f32 %v1389_v20, %v791_v34  ;;  %v924_v41 = vadd.f32 %v923_v32, %v861_v35 }
 0x10c   :  { %1311 = vst [vmem:[%s1996_s2 + $0xa0] sm:$0xff] %v1235_v38  }
 0x10d   :  { %v925_v45 = vadd.f32 %v924_v41, %v862_v39  ;;  %v1393_v46 = vpop.f32.mrb[12].mxu0  ;;  %v793_v47 = vadd.f32 %v1390_v27, %v792_v40  ;;  %v1775_v50 = vpop.f32.mrb[12].mxu1 }
 0x10e   :  { %v256_v49 = vpop.f32.mrb[13].mxu0  ;;  %v1777_v56 = vpop.f32.mrb[13].mxu1  ;;  %v866_v5 = vmul.f32 %v1393_v46, %v1393_v46 }
 0x10f   :  { %v794_v51 = vadd.f32 %v793_v47, %v256_v49  ;;  %v864_v52 = vmul.f32 %v256_v49, %v256_v49  ;;  %v926_v54 = vadd.f32 %v925_v45, %v863_v43  ;;  %v1394_v55 = vpop.f32.mrb[14].mxu0  ;;  %v1779_v59 = vpop.f32.mrb[14].mxu1 }
 0x110   :  { %v1170_v57 = vpack.c.bf16 %v1394_v55, %v1393_v46  ;;  %v259_v58 = vpop.f32.mrb[15].mxu0  ;;  %v1781_v1 = vpop.f32.mrb[15].mxu1  ;;  %v1250_v2 = vpack.c.bf16 %v1779_v59, %v1775_v50  ;;  %v867_v9 = vmul.f32 %v1394_v55, %v1394_v55 }
 0x111   :  { %v927_v60 = vadd.f32 %v926_v54, %v864_v52  ;;  %v1165_v61 = vpack.c.bf16 %v259_v58, %v256_v49  ;;  %v795_v62 = vadd.f32 %v794_v51, %v259_v58  ;;  %v865_v0 = vmul.f32 %v259_v58, %v259_v58 }
 0x112   :  { %1298 = vst [vmem:[%s1996_s2 + $0x38] sm:$0xff] %v1170_v57   ;;  %v1245_v3 = vpack.c.bf16 %v1781_v1, %v1777_v56  ;;  %1314 = vst [vmem:[%s1996_s2 + $0xb8] sm:$0xff] %v1250_v2  }
 0x113   :  { %1297 = vst [vmem:[%s1996_s2 + $0x30] sm:$0xff] %v1165_v61   ;;  %v796_v6 = vadd.f32 %v1393_v46, %v795_v62  ;;  %v928_v8 = vadd.f32 %v927_v60, %v865_v0 }
 0x114   :  { %1313 = vst [vmem:[%s1996_s2 + $0xb0] sm:$0xff] %v1245_v3  }
 0x115   :  { %v929_v10 = vadd.f32 %v928_v8, %v866_v5  ;;  %v1397_v11 = vpop.f32.mrb[16].mxu0  ;;  %v797_v13 = vadd.f32 %v1394_v55, %v796_v6  ;;  %v1799_v15 = vpop.f32.mrb[16].mxu1 }
 0x116   :  { %v272_v14 = vpop.f32.mrb[17].mxu0  ;;  %v1801_v20 = vpop.f32.mrb[17].mxu1  ;;  %v870_v34 = vmul.f32 %v1397_v11, %v1397_v11 }
 0x117   :  { %v798_v16 = vadd.f32 %v797_v13, %v272_v14  ;;  %v868_v17 = vmul.f32 %v272_v14, %v272_v14  ;;  %v930_v18 = vadd.f32 %v929_v10, %v867_v9  ;;  %v1398_v19 = vpop.f32.mrb[18].mxu0  ;;  %v1803_v24 = vpop.f32.mrb[18].mxu1 }
 0x118   :  { %v1180_v21 = vpack.c.bf16 %v1398_v19, %v1397_v11  ;;  %v275_v22 = vpop.f32.mrb[19].mxu0  ;;  %v1805_v30 = vpop.f32.mrb[19].mxu1  ;;  %v1260_v32 = vpack.c.bf16 %v1803_v24, %v1799_v15  ;;  %v871_v38 = vmul.f32 %v1398_v19, %v1398_v19 }
 0x119   :  { %v931_v25 = vadd.f32 %v930_v18, %v868_v17  ;;  %v1175_v26 = vpack.c.bf16 %v275_v22, %v272_v14  ;;  %v799_v27 = vadd.f32 %v798_v16, %v275_v22  ;;  %v869_v29 = vmul.f32 %v275_v22, %v275_v22 }
 0x11a   :  { %1300 = vst [vmem:[%s1996_s2 + $0x48] sm:$0xff] %v1180_v21   ;;  %v1255_v33 = vpack.c.bf16 %v1805_v30, %v1801_v20  ;;  %1316 = vst [vmem:[%s1996_s2 + $0xc8] sm:$0xff] %v1260_v32  }
 0x11b   :  { %1299 = vst [vmem:[%s1996_s2 + $0x40] sm:$0xff] %v1175_v26   ;;  %v800_v35 = vadd.f32 %v1397_v11, %v799_v27  ;;  %v932_v37 = vadd.f32 %v931_v25, %v869_v29 }
 0x11c   :  { %1315 = vst [vmem:[%s1996_s2 + $0xc0] sm:$0xff] %v1255_v33  }
 0x11d   :  { %v933_v39 = vadd.f32 %v932_v37, %v870_v34  ;;  %v1401_v40 = vpop.f32.mrb[20].mxu0  ;;  %v801_v41 = vadd.f32 %v1398_v19, %v800_v35  ;;  %v1823_v45 = vpop.f32.mrb[20].mxu1 }
 0x11e   :  { %v288_v43 = vpop.f32.mrb[21].mxu0  ;;  %v1825_v52 = vpop.f32.mrb[21].mxu1  ;;  %v874_v5 = vmul.f32 %v1401_v40, %v1401_v40 }
 0x11f   :  { %v802_v46 = vadd.f32 %v801_v41, %v288_v43  ;;  %v872_v47 = vmul.f32 %v288_v43, %v288_v43  ;;  %v934_v49 = vadd.f32 %v933_v39, %v871_v38  ;;  %v1402_v51 = vpop.f32.mrb[22].mxu0  ;;  %v1827_v57 = vpop.f32.mrb[22].mxu1 }
 0x120   :  { %v1190_v54 = vpack.c.bf16 %v1402_v51, %v1401_v40  ;;  %v291_v55 = vpop.f32.mrb[23].mxu0  ;;  %v1829_v0 = vpop.f32.mrb[23].mxu1  ;;  %v1270_v2 = vpack.c.bf16 %v1827_v57, %v1823_v45  ;;  %v875_v9 = vmul.f32 %v1402_v51, %v1402_v51 }
 0x121   :  { %v935_v58 = vadd.f32 %v934_v49, %v872_v47  ;;  %v1185_v60 = vpack.c.bf16 %v291_v55, %v288_v43  ;;  %v803_v61 = vadd.f32 %v802_v46, %v291_v55  ;;  %v873_v62 = vmul.f32 %v291_v55, %v291_v55 }
 0x122   :  { %1302 = vst [vmem:[%s1996_s2 + $0x58] sm:$0xff] %v1190_v54   ;;  %v1265_v3 = vpack.c.bf16 %v1829_v0, %v1825_v52  ;;  %1318 = vst [vmem:[%s1996_s2 + $0xd8] sm:$0xff] %v1270_v2  }
 0x123   :  { %1301 = vst [vmem:[%s1996_s2 + $0x50] sm:$0xff] %v1185_v60   ;;  %v804_v6 = vadd.f32 %v1401_v40, %v803_v61  ;;  %v936_v8 = vadd.f32 %v935_v58, %v873_v62 }
 0x124   :  { %1317 = vst [vmem:[%s1996_s2 + $0xd0] sm:$0xff] %v1265_v3  }
 0x125   :  { %v937_v10 = vadd.f32 %v936_v8, %v874_v5  ;;  %v1405_v11 = vpop.f32.mrb[24].mxu0  ;;  %v805_v13 = vadd.f32 %v1402_v51, %v804_v6  ;;  %v1847_v16 = vpop.f32.mrb[24].mxu1 }
 0x126   :  { %v304_v14 = vpop.f32.mrb[25].mxu0  ;;  %v1849_v22 = vpop.f32.mrb[25].mxu1  ;;  %v878_v39 = vmul.f32 %v1405_v11, %v1405_v11 }
 0x127   :  { %v806_v17 = vadd.f32 %v805_v13, %v304_v14  ;;  %v876_v18 = vmul.f32 %v304_v14, %v304_v14  ;;  %v938_v19 = vadd.f32 %v937_v10, %v875_v9  ;;  %v1406_v21 = vpop.f32.mrb[26].mxu0  ;;  %v1851_v27 = vpop.f32.mrb[26].mxu1 }
 0x128   :  { %v1200_v25 = vpack.c.bf16 %v1406_v21, %v1405_v11  ;;  %v307_v26 = vpop.f32.mrb[27].mxu0  ;;  %v1853_v35 = vpop.f32.mrb[27].mxu1  ;;  %v1280_v37 = vpack.c.bf16 %v1851_v27, %v1847_v16  ;;  %v879_v43 = vmul.f32 %v1406_v21, %v1406_v21 }
 0x129   :  { %v939_v29 = vadd.f32 %v938_v19, %v876_v18  ;;  %v1195_v32 = vpack.c.bf16 %v307_v26, %v304_v14  ;;  %v807_v33 = vadd.f32 %v806_v17, %v307_v26  ;;  %v877_v34 = vmul.f32 %v307_v26, %v307_v26 }
 0x12a   :  { %1304 = vst [vmem:[%s1996_s2 + $0x68] sm:$0xff] %v1200_v25   ;;  %v1275_v38 = vpack.c.bf16 %v1853_v35, %v1849_v22  ;;  %1320 = vst [vmem:[%s1996_s2 + $0xe8] sm:$0xff] %v1280_v37  }
 0x12b   :  { %1303 = vst [vmem:[%s1996_s2 + $0x60] sm:$0xff] %v1195_v32   ;;  %v808_v40 = vadd.f32 %v1405_v11, %v807_v33  ;;  %v940_v41 = vadd.f32 %v939_v29, %v877_v34  ;;  %v884_v29 = vmul.f32 %v1705_v44, %v1705_v44 }
 0x12c   :  { %1319 = vst [vmem:[%s1996_s2 + $0xe0] sm:$0xff] %v1275_v38   ;;  %v885_v38 = vmul.f32 %v1711_v53, %v1711_v53 }
 0x12d   :  { %v941_v46 = vadd.f32 %v940_v41, %v878_v39  ;;  %v1409_v47 = vpop.f32.mrb[28].mxu0  ;;  %v809_v49 = vadd.f32 %v1406_v21, %v808_v40  ;;  %v1871_v54 = vpop.f32.mrb[28].mxu1  ;;  %v886_v39 = vmul.f32 %v1703_v42, %v1703_v42 }
 0x12e   :  { %v320_v51 = vpop.f32.mrb[29].mxu0  ;;  %v1873_v62 = vpop.f32.mrb[29].mxu1  ;;  %v882_v17 = vmul.f32 %v1409_v47, %v1409_v47 }
 0x12f   :  { %v810_v55 = vadd.f32 %v809_v49, %v320_v51  ;;  %v880_v58 = vmul.f32 %v320_v51, %v320_v51  ;;  %v942_v60 = vadd.f32 %v941_v46, %v879_v43  ;;  %v1410_v61 = vpop.f32.mrb[30].mxu0  ;;  %v1875_v5 = vpop.f32.mrb[30].mxu1  ;;  %v887_v43 = vmul.f32 %v1707_v48, %v1707_v48 }
 0x130   :  { %v1210_v2 = vpack.c.bf16 %v1410_v61, %v1409_v47  ;;  %v323_v3 = vpop.f32.mrb[31].mxu0  ;;  %v1877_v11 = vpop.f32.mrb[31].mxu1  ;;  %v1290_v13 = vpack.c.bf16 %v1875_v5, %v1871_v54  ;;  %v883_v21 = vmul.f32 %v1410_v61, %v1410_v61 }
 0x131   :  { %v943_v6 = vadd.f32 %v942_v60, %v880_v58  ;;  %v1205_v8 = vpack.c.bf16 %v323_v3, %v320_v51  ;;  %v811_v9 = vadd.f32 %v810_v55, %v323_v3  ;;  %v881_v10 = vmul.f32 %v323_v3, %v323_v3 }
 0x132   :  { %1306 = vst [vmem:[%s1996_s2 + $0x78] sm:$0xff] %v1210_v2   ;;  %v1285_v14 = vpack.c.bf16 %v1877_v11, %v1873_v62  ;;  %1322 = vst [vmem:[%s1996_s2 + $0xf8] sm:$0xff] %v1290_v13   ;;  %v889_v58 = vmul.f32 %v1733_v12, %v1733_v12 }
 0x133   :  { %1305 = vst [vmem:[%s1996_s2 + $0x70] sm:$0xff] %v1205_v8   ;;  %v812_v18 = vadd.f32 %v1409_v47, %v811_v9  ;;  %v944_v19 = vadd.f32 %v943_v6, %v881_v10  ;;  %v893_v10 = vmul.f32 %v1757_v36, %v1757_v36 }
 0x134   :  { %1321 = vst [vmem:[%s1996_s2 + $0xf0] sm:$0xff] %v1285_v14  }
 0x135   :  { %v945_v25 = vadd.f32 %v944_v19, %v882_v17  ;;  %v813_v26 = vadd.f32 %v1410_v61, %v812_v18 }
 0x137   :  { %v814_v32 = vadd.f32 %v813_v26, %v1705_v44  ;;  %v946_v33 = vadd.f32 %v945_v25, %v883_v21  ;;  %v888_v44 = vmul.f32 %v1729_v4, %v1729_v4  ;;  %v897_v26 = vmul.f32 %v1781_v1, %v1781_v1 }
 0x139   :  { %v947_v34 = vadd.f32 %v946_v33, %v884_v29  ;;  %v815_v37 = vadd.f32 %v814_v32, %v1711_v53 }
 0x13b   :  { %v816_v40 = vadd.f32 %v1703_v42, %v815_v37  ;;  %v948_v41 = vadd.f32 %v947_v34, %v885_v38  ;;  %v890_v42 = vmul.f32 %v1727_v63, %v1727_v63 }
 0x13d   :  { %v949_v46 = vadd.f32 %v948_v41, %v886_v39  ;;  %v817_v47 = vadd.f32 %v1707_v48, %v816_v40  ;;  %v891_v48 = vmul.f32 %v1731_v7, %v1731_v7  ;;  %v901_v40 = vmul.f32 %v1805_v30, %v1805_v30 }
 0x13f   :  { %v818_v49 = vadd.f32 %v817_v47, %v1729_v4  ;;  %v950_v51 = vadd.f32 %v949_v46, %v887_v43  ;;  %v892_v4 = vmul.f32 %v1753_v28, %v1753_v28 }
 0x141   :  { %v951_v55 = vadd.f32 %v950_v51, %v888_v44  ;;  %v819_v53 = vadd.f32 %v818_v49, %v1733_v12 }
 0x143   :  { %v820_v60 = vadd.f32 %v1727_v63, %v819_v53  ;;  %v952_v61 = vadd.f32 %v951_v55, %v889_v58  ;;  %v894_v63 = vmul.f32 %v1751_v23, %v1751_v23  ;;  %v905_v55 = vmul.f32 %v1829_v0, %v1829_v0 }
 0x145   :  { %v953_v2 = vadd.f32 %v952_v61, %v890_v42  ;;  %v821_v3 = vadd.f32 %v1731_v7, %v820_v60  ;;  %v895_v7 = vmul.f32 %v1755_v31, %v1755_v31 }
 0x147   :  { %v822_v6 = vadd.f32 %v821_v3, %v1753_v28  ;;  %v954_v8 = vadd.f32 %v953_v2, %v891_v48  ;;  %v896_v28 = vmul.f32 %v1777_v56, %v1777_v56  ;;  %v909_v3 = vmul.f32 %v1853_v35, %v1853_v35 }
 0x149   :  { %v955_v9 = vadd.f32 %v954_v8, %v892_v4  ;;  %v823_v12 = vadd.f32 %v822_v6, %v1757_v36 }
 0x14b   :  { %v824_v13 = vadd.f32 %v1751_v23, %v823_v12  ;;  %v956_v14 = vadd.f32 %v955_v9, %v893_v10  ;;  %v898_v23 = vmul.f32 %v1775_v50, %v1775_v50 }
 0x14d   :  { %v957_v17 = vadd.f32 %v956_v14, %v894_v63  ;;  %v825_v18 = vadd.f32 %v1755_v31, %v824_v13  ;;  %v899_v31 = vmul.f32 %v1779_v59, %v1779_v59  ;;  %v913_v13 = vmul.f32 %v1877_v11, %v1877_v11 }
 0x14f   :  { %v826_v19 = vadd.f32 %v825_v18, %v1777_v56  ;;  %v958_v21 = vadd.f32 %v957_v17, %v895_v7  ;;  %v900_v56 = vmul.f32 %v1801_v20, %v1801_v20 }
 0x151   :  { %v959_v25 = vadd.f32 %v958_v21, %v896_v28  ;;  %v827_v36 = vadd.f32 %v826_v19, %v1781_v1 }
 0x153   :  { %v828_v29 = vadd.f32 %v1775_v50, %v827_v36  ;;  %v960_v32 = vadd.f32 %v959_v25, %v897_v26  ;;  %v902_v50 = vmul.f32 %v1799_v15, %v1799_v15 }
 0x155   :  { %v961_v33 = vadd.f32 %v960_v32, %v898_v23  ;;  %v829_v34 = vadd.f32 %v1779_v59, %v828_v29  ;;  %v903_v59 = vmul.f32 %v1803_v24, %v1803_v24 }
 0x157   :  { %v830_v37 = vadd.f32 %v829_v34, %v1801_v20  ;;  %v962_v38 = vadd.f32 %v961_v33, %v899_v31  ;;  %v904_v20 = vmul.f32 %v1825_v52, %v1825_v52 }
 0x159   :  { %v963_v39 = vadd.f32 %v962_v38, %v900_v56  ;;  %v831_v1 = vadd.f32 %v830_v37, %v1805_v30 }
 0x15b   :  { %v832_v41 = vadd.f32 %v1799_v15, %v831_v1  ;;  %v964_v43 = vadd.f32 %v963_v39, %v901_v40  ;;  %v906_v15 = vmul.f32 %v1823_v45, %v1823_v45 }
 0x15d   :  { %v965_v46 = vadd.f32 %v964_v43, %v902_v50  ;;  %v833_v47 = vadd.f32 %v1803_v24, %v832_v41  ;;  %v907_v24 = vmul.f32 %v1827_v57, %v1827_v57 }
 0x15f   :  { %v834_v44 = vadd.f32 %v833_v47, %v1825_v52  ;;  %v966_v49 = vadd.f32 %v965_v46, %v903_v59  ;;  %v908_v52 = vmul.f32 %v1849_v22, %v1849_v22 }
 0x161   :  { %v967_v51 = vadd.f32 %v966_v49, %v904_v20  ;;  %v835_v30 = vadd.f32 %v834_v44, %v1829_v0 }
 0x163   :  { %v836_v53 = vadd.f32 %v1823_v45, %v835_v30  ;;  %v968_v58 = vadd.f32 %v967_v51, %v905_v55  ;;  %v910_v45 = vmul.f32 %v1847_v16, %v1847_v16 }
 0x165   :  { %v969_v42 = vadd.f32 %v968_v58, %v906_v15  ;;  %v837_v60 = vadd.f32 %v1827_v57, %v836_v53  ;;  %v911_v57 = vmul.f32 %v1851_v27, %v1851_v27 }
 0x167   :  { %v838_v61 = vadd.f32 %v837_v60, %v1849_v22  ;;  %v970_v48 = vadd.f32 %v969_v42, %v907_v24  ;;  %v912_v22 = vmul.f32 %v1873_v62, %v1873_v62 }
 0x169   :  { %v971_v2 = vadd.f32 %v970_v48, %v908_v52  ;;  %v839_v0 = vadd.f32 %v838_v61, %v1853_v35 }
 0x16b   :  { %v840_v4 = vadd.f32 %v1847_v16, %v839_v0  ;;  %v972_v6 = vadd.f32 %v971_v2, %v909_v3  ;;  %v914_v16 = vmul.f32 %v1871_v54, %v1871_v54 }
 0x16d   :  { %v973_v8 = vadd.f32 %v972_v6, %v910_v45  ;;  %v841_v9 = vadd.f32 %v1851_v27, %v840_v4  ;;  %v915_v27 = vmul.f32 %v1875_v5, %v1875_v5 }
 0x16f   :  { %v842_v12 = vadd.f32 %v841_v9, %v1873_v62  ;;  %v974_v10 = vadd.f32 %v973_v8, %v911_v57 }
 0x171   :  { %v975_v63 = vadd.f32 %v974_v10, %v912_v22  ;;  %v843_v35 = vadd.f32 %v842_v12, %v1877_v11 }
 0x173   :  { %v844_v14 = vadd.f32 %v1871_v54, %v843_v35  ;;  %v976_v7 = vadd.f32 %v975_v63, %v913_v13 }
 0x175   :  { %v845_v17 = vadd.f32 %v1875_v5, %v844_v14  ;;  %v977_v18 = vadd.f32 %v976_v7, %v914_v16 }
 0x177   :  { %v846_v62 = vrot.slane %v845_v17, 4  ;;  %v978_v28 = vadd.f32 %v977_v18, %v915_v27 }
 0x179   :  { %v847_v19 = vadd.f32 %v846_v62, %v845_v17  ;;  %v979_v21 = vrot.slane %v978_v28, 4 }
 0x17b   :  { %v848_v25 = vrot.slane %v847_v19, 2  ;;  %v980_v36 = vadd.f32 %v979_v21, %v978_v28 }
 0x17d   :  { %v849_v26 = vadd.f32 %v848_v25, %v847_v19  ;;  %v981_v11 = vrot.slane %v980_v36, 2 }
 0x17f   :  { %v850_v23 = vrot.slane %v849_v26, 1  ;;  %v982_v29 = vadd.f32 %v981_v11, %v980_v36 }
 0x181   :  { %v983_v32 = vrot.slane %v982_v29, 1  ;;  %v851_v54 = vadd.f32 %v850_v23, %v849_v26 }
 0x183   :  { %v984_v31 = vadd.f32 %v983_v32, %v982_v29 }
 0x185   :  { %v986_v33 = vsel %vm985_vm0, %v851_v54, %v984_v31 }
 0x186   :  { %987 = vst [vmem:[%s1997_s3] sm:$0x3] %v986_v33 }

// kernel: bottleneck_forward.7
= control target key start
LH: loop header
LB: loop body
LE: loop exit
PB: predicated region body
PF: predicated region fallthrough
CT: control target
= control target key end

     0   :  { %s1351_s0 = inlined_call_operand.vmem [shape: bf16[512,128], index: 0, kind: input, shape index: {}]   ;;  %s1352_s2 = inlined_call_operand.vmem [shape: f32[1,128], index: 2, kind: input, shape index: {}]   ;;  %s1353_s3 = inlined_call_operand.vmem [shape: f32[1,128], index: 3, kind: input, shape index: {}]   ;;  %s1354_s1 = inlined_call_operand.vmem [shape: f32[512,128], index: 1, kind: input, shape index: {}]   ;;  %s1355_s4 = inlined_call_operand.vmem [shape: f32[512,128], index: 4, kind: output, shape index: {}]  }
   0x1   :  { %v550_v0 = vld [vmem:[%s1351_s0] sm:$0xff]   ;;  %v677_v4 = vld [vmem:[%s1351_s0 + $0x8] sm:$0xff]   ;;  %v678_v8 = vld [vmem:[%s1351_s0 + $0x10] sm:$0xff]  }
   0x2   :  { %v739_v1 = vld [vmem:[%s1352_s2] ss:$0 sm:$0xff]  ;;  %v551_v2 = vunpack.c.l.bf16 %v550_v0  ;;  %v552_v3 = vunpack.c.h.bf16 %v550_v0  ;;  %v555_v6 = vunpack.c.l.bf16 %v677_v4  ;;  %v556_v7 = vunpack.c.h.bf16 %v677_v4  ;;  %v679_v13 = vld [vmem:[%s1351_s0 + $0x18] sm:$0xff]   ;;  %v288_v15 = vld [vmem:[%s1354_s1 + $0x8] sm:$0xff] }
   0x3   :  { %v747_v5 = vld [vmem:[%s1353_s3] ss:$0 sm:$0xff]  ;;  %v559_v11 = vunpack.c.l.bf16 %v678_v8  ;;  %v560_v12 = vunpack.c.h.bf16 %v678_v8  ;;  %v563_v18 = vunpack.c.l.bf16 %v679_v13  ;;  %v564_v19 = vunpack.c.h.bf16 %v679_v13  ;;  %v289_v22 = vld [vmem:[%s1354_s1 + $0x10] sm:$0xff]  ;;  %v290_v23 = vld [vmem:[%s1354_s1 + $0x18] sm:$0xff] }
   0x4   :  { %v152_v9 = vmul.f32 %v551_v2, %v739_v1  ;;  %v153_v10 = vmul.f32 %v552_v3, %v739_v1  ;;  %v287_v14 = vld [vmem:[%s1354_s1] sm:$0xff]  ;;  %v154_v16 = vmul.f32 %v555_v6, %v739_v1  ;;  %v155_v17 = vmul.f32 %v556_v7, %v739_v1  ;;  %v292_v29 = vld [vmem:[%s1354_s1 + $0x28] sm:$0xff]  ;;  %v293_v36 = vld [vmem:[%s1354_s1 + $0x30] sm:$0xff] }
   0x5   :  { %v156_v24 = vmul.f32 %v559_v11, %v739_v1  ;;  %v157_v25 = vmul.f32 %v560_v12, %v739_v1  ;;  %v291_v28 = vld [vmem:[%s1354_s1 + $0x20] sm:$0xff]  ;;  %v158_v30 = vmul.f32 %v563_v18, %v739_v1  ;;  %v159_v31 = vmul.f32 %v564_v19, %v739_v1  ;;  %v294_v37 = vld [vmem:[%s1354_s1 + $0x38] sm:$0xff]  ;;  %v681_v47 = vld [vmem:[%s1351_s0 + $0x28] sm:$0xff]  }
   0x6   :  { %v223_v20 = vadd.f32 %v747_v5, %v152_v9  ;;  %v224_v21 = vadd.f32 %v747_v5, %v153_v10  ;;  %v225_v26 = vadd.f32 %v747_v5, %v154_v16  ;;  %v226_v27 = vadd.f32 %v747_v5, %v155_v17  ;;  %v680_v42 = vld [vmem:[%s1351_s0 + $0x20] sm:$0xff]   ;;  %v682_v52 = vld [vmem:[%s1351_s0 + $0x30] sm:$0xff]   ;;  %v683_v57 = vld [vmem:[%s1351_s0 + $0x38] sm:$0xff]  }
   0x7   :  { %v227_v34 = vadd.f32 %v747_v5, %v156_v24  ;;  %v228_v35 = vadd.f32 %v747_v5, %v157_v25  ;;  %v229_v40 = vadd.f32 %v747_v5, %v158_v30  ;;  %v230_v41 = vadd.f32 %v747_v5, %v159_v31  ;;  %v295_v3 = vld [vmem:[%s1354_s1 + $0x40] sm:$0xff]  ;;  %v296_v4 = vld [vmem:[%s1354_s1 + $0x48] sm:$0xff]  ;;  %v297_v12 = vld [vmem:[%s1354_s1 + $0x50] sm:$0xff] }
   0x8   :  { %v351_v32 = vadd.f32 %v287_v14, %v223_v20  ;;  %v352_v33 = vadd.f32 %v288_v15, %v224_v21  ;;  %v353_v38 = vadd.f32 %v289_v22, %v225_v26  ;;  %v354_v39 = vadd.f32 %v290_v23, %v226_v27  ;;  %v298_v13 = vld [vmem:[%s1354_s1 + $0x58] sm:$0xff]  ;;  %v299_v18 = vld [vmem:[%s1354_s1 + $0x60] sm:$0xff]  ;;  %v300_v19 = vld [vmem:[%s1354_s1 + $0x68] sm:$0xff] }
   0x9   :  { %v355_v45 = vadd.f32 %v291_v28, %v227_v34  ;;  %v356_v46 = vadd.f32 %v292_v29, %v228_v35  ;;  %v357_v50 = vadd.f32 %v293_v36, %v229_v40  ;;  %v358_v51 = vadd.f32 %v294_v37, %v230_v41  ;;  %v301_v26 = vld [vmem:[%s1354_s1 + $0x70] sm:$0xff]  ;;  %v302_v27 = vld [vmem:[%s1354_s1 + $0x78] sm:$0xff]  ;;  %v685_v37 = vld [vmem:[%s1351_s0 + $0x48] sm:$0xff]  }
   0xa   :  { %v415_v43 = vmax.f32 %v351_v32, 0.0  ;;  %v416_v44 = vmax.f32 %v352_v33, 0.0  ;;  %v417_v48 = vmax.f32 %v353_v38, 0.0  ;;  %v418_v49 = vmax.f32 %v354_v39, 0.0  ;;  %v684_v32 = vld [vmem:[%s1351_s0 + $0x40] sm:$0xff]  }
   0xb   :  { %v419_v53 = vmax.f32 %v355_v45, 0.0  ;;  %v420_v54 = vmax.f32 %v356_v46, 0.0  ;;  %v567_v55 = vunpack.c.l.bf16 %v680_v42  ;;  %v568_v56 = vunpack.c.h.bf16 %v680_v42  ;;  %v686_v42 = vld [vmem:[%s1351_s0 + $0x50] sm:$0xff]  }
   0xc   :  { %479 = vst [vmem:[%s1355_s4] sm:$0xff] %v415_v43  ;;  %480 = vst [vmem:[%s1355_s4 + $0x8] sm:$0xff] %v416_v44  ;;  %v421_v58 = vmax.f32 %v357_v50, 0.0  ;;  %v422_v59 = vmax.f32 %v358_v51, 0.0  ;;  %v571_v60 = vunpack.c.l.bf16 %v681_v47  ;;  %v572_v61 = vunpack.c.h.bf16 %v681_v47  ;;  %v687_v47 = vld [vmem:[%s1351_s0 + $0x58] sm:$0xff]  }
   0xd   :  { %481 = vst [vmem:[%s1355_s4 + $0x10] sm:$0xff] %v417_v48  ;;  %482 = vst [vmem:[%s1355_s4 + $0x18] sm:$0xff] %v418_v49  ;;  %v160_v62 = vmul.f32 %v567_v55, %v739_v1  ;;  %v161_v63 = vmul.f32 %v568_v56, %v739_v1  ;;  %v575_v0 = vunpack.c.l.bf16 %v682_v52  ;;  %v576_v2 = vunpack.c.h.bf16 %v682_v52  ;;  %v303_v56 = vld [vmem:[%s1354_s1 + $0x80] sm:$0xff] }
   0xe   :  { %483 = vst [vmem:[%s1355_s4 + $0x20] sm:$0xff] %v419_v53  ;;  %484 = vst [vmem:[%s1355_s4 + $0x28] sm:$0xff] %v420_v54  ;;  %v162_v6 = vmul.f32 %v571_v60, %v739_v1  ;;  %v163_v7 = vmul.f32 %v572_v61, %v739_v1  ;;  %v579_v8 = vunpack.c.l.bf16 %v683_v57  ;;  %v580_v9 = vunpack.c.h.bf16 %v683_v57  ;;  %v304_v57 = vld [vmem:[%s1354_s1 + $0x88] sm:$0xff] }
   0xf   :  { %485 = vst [vmem:[%s1355_s4 + $0x30] sm:$0xff] %v421_v58  ;;  %486 = vst [vmem:[%s1355_s4 + $0x38] sm:$0xff] %v422_v59  ;;  %v231_v10 = vadd.f32 %v747_v5, %v160_v62  ;;  %v232_v11 = vadd.f32 %v747_v5, %v161_v63  ;;  %v164_v14 = vmul.f32 %v575_v0, %v739_v1  ;;  %v583_v45 = vunpack.c.l.bf16 %v684_v32  ;;  %v305_v0 = vld [vmem:[%s1354_s1 + $0x90] sm:$0xff] }
  0x10   :  { %v165_v15 = vmul.f32 %v576_v2, %v739_v1  ;;  %v233_v16 = vadd.f32 %v747_v5, %v162_v6  ;;  %v234_v17 = vadd.f32 %v747_v5, %v163_v7  ;;  %v166_v20 = vmul.f32 %v579_v8, %v739_v1  ;;  %v306_v2 = vld [vmem:[%s1354_s1 + $0x98] sm:$0xff]  ;;  %v307_v8 = vld [vmem:[%s1354_s1 + $0xa0] sm:$0xff] }
  0x11   :  { %v167_v21 = vmul.f32 %v580_v9, %v739_v1  ;;  %v359_v22 = vadd.f32 %v295_v3, %v231_v10  ;;  %v360_v23 = vadd.f32 %v296_v4, %v232_v11  ;;  %v235_v24 = vadd.f32 %v747_v5, %v164_v14  ;;  %v308_v9 = vld [vmem:[%s1354_s1 + $0xa8] sm:$0xff] }
  0x12   :  { %v236_v25 = vadd.f32 %v747_v5, %v165_v15  ;;  %v361_v28 = vadd.f32 %v297_v12, %v233_v16  ;;  %v362_v29 = vadd.f32 %v298_v13, %v234_v17  ;;  %v237_v30 = vadd.f32 %v747_v5, %v166_v20  ;;  %v309_v16 = vld [vmem:[%s1354_s1 + $0xb0] sm:$0xff]  ;;  %v310_v17 = vld [vmem:[%s1354_s1 + $0xb8] sm:$0xff] }
  0x13   :  { %v238_v31 = vadd.f32 %v747_v5, %v167_v21  ;;  %v423_v33 = vmax.f32 %v359_v22, 0.0  ;;  %v424_v34 = vmax.f32 %v360_v23, 0.0  ;;  %v363_v35 = vadd.f32 %v299_v18, %v235_v24  ;;  %v688_v22 = vld [vmem:[%s1351_s0 + $0x60] sm:$0xff]  }
  0x14   :  { %v364_v36 = vadd.f32 %v300_v19, %v236_v25  ;;  %v425_v38 = vmax.f32 %v361_v28, 0.0  ;;  %v426_v39 = vmax.f32 %v362_v29, 0.0  ;;  %v365_v40 = vadd.f32 %v301_v26, %v237_v30 }
  0x15   :  { %v366_v41 = vadd.f32 %v302_v27, %v238_v31  ;;  %487 = vst [vmem:[%s1355_s4 + $0x40] sm:$0xff] %v423_v33  ;;  %488 = vst [vmem:[%s1355_s4 + $0x48] sm:$0xff] %v424_v34  ;;  %v427_v43 = vmax.f32 %v363_v35, 0.0  ;;  %v584_v46 = vunpack.c.h.bf16 %v684_v32  ;;  %v587_v50 = vunpack.c.l.bf16 %v685_v37  ;;  %v689_v27 = vld [vmem:[%s1351_s0 + $0x68] sm:$0xff]   ;;  %v690_v32 = vld [vmem:[%s1351_s0 + $0x70] sm:$0xff]  }
  0x16   :  { %v428_v44 = vmax.f32 %v364_v36, 0.0  ;;  %489 = vst [vmem:[%s1355_s4 + $0x50] sm:$0xff] %v425_v38  ;;  %490 = vst [vmem:[%s1355_s4 + $0x58] sm:$0xff] %v426_v39  ;;  %v429_v48 = vmax.f32 %v365_v40, 0.0  ;;  %v588_v51 = vunpack.c.h.bf16 %v685_v37  ;;  %v168_v52 = vmul.f32 %v583_v45, %v739_v1  ;;  %v691_v37 = vld [vmem:[%s1351_s0 + $0x78] sm:$0xff]  }
  0x17   :  { %v430_v49 = vmax.f32 %v366_v41, 0.0  ;;  %491 = vst [vmem:[%s1355_s4 + $0x60] sm:$0xff] %v427_v43  ;;  %v169_v53 = vmul.f32 %v584_v46, %v739_v1  ;;  %v591_v54 = vunpack.c.l.bf16 %v686_v42  ;;  %v592_v55 = vunpack.c.h.bf16 %v686_v42  ;;  %v311_v46 = vld [vmem:[%s1354_s1 + $0xc0] sm:$0xff] }
  0x18   :  { %492 = vst [vmem:[%s1355_s4 + $0x68] sm:$0xff] %v428_v44  ;;  %493 = vst [vmem:[%s1355_s4 + $0x70] sm:$0xff] %v429_v48  ;;  %v170_v58 = vmul.f32 %v587_v50, %v739_v1  ;;  %v171_v59 = vmul.f32 %v588_v51, %v739_v1  ;;  %v595_v60 = vunpack.c.l.bf16 %v687_v47  ;;  %v596_v61 = vunpack.c.h.bf16 %v687_v47  ;;  %v312_v47 = vld [vmem:[%s1354_s1 + $0xc8] sm:$0xff] }
  0x19   :  { %494 = vst [vmem:[%s1355_s4 + $0x78] sm:$0xff] %v430_v49  ;;  %v239_v62 = vadd.f32 %v747_v5, %v168_v52  ;;  %v240_v63 = vadd.f32 %v747_v5, %v169_v53  ;;  %v172_v3 = vmul.f32 %v591_v54, %v739_v1  ;;  %v173_v4 = vmul.f32 %v592_v55, %v739_v1  ;;  %v313_v54 = vld [vmem:[%s1354_s1 + $0xd0] sm:$0xff]  ;;  %v314_v55 = vld [vmem:[%s1354_s1 + $0xd8] sm:$0xff] }
  0x1a   :  { %v241_v6 = vadd.f32 %v747_v5, %v170_v58  ;;  %v242_v7 = vadd.f32 %v747_v5, %v171_v59  ;;  %v174_v10 = vmul.f32 %v595_v60, %v739_v1  ;;  %v175_v11 = vmul.f32 %v596_v61, %v739_v1  ;;  %v315_v60 = vld [vmem:[%s1354_s1 + $0xe0] sm:$0xff]  ;;  %v316_v61 = vld [vmem:[%s1354_s1 + $0xe8] sm:$0xff] }
  0x1b   :  { %v367_v12 = vadd.f32 %v303_v56, %v239_v62  ;;  %v368_v13 = vadd.f32 %v304_v57, %v240_v63  ;;  %v243_v14 = vadd.f32 %v747_v5, %v172_v3  ;;  %v244_v15 = vadd.f32 %v747_v5, %v173_v4 }
  0x1c   :  { %v369_v18 = vadd.f32 %v305_v0, %v241_v6  ;;  %v370_v19 = vadd.f32 %v306_v2, %v242_v7  ;;  %v245_v20 = vadd.f32 %v747_v5, %v174_v10  ;;  %v246_v21 = vadd.f32 %v747_v5, %v175_v11  ;;  %v317_v6 = vld [vmem:[%s1354_s1 + $0xf0] sm:$0xff]  ;;  %v318_v7 = vld [vmem:[%s1354_s1 + $0xf8] sm:$0xff] }
  0x1d   :  { %v431_v23 = vmax.f32 %v367_v12, 0.0  ;;  %v432_v24 = vmax.f32 %v368_v13, 0.0  ;;  %v371_v25 = vadd.f32 %v307_v8, %v243_v14  ;;  %v372_v26 = vadd.f32 %v308_v9, %v244_v15  ;;  %v692_v12 = vld [vmem:[%s1351_s0 + $0x80] sm:$0xff]  }
  0x1e   :  { %v433_v28 = vmax.f32 %v369_v18, 0.0  ;;  %v434_v29 = vmax.f32 %v370_v19, 0.0  ;;  %v373_v30 = vadd.f32 %v309_v16, %v245_v20  ;;  %v374_v31 = vadd.f32 %v310_v17, %v246_v21  ;;  %v693_v17 = vld [vmem:[%s1351_s0 + $0x88] sm:$0xff]  }
  0x1f   :  { %495 = vst [vmem:[%s1355_s4 + $0x80] sm:$0xff] %v431_v23  ;;  %496 = vst [vmem:[%s1355_s4 + $0x88] sm:$0xff] %v432_v24  ;;  %v435_v33 = vmax.f32 %v371_v25, 0.0  ;;  %v436_v34 = vmax.f32 %v372_v26, 0.0  ;;  %v599_v35 = vunpack.c.l.bf16 %v688_v22  ;;  %v600_v36 = vunpack.c.h.bf16 %v688_v22  ;;  %v694_v22 = vld [vmem:[%s1351_s0 + $0x90] sm:$0xff]  }
  0x20   :  { %497 = vst [vmem:[%s1355_s4 + $0x90] sm:$0xff] %v433_v28  ;;  %498 = vst [vmem:[%s1355_s4 + $0x98] sm:$0xff] %v434_v29  ;;  %v437_v38 = vmax.f32 %v373_v30, 0.0  ;;  %v438_v39 = vmax.f32 %v374_v31, 0.0  ;;  %v603_v40 = vunpack.c.l.bf16 %v689_v27  ;;  %v604_v41 = vunpack.c.h.bf16 %v689_v27  ;;  %v695_v27 = vld [vmem:[%s1351_s0 + $0x98] sm:$0xff]  }
  0x21   :  { %499 = vst [vmem:[%s1355_s4 + $0xa0] sm:$0xff] %v435_v33  ;;  %500 = vst [vmem:[%s1355_s4 + $0xa8] sm:$0xff] %v436_v34  ;;  %v176_v42 = vmul.f32 %v599_v35, %v739_v1  ;;  %v177_v43 = vmul.f32 %v600_v36, %v739_v1  ;;  %v607_v44 = vunpack.c.l.bf16 %v690_v32  ;;  %v608_v45 = vunpack.c.h.bf16 %v690_v32  ;;  %v319_v36 = vld [vmem:[%s1354_s1 + $0x100] sm:$0xff] }
  0x22   :  { %501 = vst [vmem:[%s1355_s4 + $0xb0] sm:$0xff] %v437_v38  ;;  %502 = vst [vmem:[%s1355_s4 + $0xb8] sm:$0xff] %v438_v39  ;;  %v178_v48 = vmul.f32 %v603_v40, %v739_v1  ;;  %v179_v49 = vmul.f32 %v604_v41, %v739_v1  ;;  %v611_v50 = vunpack.c.l.bf16 %v691_v37  ;;  %v612_v51 = vunpack.c.h.bf16 %v691_v37  ;;  %v320_v37 = vld [vmem:[%s1354_s1 + $0x108] sm:$0xff] }
  0x23   :  { %v247_v52 = vadd.f32 %v747_v5, %v176_v42  ;;  %v248_v53 = vadd.f32 %v747_v5, %v177_v43  ;;  %v180_v56 = vmul.f32 %v607_v44, %v739_v1  ;;  %v181_v57 = vmul.f32 %v608_v45, %v739_v1  ;;  %v321_v44 = vld [vmem:[%s1354_s1 + $0x110] sm:$0xff]  ;;  %v322_v45 = vld [vmem:[%s1354_s1 + $0x118] sm:$0xff] }
  0x24   :  { %v249_v58 = vadd.f32 %v747_v5, %v178_v48  ;;  %v250_v59 = vadd.f32 %v747_v5, %v179_v49  ;;  %v182_v62 = vmul.f32 %v611_v50, %v739_v1  ;;  %v183_v63 = vmul.f32 %v612_v51, %v739_v1  ;;  %v323_v50 = vld [vmem:[%s1354_s1 + $0x120] sm:$0xff]  ;;  %v324_v51 = vld [vmem:[%s1354_s1 + $0x128] sm:$0xff] }
  0x25   :  { %v375_v0 = vadd.f32 %v311_v46, %v247_v52  ;;  %v376_v2 = vadd.f32 %v312_v47, %v248_v53  ;;  %v251_v3 = vadd.f32 %v747_v5, %v180_v56  ;;  %v252_v4 = vadd.f32 %v747_v5, %v181_v57 }
  0x26   :  { %v377_v8 = vadd.f32 %v313_v54, %v249_v58  ;;  %v378_v9 = vadd.f32 %v314_v55, %v250_v59  ;;  %v253_v10 = vadd.f32 %v747_v5, %v182_v62  ;;  %v254_v11 = vadd.f32 %v747_v5, %v183_v63  ;;  %v325_v58 = vld [vmem:[%s1354_s1 + $0x130] sm:$0xff]  ;;  %v326_v59 = vld [vmem:[%s1354_s1 + $0x138] sm:$0xff] }
  0x27   :  { %v439_v13 = vmax.f32 %v375_v0, 0.0  ;;  %v440_v14 = vmax.f32 %v376_v2, 0.0  ;;  %v379_v15 = vadd.f32 %v315_v60, %v251_v3  ;;  %v380_v16 = vadd.f32 %v316_v61, %v252_v4  ;;  %v696_v0 = vld [vmem:[%s1351_s0 + $0xa0] sm:$0xff]  }
  0x28   :  { %v441_v18 = vmax.f32 %v377_v8, 0.0  ;;  %v442_v19 = vmax.f32 %v378_v9, 0.0  ;;  %v381_v20 = vadd.f32 %v317_v6, %v253_v10  ;;  %v382_v21 = vadd.f32 %v318_v7, %v254_v11  ;;  %v697_v7 = vld [vmem:[%s1351_s0 + $0xa8] sm:$0xff]  }
  0x29   :  { %503 = vst [vmem:[%s1355_s4 + $0xc0] sm:$0xff] %v439_v13  ;;  %504 = vst [vmem:[%s1355_s4 + $0xc8] sm:$0xff] %v440_v14  ;;  %v443_v23 = vmax.f32 %v379_v15, 0.0  ;;  %v444_v24 = vmax.f32 %v380_v16, 0.0  ;;  %v615_v25 = vunpack.c.l.bf16 %v692_v12  ;;  %v616_v26 = vunpack.c.h.bf16 %v692_v12  ;;  %v698_v12 = vld [vmem:[%s1351_s0 + $0xb0] sm:$0xff]  }
  0x2a   :  { %505 = vst [vmem:[%s1355_s4 + $0xd0] sm:$0xff] %v441_v18  ;;  %506 = vst [vmem:[%s1355_s4 + $0xd8] sm:$0xff] %v442_v19  ;;  %v445_v28 = vmax.f32 %v381_v20, 0.0  ;;  %v446_v29 = vmax.f32 %v382_v21, 0.0  ;;  %v619_v30 = vunpack.c.l.bf16 %v693_v17  ;;  %v620_v31 = vunpack.c.h.bf16 %v693_v17  ;;  %v699_v17 = vld [vmem:[%s1351_s0 + $0xb8] sm:$0xff]  }
  0x2b   :  { %507 = vst [vmem:[%s1355_s4 + $0xe0] sm:$0xff] %v443_v23  ;;  %508 = vst [vmem:[%s1355_s4 + $0xe8] sm:$0xff] %v444_v24  ;;  %v184_v32 = vmul.f32 %v615_v25, %v739_v1  ;;  %v185_v33 = vmul.f32 %v616_v26, %v739_v1  ;;  %v623_v34 = vunpack.c.l.bf16 %v694_v22  ;;  %v624_v35 = vunpack.c.h.bf16 %v694_v22  ;;  %v327_v26 = vld [vmem:[%s1354_s1 + $0x140] sm:$0xff] }
  0x2c   :  { %509 = vst [vmem:[%s1355_s4 + $0xf0] sm:$0xff] %v445_v28  ;;  %510 = vst [vmem:[%s1355_s4 + $0xf8] sm:$0xff] %v446_v29  ;;  %v186_v38 = vmul.f32 %v619_v30, %v739_v1  ;;  %v187_v39 = vmul.f32 %v620_v31, %v739_v1  ;;  %v627_v40 = vunpack.c.l.bf16 %v695_v27  ;;  %v628_v41 = vunpack.c.h.bf16 %v695_v27  ;;  %v328_v27 = vld [vmem:[%s1354_s1 + $0x148] sm:$0xff] }
  0x2d   :  { %v255_v42 = vadd.f32 %v747_v5, %v184_v32  ;;  %v256_v43 = vadd.f32 %v747_v5, %v185_v33  ;;  %v188_v46 = vmul.f32 %v623_v34, %v739_v1  ;;  %v189_v47 = vmul.f32 %v624_v35, %v739_v1  ;;  %v329_v34 = vld [vmem:[%s1354_s1 + $0x150] sm:$0xff]  ;;  %v330_v35 = vld [vmem:[%s1354_s1 + $0x158] sm:$0xff] }
  0x2e   :  { %v257_v48 = vadd.f32 %v747_v5, %v186_v38  ;;  %v258_v49 = vadd.f32 %v747_v5, %v187_v39  ;;  %v190_v52 = vmul.f32 %v627_v40, %v739_v1  ;;  %v191_v53 = vmul.f32 %v628_v41, %v739_v1  ;;  %v331_v40 = vld [vmem:[%s1354_s1 + $0x160] sm:$0xff]  ;;  %v332_v41 = vld [vmem:[%s1354_s1 + $0x168] sm:$0xff] }
  0x2f   :  { %v383_v54 = vadd.f32 %v319_v36, %v255_v42  ;;  %v384_v55 = vadd.f32 %v320_v37, %v256_v43  ;;  %v259_v56 = vadd.f32 %v747_v5, %v188_v46  ;;  %v260_v57 = vadd.f32 %v747_v5, %v189_v47 }
  0x30   :  { %v385_v60 = vadd.f32 %v321_v44, %v257_v48  ;;  %v386_v61 = vadd.f32 %v322_v45, %v258_v49  ;;  %v261_v62 = vadd.f32 %v747_v5, %v190_v52  ;;  %v262_v63 = vadd.f32 %v747_v5, %v191_v53  ;;  %v333_v48 = vld [vmem:[%s1354_s1 + $0x170] sm:$0xff]  ;;  %v334_v49 = vld [vmem:[%s1354_s1 + $0x178] sm:$0xff] }
  0x31   :  { %v447_v2 = vmax.f32 %v383_v54, 0.0  ;;  %v448_v3 = vmax.f32 %v384_v55, 0.0  ;;  %v387_v4 = vadd.f32 %v323_v50, %v259_v56  ;;  %v388_v6 = vadd.f32 %v324_v51, %v260_v57  ;;  %v700_v54 = vld [vmem:[%s1351_s0 + $0xc0] sm:$0xff]  }
  0x32   :  { %v449_v8 = vmax.f32 %v385_v60, 0.0  ;;  %v450_v9 = vmax.f32 %v386_v61, 0.0  ;;  %v389_v10 = vadd.f32 %v325_v58, %v261_v62  ;;  %v390_v11 = vadd.f32 %v326_v59, %v262_v63  ;;  %v701_v59 = vld [vmem:[%s1351_s0 + $0xc8] sm:$0xff]  }
  0x33   :  { %511 = vst [vmem:[%s1355_s4 + $0x100] sm:$0xff] %v447_v2  ;;  %512 = vst [vmem:[%s1355_s4 + $0x108] sm:$0xff] %v448_v3  ;;  %v451_v13 = vmax.f32 %v387_v4, 0.0  ;;  %v452_v14 = vmax.f32 %v388_v6, 0.0  ;;  %v631_v15 = vunpack.c.l.bf16 %v696_v0  ;;  %v632_v16 = vunpack.c.h.bf16 %v696_v0  ;;  %v702_v0 = vld [vmem:[%s1351_s0 + $0xd0] sm:$0xff]  }
  0x34   :  { %513 = vst [vmem:[%s1355_s4 + $0x110] sm:$0xff] %v449_v8  ;;  %514 = vst [vmem:[%s1355_s4 + $0x118] sm:$0xff] %v450_v9  ;;  %v453_v18 = vmax.f32 %v389_v10, 0.0  ;;  %v454_v19 = vmax.f32 %v390_v11, 0.0  ;;  %v635_v20 = vunpack.c.l.bf16 %v697_v7  ;;  %v636_v21 = vunpack.c.h.bf16 %v697_v7  ;;  %v703_v7 = vld [vmem:[%s1351_s0 + $0xd8] sm:$0xff]  }
  0x35   :  { %515 = vst [vmem:[%s1355_s4 + $0x120] sm:$0xff] %v451_v13  ;;  %516 = vst [vmem:[%s1355_s4 + $0x128] sm:$0xff] %v452_v14  ;;  %v192_v22 = vmul.f32 %v631_v15, %v739_v1  ;;  %v193_v23 = vmul.f32 %v632_v16, %v739_v1  ;;  %v639_v24 = vunpack.c.l.bf16 %v698_v12  ;;  %v640_v25 = vunpack.c.h.bf16 %v698_v12  ;;  %v335_v16 = vld [vmem:[%s1354_s1 + $0x180] sm:$0xff] }
  0x36   :  { %517 = vst [vmem:[%s1355_s4 + $0x130] sm:$0xff] %v453_v18  ;;  %518 = vst [vmem:[%s1355_s4 + $0x138] sm:$0xff] %v454_v19  ;;  %v194_v28 = vmul.f32 %v635_v20, %v739_v1  ;;  %v195_v29 = vmul.f32 %v636_v21, %v739_v1  ;;  %v643_v30 = vunpack.c.l.bf16 %v699_v17  ;;  %v644_v31 = vunpack.c.h.bf16 %v699_v17  ;;  %v336_v17 = vld [vmem:[%s1354_s1 + $0x188] sm:$0xff] }
  0x37   :  { %v263_v32 = vadd.f32 %v747_v5, %v192_v22  ;;  %v264_v33 = vadd.f32 %v747_v5, %v193_v23  ;;  %v196_v36 = vmul.f32 %v639_v24, %v739_v1  ;;  %v197_v37 = vmul.f32 %v640_v25, %v739_v1  ;;  %v337_v24 = vld [vmem:[%s1354_s1 + $0x190] sm:$0xff]  ;;  %v338_v25 = vld [vmem:[%s1354_s1 + $0x198] sm:$0xff] }
  0x38   :  { %v265_v38 = vadd.f32 %v747_v5, %v194_v28  ;;  %v266_v39 = vadd.f32 %v747_v5, %v195_v29  ;;  %v198_v42 = vmul.f32 %v643_v30, %v739_v1  ;;  %v199_v43 = vmul.f32 %v644_v31, %v739_v1  ;;  %v339_v30 = vld [vmem:[%s1354_s1 + $0x1a0] sm:$0xff]  ;;  %v340_v31 = vld [vmem:[%s1354_s1 + $0x1a8] sm:$0xff] }
  0x39   :  { %v391_v44 = vadd.f32 %v327_v26, %v263_v32  ;;  %v392_v45 = vadd.f32 %v328_v27, %v264_v33  ;;  %v267_v46 = vadd.f32 %v747_v5, %v196_v36  ;;  %v268_v47 = vadd.f32 %v747_v5, %v197_v37 }
  0x3a   :  { %v393_v50 = vadd.f32 %v329_v34, %v265_v38  ;;  %v394_v51 = vadd.f32 %v330_v35, %v266_v39  ;;  %v269_v52 = vadd.f32 %v747_v5, %v198_v42  ;;  %v270_v53 = vadd.f32 %v747_v5, %v199_v43  ;;  %v341_v38 = vld [vmem:[%s1354_s1 + $0x1b0] sm:$0xff]  ;;  %v342_v39 = vld [vmem:[%s1354_s1 + $0x1b8] sm:$0xff] }
  0x3b   :  { %v455_v55 = vmax.f32 %v391_v44, 0.0  ;;  %v456_v56 = vmax.f32 %v392_v45, 0.0  ;;  %v395_v57 = vadd.f32 %v331_v40, %v267_v46  ;;  %v396_v58 = vadd.f32 %v332_v41, %v268_v47  ;;  %v704_v44 = vld [vmem:[%s1351_s0 + $0xe0] sm:$0xff]  }
  0x3c   :  { %v457_v60 = vmax.f32 %v393_v50, 0.0  ;;  %v458_v61 = vmax.f32 %v394_v51, 0.0  ;;  %v397_v62 = vadd.f32 %v333_v48, %v269_v52  ;;  %v398_v63 = vadd.f32 %v334_v49, %v270_v53  ;;  %v705_v49 = vld [vmem:[%s1351_s0 + $0xe8] sm:$0xff]  }
  0x3d   :  { %519 = vst [vmem:[%s1355_s4 + $0x140] sm:$0xff] %v455_v55  ;;  %520 = vst [vmem:[%s1355_s4 + $0x148] sm:$0xff] %v456_v56  ;;  %v459_v2 = vmax.f32 %v395_v57, 0.0  ;;  %v460_v3 = vmax.f32 %v396_v58, 0.0  ;;  %v647_v4 = vunpack.c.l.bf16 %v700_v54  ;;  %v648_v6 = vunpack.c.h.bf16 %v700_v54  ;;  %v706_v54 = vld [vmem:[%s1351_s0 + $0xf0] sm:$0xff]  }
  0x3e   :  { %521 = vst [vmem:[%s1355_s4 + $0x150] sm:$0xff] %v457_v60  ;;  %522 = vst [vmem:[%s1355_s4 + $0x158] sm:$0xff] %v458_v61  ;;  %v461_v8 = vmax.f32 %v397_v62, 0.0  ;;  %v462_v9 = vmax.f32 %v398_v63, 0.0  ;;  %v651_v10 = vunpack.c.l.bf16 %v701_v59  ;;  %v652_v11 = vunpack.c.h.bf16 %v701_v59  ;;  %v707_v59 = vld [vmem:[%s1351_s0 + $0xf8] sm:$0xff]  }
  0x3f   :  { %523 = vst [vmem:[%s1355_s4 + $0x160] sm:$0xff] %v459_v2  ;;  %524 = vst [vmem:[%s1355_s4 + $0x168] sm:$0xff] %v460_v3  ;;  %v200_v12 = vmul.f32 %v647_v4, %v739_v1  ;;  %v201_v13 = vmul.f32 %v648_v6, %v739_v1  ;;  %v655_v14 = vunpack.c.l.bf16 %v702_v0  ;;  %v656_v15 = vunpack.c.h.bf16 %v702_v0  ;;  %v343_v6 = vld [vmem:[%s1354_s1 + $0x1c0] sm:$0xff] }
  0x40   :  { %525 = vst [vmem:[%s1355_s4 + $0x170] sm:$0xff] %v461_v8  ;;  %526 = vst [vmem:[%s1355_s4 + $0x178] sm:$0xff] %v462_v9  ;;  %v202_v18 = vmul.f32 %v651_v10, %v739_v1  ;;  %v203_v19 = vmul.f32 %v652_v11, %v739_v1  ;;  %v659_v20 = vunpack.c.l.bf16 %v703_v7  ;;  %v660_v21 = vunpack.c.h.bf16 %v703_v7  ;;  %v344_v7 = vld [vmem:[%s1354_s1 + $0x1c8] sm:$0xff] }
  0x41   :  { %v271_v22 = vadd.f32 %v747_v5, %v200_v12  ;;  %v272_v23 = vadd.f32 %v747_v5, %v201_v13  ;;  %v204_v26 = vmul.f32 %v655_v14, %v739_v1  ;;  %v205_v27 = vmul.f32 %v656_v15, %v739_v1  ;;  %v345_v14 = vld [vmem:[%s1354_s1 + $0x1d0] sm:$0xff]  ;;  %v346_v15 = vld [vmem:[%s1354_s1 + $0x1d8] sm:$0xff] }
  0x42   :  { %v273_v28 = vadd.f32 %v747_v5, %v202_v18  ;;  %v274_v29 = vadd.f32 %v747_v5, %v203_v19  ;;  %v206_v32 = vmul.f32 %v659_v20, %v739_v1  ;;  %v207_v33 = vmul.f32 %v660_v21, %v739_v1  ;;  %v347_v20 = vld [vmem:[%s1354_s1 + $0x1e0] sm:$0xff]  ;;  %v348_v21 = vld [vmem:[%s1354_s1 + $0x1e8] sm:$0xff] }
  0x43   :  { %v399_v34 = vadd.f32 %v335_v16, %v271_v22  ;;  %v400_v35 = vadd.f32 %v336_v17, %v272_v23  ;;  %v275_v36 = vadd.f32 %v747_v5, %v204_v26  ;;  %v276_v37 = vadd.f32 %v747_v5, %v205_v27 }
  0x44   :  { %v401_v40 = vadd.f32 %v337_v24, %v273_v28  ;;  %v402_v41 = vadd.f32 %v338_v25, %v274_v29  ;;  %v277_v42 = vadd.f32 %v747_v5, %v206_v32  ;;  %v278_v43 = vadd.f32 %v747_v5, %v207_v33  ;;  %v349_v28 = vld [vmem:[%s1354_s1 + $0x1f0] sm:$0xff]  ;;  %v350_v29 = vld [vmem:[%s1354_s1 + $0x1f8] sm:$0xff] }
  0x45   :  { %v463_v45 = vmax.f32 %v399_v34, 0.0  ;;  %v464_v46 = vmax.f32 %v400_v35, 0.0  ;;  %v403_v47 = vadd.f32 %v339_v30, %v275_v36  ;;  %v404_v48 = vadd.f32 %v340_v31, %v276_v37 }
  0x46   :  { %v465_v50 = vmax.f32 %v401_v40, 0.0  ;;  %v466_v51 = vmax.f32 %v402_v41, 0.0  ;;  %v405_v52 = vadd.f32 %v341_v38, %v277_v42  ;;  %v406_v53 = vadd.f32 %v342_v39, %v278_v43 }
  0x47   :  { %527 = vst [vmem:[%s1355_s4 + $0x180] sm:$0xff] %v463_v45  ;;  %528 = vst [vmem:[%s1355_s4 + $0x188] sm:$0xff] %v464_v46  ;;  %v467_v55 = vmax.f32 %v403_v47, 0.0  ;;  %v468_v56 = vmax.f32 %v404_v48, 0.0  ;;  %v663_v57 = vunpack.c.l.bf16 %v704_v44  ;;  %v664_v58 = vunpack.c.h.bf16 %v704_v44 }
  0x48   :  { %529 = vst [vmem:[%s1355_s4 + $0x190] sm:$0xff] %v465_v50  ;;  %530 = vst [vmem:[%s1355_s4 + $0x198] sm:$0xff] %v466_v51  ;;  %v469_v60 = vmax.f32 %v405_v52, 0.0  ;;  %v470_v61 = vmax.f32 %v406_v53, 0.0  ;;  %v667_v62 = vunpack.c.l.bf16 %v705_v49  ;;  %v668_v63 = vunpack.c.h.bf16 %v705_v49 }
  0x49   :  { %531 = vst [vmem:[%s1355_s4 + $0x1a0] sm:$0xff] %v467_v55  ;;  %532 = vst [vmem:[%s1355_s4 + $0x1a8] sm:$0xff] %v468_v56  ;;  %v208_v0 = vmul.f32 %v663_v57, %v739_v1  ;;  %v209_v2 = vmul.f32 %v664_v58, %v739_v1  ;;  %v671_v3 = vunpack.c.l.bf16 %v706_v54  ;;  %v672_v4 = vunpack.c.h.bf16 %v706_v54 }
  0x4a   :  { %533 = vst [vmem:[%s1355_s4 + $0x1b0] sm:$0xff] %v469_v60  ;;  %534 = vst [vmem:[%s1355_s4 + $0x1b8] sm:$0xff] %v470_v61  ;;  %v210_v8 = vmul.f32 %v667_v62, %v739_v1  ;;  %v211_v9 = vmul.f32 %v668_v63, %v739_v1  ;;  %v675_v10 = vunpack.c.l.bf16 %v707_v59  ;;  %v676_v11 = vunpack.c.h.bf16 %v707_v59 }
  0x4b   :  { %v279_v12 = vadd.f32 %v747_v5, %v208_v0  ;;  %v280_v13 = vadd.f32 %v747_v5, %v209_v2  ;;  %v212_v16 = vmul.f32 %v671_v3, %v739_v1  ;;  %v213_v17 = vmul.f32 %v672_v4, %v739_v1 }
  0x4c   :  { %v281_v18 = vadd.f32 %v747_v5, %v210_v8  ;;  %v282_v19 = vadd.f32 %v747_v5, %v211_v9  ;;  %v214_v22 = vmul.f32 %v675_v10, %v739_v1  ;;  %v215_v23 = vmul.f32 %v676_v11, %v739_v1 }
  0x4d   :  { %v407_v24 = vadd.f32 %v343_v6, %v279_v12  ;;  %v408_v25 = vadd.f32 %v344_v7, %v280_v13  ;;  %v283_v26 = vadd.f32 %v747_v5, %v212_v16  ;;  %v284_v27 = vadd.f32 %v747_v5, %v213_v17 }
  0x4e   :  { %v409_v30 = vadd.f32 %v345_v14, %v281_v18  ;;  %v410_v31 = vadd.f32 %v346_v15, %v282_v19  ;;  %v285_v32 = vadd.f32 %v747_v5, %v214_v22  ;;  %v286_v1 = vadd.f32 %v747_v5, %v215_v23 }
  0x4f   :  { %v471_v33 = vmax.f32 %v407_v24, 0.0  ;;  %v472_v34 = vmax.f32 %v408_v25, 0.0  ;;  %v411_v35 = vadd.f32 %v347_v20, %v283_v26  ;;  %v412_v36 = vadd.f32 %v348_v21, %v284_v27 }
  0x50   :  { %v473_v37 = vmax.f32 %v409_v30, 0.0  ;;  %v474_v38 = vmax.f32 %v410_v31, 0.0  ;;  %v413_v39 = vadd.f32 %v349_v28, %v285_v32  ;;  %v414_v40 = vadd.f32 %v350_v29, %v286_v1 }
  0x51   :  { %535 = vst [vmem:[%s1355_s4 + $0x1c0] sm:$0xff] %v471_v33  ;;  %536 = vst [vmem:[%s1355_s4 + $0x1c8] sm:$0xff] %v472_v34  ;;  %v475_v41 = vmax.f32 %v411_v35, 0.0  ;;  %v476_v42 = vmax.f32 %v412_v36, 0.0 }
  0x52   :  { %537 = vst [vmem:[%s1355_s4 + $0x1d0] sm:$0xff] %v473_v37  ;;  %538 = vst [vmem:[%s1355_s4 + $0x1d8] sm:$0xff] %v474_v38  ;;  %v477_v5 = vmax.f32 %v413_v39, 0.0  ;;  %v478_v43 = vmax.f32 %v414_v40, 0.0 }
  0x53   :  { %539 = vst [vmem:[%s1355_s4 + $0x1e0] sm:$0xff] %v475_v41  ;;  %540 = vst [vmem:[%s1355_s4 + $0x1e8] sm:$0xff] %v476_v42 }
  0x54   :  { %541 = vst [vmem:[%s1355_s4 + $0x1f0] sm:$0xff] %v477_v5  ;;  %542 = vst [vmem:[%s1355_s4 + $0x1f8] sm:$0xff] %v478_v43 }

// kernel: bottleneck_forward.6
= control target key start
LH: loop header
LB: loop body
LE: loop exit
PB: predicated region body
PF: predicated region fallthrough
CT: control target
= control target key end

     0   :  { %vm1261_vm0 = vcmask 1040384   ;;  %s2517_s3 = inlined_call_operand.vmem [shape: bf16[128,128], index: 3, kind: input, shape index: {}]   ;;  %s2518_s0 = inlined_call_operand.vmem [shape: bf16[512,128], index: 0, kind: input, shape index: {}]   ;;  %s2519_s1 = inlined_call_operand.vmem [shape: f32[1,128], index: 1, kind: input, shape index: {}]   ;;  %s2520_s2 = inlined_call_operand.vmem [shape: f32[1,128], index: 2, kind: input, shape index: {}]   ;;  %s2521_s4 = inlined_call_operand.vmem [shape: bf16[512,128], index: 4, kind: output, shape index: {0}]   ;;  %s2522_s5 = inlined_call_operand.vmem [shape: f32[1,2,128], index: 5, kind: output, shape index: {1}]  }
   0x1   :  { %v1896_v0 = vld [vmem:[%s2517_s3] sm:$0xff]   ;;  %v1897_v1 = vld [vmem:[%s2517_s3 + $0x8] sm:$0xff]   ;;  %v1898_v2 = vld [vmem:[%s2517_s3 + $0x10] sm:$0xff]  }
   0x2   :  { %1800 = vmatprep.subr.bf16.mxu0 %v1896_v0  ;;  %1880 = vmatprep.subr.bf16.mxu1 %v1896_v0  ;;  %v1899_v3 = vld [vmem:[%s2517_s3 + $0x18] sm:$0xff]   ;;  %v1411_v4 = vld [vmem:[%s2518_s0] sm:$0xff]   ;;  %v1698_v8 = vld [vmem:[%s2518_s0 + $0x8] sm:$0xff]  }
   0x3   :  { %1801 = vmatpush3.bf16.msra.mxu0 %v1896_v0  ;;  %1888 = vmatpush3.bf16.msra.mxu1 %v1896_v0  ;;  %v1952_v5 = vld [vmem:[%s2519_s1] ss:$0 sm:$0xff]  ;;  %v1412_v6 = vunpack.c.l.bf16 %v1411_v4  ;;  %v1413_v7 = vunpack.c.h.bf16 %v1411_v4  ;;  %v1699_v9 = vld [vmem:[%s2518_s0 + $0x10] sm:$0xff]   ;;  %v1416_v14 = vunpack.c.l.bf16 %v1698_v8  ;;  %v1417_v15 = vunpack.c.h.bf16 %v1698_v8  ;;  %v1901_v22 = vld [vmem:[%s2517_s3 + $0x28] sm:$0xff]  }
   0x4   :  { %1802 = vmatprep.subr.bf16.mxu0 %v1897_v1  ;;  %1881 = vmatprep.subr.bf16.mxu1 %v1897_v1  ;;  %v1963_v10 = vld [vmem:[%s2520_s2] ss:$0 sm:$0xff]  ;;  %v1420_v16 = vunpack.c.l.bf16 %v1699_v9  ;;  %v1421_v19 = vunpack.c.h.bf16 %v1699_v9  ;;  %v1700_v26 = vld [vmem:[%s2518_s0 + $0x18] sm:$0xff]   ;;  %v1902_v31 = vld [vmem:[%s2517_s3 + $0x30] sm:$0xff]  }
   0x5   :  { %v155_v11 = vmul.f32 %v1412_v6, %v1952_v5  ;;  %v156_v12 = vmul.f32 %v1413_v7, %v1952_v5  ;;  %v1900_v13 = vld [vmem:[%s2517_s3 + $0x20] sm:$0xff]   ;;  %v157_v23 = vmul.f32 %v1416_v14, %v1952_v5  ;;  %v158_v24 = vmul.f32 %v1417_v15, %v1952_v5  ;;  %v1702_v38 = vld [vmem:[%s2518_s0 + $0x28] sm:$0xff]   ;;  %v1703_v41 = vld [vmem:[%s2518_s0 + $0x30] sm:$0xff]  }
   0x6   :  { %v159_v25 = vmul.f32 %v1420_v16, %v1952_v5  ;;  %v160_v28 = vmul.f32 %v1421_v19, %v1952_v5  ;;  %v1701_v29 = vld [vmem:[%s2518_s0 + $0x20] sm:$0xff]   ;;  %v1424_v30 = vunpack.c.l.bf16 %v1700_v26  ;;  %v1425_v35 = vunpack.c.h.bf16 %v1700_v26  ;;  %v1704_v42 = vld [vmem:[%s2518_s0 + $0x38] sm:$0xff]   ;;  %v1706_v63 = vld [vmem:[%s2518_s0 + $0x48] sm:$0xff]  }
   0x7   :  { %1803 = vmatpush3.bf16.msra.mxu0 %v1897_v1  ;;  %1889 = vmatpush3.bf16.msra.mxu1 %v1897_v1  ;;  %v226_v17 = vadd.f32 %v1963_v10, %v155_v11  ;;  %v227_v18 = vadd.f32 %v1963_v10, %v156_v12  ;;  %v228_v32 = vadd.f32 %v1963_v10, %v157_v23  ;;  %v1428_v37 = vunpack.c.l.bf16 %v1701_v29  ;;  %v1903_v43 = vld [vmem:[%s2517_s3 + $0x38] sm:$0xff]   ;;  %v1705_v48 = vld [vmem:[%s2518_s0 + $0x40] sm:$0xff]   ;;  %v1707_v4 = vld [vmem:[%s2518_s0 + $0x50] sm:$0xff]  }
   0x8   :  { %1804 = vmatprep.subr.bf16.mxu0 %v1898_v2  ;;  %1882 = vmatprep.subr.bf16.mxu1 %v1898_v2  ;;  %v229_v33 = vadd.f32 %v1963_v10, %v158_v24  ;;  %v230_v34 = vadd.f32 %v1963_v10, %v159_v25  ;;  %v231_v36 = vadd.f32 %v1963_v10, %v160_v28  ;;  %v1429_v40 = vunpack.c.h.bf16 %v1701_v29  ;;  %v1708_v23 = vld [vmem:[%s2518_s0 + $0x58] sm:$0xff]  }
   0x9   :  { %v290_v20 = vmax.f32 %v226_v17, 0.0  ;;  %v291_v21 = vmax.f32 %v227_v18, 0.0  ;;  %v161_v39 = vmul.f32 %v1424_v30, %v1952_v5  ;;  %v292_v44 = vmax.f32 %v228_v32, 0.0 }
   0xa   :  { %v293_v45 = vmax.f32 %v229_v33, 0.0  ;;  %v294_v46 = vmax.f32 %v230_v34, 0.0  ;;  %v162_v47 = vmul.f32 %v1425_v35, %v1952_v5  ;;  %v295_v49 = vmax.f32 %v231_v36, 0.0 }
   0xb   :  { %1805 = vmatpush3.bf16.msra.mxu0 %v1898_v2  ;;  %1890 = vmatpush3.bf16.msra.mxu1 %v1898_v2  ;;  %v354_v27 = vpack.c.bf16 %v291_v21, %v290_v20  ;;  %v163_v50 = vmul.f32 %v1428_v37, %v1952_v5  ;;  %v1432_v51 = vunpack.c.l.bf16 %v1702_v38  ;;  %v1433_v52 = vunpack.c.h.bf16 %v1702_v38 }
   0xc   :  { %1806 = vmatprep.subr.bf16.mxu0 %v1899_v3  ;;  %1883 = vmatprep.subr.bf16.mxu1 %v1899_v3  ;;  %v1436_v53 = vunpack.c.l.bf16 %v1703_v41  ;;  %v1437_v54 = vunpack.c.h.bf16 %v1703_v41  ;;  %v1440_v55 = vunpack.c.l.bf16 %v1704_v42  ;;  %v1441_v56 = vunpack.c.h.bf16 %v1704_v42 }
   0xd   :  { %1816 = vmatprep.mubr.bf16.mxu0 %v354_v27  ;;  %v164_v57 = vmul.f32 %v1429_v40, %v1952_v5  ;;  %v1444_v58 = vunpack.c.l.bf16 %v1705_v48  ;;  %v1445_v59 = vunpack.c.h.bf16 %v1705_v48  ;;  %v355_v60 = vpack.c.bf16 %v293_v45, %v292_v44  ;;  %v1713_v44 = vld [vmem:[%s2518_s0 + $0x80] sm:$0xff]  }
   0xe   :  { %v232_v61 = vadd.f32 %v1963_v10, %v161_v39  ;;  %v233_v62 = vadd.f32 %v1963_v10, %v162_v47  ;;  %v356_v0 = vpack.c.bf16 %v295_v49, %v294_v46  ;;  %v234_v1 = vadd.f32 %v1963_v10, %v163_v50 }
   0xf   :  { %1807 = vmatpush3.bf16.msra.mxu0 %v1899_v3  ;;  %1891 = vmatpush3.bf16.msra.mxu1 %v1899_v3  ;;  %v165_v2 = vmul.f32 %v1432_v51, %v1952_v5  ;;  %v166_v3 = vmul.f32 %v1433_v52, %v1952_v5  ;;  %v167_v6 = vmul.f32 %v1436_v53, %v1952_v5  ;;  %v1448_v14 = vunpack.c.l.bf16 %v1706_v63  ;;  %v2056_v52 = vld [vmem:[%s2518_s0 + $0x60] sm:$0xff]  }
  0x10   :  { %1808 = vmatprep.subr.bf16.mxu0 %v1900_v13  ;;  %1884 = vmatprep.subr.bf16.mxu1 %v1900_v13  ;;  %v168_v7 = vmul.f32 %v1437_v54, %v1952_v5  ;;  %v169_v8 = vmul.f32 %v1440_v55, %v1952_v5  ;;  %v170_v9 = vmul.f32 %v1441_v56, %v1952_v5  ;;  %v296_v15 = vmax.f32 %v232_v61, 0.0 }
  0x11   :  { %v235_v11 = vadd.f32 %v1963_v10, %v164_v57  ;;  %v171_v12 = vmul.f32 %v1444_v58, %v1952_v5  ;;  %v297_v16 = vmax.f32 %v233_v62, 0.0  ;;  %v1449_v17 = vunpack.c.h.bf16 %v1706_v63 }
  0x12   :  { %v1452_v18 = vunpack.c.l.bf16 %v1707_v4  ;;  %v298_v19 = vmax.f32 %v234_v1, 0.0  ;;  %v236_v20 = vadd.f32 %v1963_v10, %v165_v2  ;;  %v237_v21 = vadd.f32 %v1963_v10, %v166_v3 }
  0x13   :  { %1809 = vmatpush3.bf16.msra.mxu0 %v1900_v13  ;;  %1892 = vmatpush3.bf16.msra.mxu1 %v1900_v13  ;;  %v172_v13 = vmul.f32 %v1445_v59, %v1952_v5  ;;  %v238_v24 = vadd.f32 %v1963_v10, %v167_v6  ;;  %v239_v25 = vadd.f32 %v1963_v10, %v168_v7  ;;  %v299_v28 = vmax.f32 %v235_v11, 0.0  ;;  %v1714_v59 = vld [vmem:[%s2518_s0 + $0x88] sm:$0xff]   ;;  %v1716_v11 = vld [vmem:[%s2518_s0 + $0x98] sm:$0xff]  }
  0x14   :  { %1810 = vmatprep.subr.bf16.mxu0 %v1901_v22  ;;  %1885 = vmatprep.subr.bf16.mxu1 %v1901_v22  ;;  %v240_v26 = vadd.f32 %v1963_v10, %v169_v8  ;;  %v241_v27 = vadd.f32 %v1963_v10, %v170_v9  ;;  %v242_v29 = vadd.f32 %v1963_v10, %v171_v12  ;;  %v1456_v35 = vunpack.c.l.bf16 %v1708_v23 }
  0x15   :  { %v243_v30 = vadd.f32 %v1963_v10, %v172_v13  ;;  %v357_v32 = vpack.c.bf16 %v297_v16, %v296_v15  ;;  %v174_v33 = vmul.f32 %v1449_v17, %v1952_v5  ;;  %v175_v34 = vmul.f32 %v1452_v18, %v1952_v5 }
  0x16   :  { %v300_v36 = vmax.f32 %v236_v20, 0.0  ;;  %v301_v37 = vmax.f32 %v237_v21, 0.0  ;;  %v1457_v39 = vunpack.c.h.bf16 %v1708_v23  ;;  %v302_v40 = vmax.f32 %v238_v24, 0.0  ;;  %v1717_v24 = vld [vmem:[%s2518_s0 + $0xa0] sm:$0xff]  }
  0x17   :  { %1811 = vmatpush3.bf16.msra.mxu0 %v1901_v22  ;;  %1893 = vmatpush3.bf16.msra.mxu1 %v1901_v22  ;;  %v1453_v22 = vunpack.c.h.bf16 %v1707_v4  ;;  %v303_v41 = vmax.f32 %v239_v25, 0.0  ;;  %v304_v42 = vmax.f32 %v240_v26, 0.0  ;;  %v358_v45 = vpack.c.bf16 %v299_v28, %v298_v19 }
  0x18   :  { %1812 = vmatprep.subr.bf16.mxu0 %v1902_v31  ;;  %1886 = vmatprep.subr.bf16.mxu1 %v1902_v31  ;;  %v306_v46 = vmax.f32 %v242_v29, 0.0  ;;  %v307_v47 = vmax.f32 %v243_v30, 0.0  ;;  %v245_v49 = vadd.f32 %v1963_v10, %v174_v33  ;;  %v2050_v50 = vadd.f32 %v1963_v10, %v175_v34  ;;  %v1718_v33 = vld [vmem:[%s2518_s0 + $0xa8] sm:$0xff]  }
  0x19   :  { %v176_v38 = vmul.f32 %v1453_v22, %v1952_v5  ;;  %v177_v51 = vmul.f32 %v1456_v35, %v1952_v5  ;;  %v178_v54 = vmul.f32 %v1457_v39, %v1952_v5  ;;  %v1476_v55 = vunpack.c.l.bf16 %v1713_v44 }
  0x1a   :  { %v359_v56 = vpack.c.bf16 %v301_v37, %v300_v36  ;;  %v360_v57 = vpack.c.bf16 %v303_v41, %v302_v40  ;;  %v1460_v62 = vunpack.c.l.bf16 %v2056_v52  ;;  %v1477_v63 = vunpack.c.h.bf16 %v1713_v44 }
  0x1b   :  { %1813 = vmatpush3.bf16.msra.mxu0 %v1902_v31  ;;  %1894 = vmatpush3.bf16.msra.mxu1 %v1902_v31  ;;  %v173_v31 = vmul.f32 %v1448_v14, %v1952_v5  ;;  %v2059_v53 = vadd.f32 %v1963_v10, %v176_v38  ;;  %v309_v1 = vmax.f32 %v245_v49, 0.0  ;;  %v310_v2 = vmax.f32 %v2050_v50, 0.0 }
  0x1c   :  { %1814 = vmatprep.subr.bf16.mxu0 %v1903_v43  ;;  %1887 = vmatprep.subr.bf16.mxu1 %v1903_v43  ;;  %v2075_v3 = vadd.f32 %v1963_v10, %v177_v51  ;;  %v187_v4 = vmul.f32 %v1476_v55, %v1952_v5  ;;  %v2080_v7 = vadd.f32 %v1963_v10, %v178_v54  ;;  %v1480_v9 = vunpack.c.l.bf16 %v1714_v59 }
  0x1d   :  { %v244_v48 = vadd.f32 %v1963_v10, %v173_v31  ;;  %v311_v6 = vmax.f32 %v2059_v53, 0.0  ;;  %v188_v8 = vmul.f32 %v1477_v63, %v1952_v5  ;;  %v1461_v12 = vunpack.c.h.bf16 %v2056_v52 }
  0x1e   :  { %v258_v13 = vadd.f32 %v1963_v10, %v187_v4  ;;  %v1481_v14 = vunpack.c.h.bf16 %v1714_v59  ;;  %v2089_v16 = vmul.f32 %v1460_v62, %v1952_v5  ;;  %v189_v18 = vmul.f32 %v1480_v9, %v1952_v5 }
  0x1f   :  { %1815 = vmatpush3.bf16.msra.mxu0 %v1903_v43  ;;  %1895 = vmatpush3.bf16.msra.mxu1 %v1903_v43  ;;  %v305_v43 = vmax.f32 %v241_v27, 0.0  ;;  %v308_v61 = vmax.f32 %v244_v48, 0.0  ;;  %v259_v17 = vadd.f32 %v1963_v10, %v188_v8  ;;  %v1488_v23 = vunpack.c.l.bf16 %v1716_v11 }
  0x20   :  { %v322_v20 = vmax.f32 %v258_v13, 0.0  ;;  %v190_v21 = vmul.f32 %v1481_v14, %v1952_v5  ;;  %v260_v27 = vadd.f32 %v1963_v10, %v189_v18  ;;  %v1489_v31 = vunpack.c.h.bf16 %v1716_v11  ;;  %v1721_v18 = vld [vmem:[%s2518_s0 + $0xc0] sm:$0xff]  }
  0x21   :  { %v2062_v58 = vpack.c.bf16 %v305_v43, %v304_v42  ;;  %v2098_v25 = vpack.c.bf16 %v309_v1, %v308_v61  ;;  %v323_v26 = vmax.f32 %v259_v17, 0.0  ;;  %v1492_v37 = vunpack.c.l.bf16 %v1717_v24  ;;  %v1720_v1 = vld [vmem:[%s2518_s0 + $0xb8] sm:$0xff]  }
  0x22   :  { %1817 = vmatmul.mubr.bf16.vlgmr.msra.gmra.mrb[0].mxu0 %v355_v60  ;;  %v2067_v60 = vpack.c.bf16 %v307_v47, %v306_v46  ;;  %v261_v29 = vadd.f32 %v1963_v10, %v190_v21  ;;  %v324_v35 = vmax.f32 %v260_v27, 0.0  ;;  %v194_v40 = vmul.f32 %v1489_v31, %v1952_v5  ;;  %v1719_v46 = vld [vmem:[%s2518_s0 + $0xb0] sm:$0xff]   ;;  %v1710_v47 = vld [vmem:[%s2518_s0 + $0x68] sm:$0xff]  }
  0x23   :  { %1820 = vmatprep.mubr.bf16.mxu0 %v356_v0  ;;  %v1715_v0 = vld [vmem:[%s2518_s0 + $0x90] sm:$0xff]   ;;  %v370_v34 = vpack.c.bf16 %v323_v26, %v322_v20  ;;  %v1493_v43 = vunpack.c.h.bf16 %v1717_v24  ;;  %v195_v44 = vmul.f32 %v1492_v37, %v1952_v5  ;;  %v1497_v54 = vunpack.c.h.bf16 %v1718_v33 }
  0x24   :  { %v1484_v15 = vunpack.c.l.bf16 %v1715_v0  ;;  %v1485_v19 = vunpack.c.h.bf16 %v1715_v0  ;;  %v325_v38 = vmax.f32 %v261_v29, 0.0  ;;  %v265_v49 = vadd.f32 %v1963_v10, %v194_v40  ;;  %v1723_v40 = vld [vmem:[%s2518_s0 + $0xd0] sm:$0xff]  }
  0x25   :  { %1848 = vmatprep.mubr.bf16.mxu1 %v370_v34  ;;  %v198_v62 = vmul.f32 %v1497_v54, %v1952_v5  ;;  %v1500_v63 = vunpack.c.l.bf16 %v1719_v46  ;;  %v1501_v0 = vunpack.c.h.bf16 %v1719_v46  ;;  %v312_v4 = vmax.f32 %v2075_v3, 0.0 }
  0x26   :  { %v191_v22 = vmul.f32 %v1484_v15, %v1952_v5  ;;  %v192_v28 = vmul.f32 %v1485_v19, %v1952_v5  ;;  %v371_v48 = vpack.c.bf16 %v325_v38, %v324_v35  ;;  %v329_v61 = vmax.f32 %v265_v49, 0.0 }
  0x27   :  { %v1464_v8 = vunpack.c.l.bf16 %v1710_v47  ;;  %v313_v13 = vmax.f32 %v2080_v7, 0.0  ;;  %v1465_v14 = vunpack.c.h.bf16 %v1710_v47  ;;  %v199_v15 = vmul.f32 %v1500_v63, %v1952_v5 }
  0x28   :  { %v262_v30 = vadd.f32 %v1963_v10, %v191_v22  ;;  %v263_v36 = vadd.f32 %v1963_v10, %v192_v28  ;;  %1849 = vmatmul.mubr.bf16.vlgmr.msra.gmra.mrb[0].mxu1 %v371_v48  ;;  %v200_v17 = vmul.f32 %v1501_v0, %v1952_v5  ;;  %v180_v3 = vmul.f32 %v1461_v12, %v1952_v5 }
  0x29   :  { %v1504_v19 = vunpack.c.l.bf16 %v1720_v1  ;;  %v1505_v20 = vunpack.c.h.bf16 %v1720_v1  ;;  %v270_v24 = vadd.f32 %v1963_v10, %v199_v15  ;;  %v1508_v27 = vunpack.c.l.bf16 %v1721_v18  ;;  %v1724_v15 = vld [vmem:[%s2518_s0 + $0xd8] sm:$0xff]  }
  0x2a   :  { %1821 = vmatmul.mubr.bf16.gmra.mrb[4].mxu0 %v357_v32  ;;  %v193_v32 = vmul.f32 %v1488_v23, %v1952_v5  ;;  %v326_v39 = vmax.f32 %v262_v30, 0.0  ;;  %v327_v42 = vmax.f32 %v263_v36, 0.0  ;;  %v269_v23 = vadd.f32 %v1963_v10, %v198_v62 }
  0x2b   :  { %1824 = vmatprep.mubr.bf16.mxu0 %v358_v45  ;;  %v1496_v45 = vunpack.c.l.bf16 %v1718_v33  ;;  %v1509_v52 = vunpack.c.h.bf16 %v1721_v18  ;;  %v364_v12 = vpack.c.bf16 %v311_v6, %v310_v2  ;;  %v250_v28 = vadd.f32 %v1963_v10, %v2089_v16  ;;  %v1712_v33 = vld [vmem:[%s2518_s0 + $0x78] sm:$0xff]   ;;  %v1722_v16 = vld [vmem:[%s2518_s0 + $0xc8] sm:$0xff]  }
  0x2c   :  { %v264_v41 = vadd.f32 %v1963_v10, %v193_v32  ;;  %v372_v55 = vpack.c.bf16 %v327_v42, %v326_v39  ;;  %v251_v31 = vadd.f32 %v1963_v10, %v180_v3  ;;  %v181_v32 = vmul.f32 %v1464_v8, %v1952_v5 }
  0x2d   :  { %v197_v59 = vmul.f32 %v1496_v45, %v1952_v5  ;;  %v201_v34 = vmul.f32 %v1504_v19, %v1952_v5  ;;  %v202_v50 = vmul.f32 %v1505_v20, %v1952_v5  ;;  %v365_v35 = vpack.c.bf16 %v313_v13, %v312_v4 }
  0x2e   :  { %v328_v51 = vmax.f32 %v264_v41, 0.0  ;;  %1852 = vmatprep.mubr.bf16.mxu1 %v372_v55  ;;  %v182_v53 = vmul.f32 %v1465_v14, %v1952_v5  ;;  %v333_v6 = vmax.f32 %v269_v23, 0.0  ;;  %v334_v36 = vmax.f32 %v270_v24, 0.0 }
  0x2f   :  { %v268_v22 = vadd.f32 %v1963_v10, %v197_v59  ;;  %v203_v38 = vmul.f32 %v1508_v27, %v1952_v5  ;;  %v204_v39 = vmul.f32 %v1509_v52, %v1952_v5  ;;  %v314_v41 = vmax.f32 %v250_v28, 0.0 }
  0x30   :  { %v373_v21 = vpack.c.bf16 %v329_v61, %v328_v51  ;;  %v315_v45 = vmax.f32 %v251_v31, 0.0  ;;  %v272_v46 = vadd.f32 %v1963_v10, %v201_v34  ;;  %v273_v47 = vadd.f32 %v1963_v10, %v202_v50 }
  0x31   :  { %v332_v2 = vmax.f32 %v268_v22, 0.0  ;;  %v1512_v48 = vunpack.c.l.bf16 %v1722_v16  ;;  %v1513_v51 = vunpack.c.h.bf16 %v1722_v16  ;;  %v1516_v54 = vunpack.c.l.bf16 %v1723_v40 }
  0x32   :  { %1825 = vmatmul.mubr.bf16.gmra.mrb[8].mxu0 %v359_v56  ;;  %v196_v56 = vmul.f32 %v1493_v43, %v1952_v5  ;;  %1853 = vmatmul.mubr.bf16.gmra.mrb[4].mxu1 %v373_v21  ;;  %v1517_v55 = vunpack.c.h.bf16 %v1723_v40  ;;  %v275_v59 = vadd.f32 %v1963_v10, %v204_v39  ;;  %v253_v61 = vadd.f32 %v1963_v10, %v182_v53  ;;  %v1725_v21 = vld [vmem:[%s2518_s0 + $0xe0] sm:$0xff]  }
  0x33   :  { %1828 = vmatprep.mubr.bf16.mxu0 %v360_v57  ;;  %v266_v57 = vadd.f32 %v1963_v10, %v195_v44  ;;  %v1472_v44 = vunpack.c.l.bf16 %v1712_v33  ;;  %v375_v49 = vpack.c.bf16 %v333_v6, %v332_v2  ;;  %v1473_v0 = vunpack.c.h.bf16 %v1712_v33 }
  0x34   :  { %v267_v9 = vadd.f32 %v1963_v10, %v196_v56  ;;  %v252_v56 = vadd.f32 %v1963_v10, %v181_v32  ;;  %v366_v1 = vpack.c.bf16 %v315_v45, %v314_v41  ;;  %v336_v4 = vmax.f32 %v272_v46, 0.0  ;;  %v1727_v41 = vld [vmem:[%s2518_s0 + $0xf0] sm:$0xff]  }
  0x35   :  { %v330_v11 = vmax.f32 %v266_v57, 0.0  ;;  %v274_v57 = vadd.f32 %v1963_v10, %v203_v38  ;;  %v337_v8 = vmax.f32 %v273_v47, 0.0  ;;  %v207_v13 = vmul.f32 %v1516_v54, %v1952_v5 }
  0x36   :  { %v331_v7 = vmax.f32 %v267_v9, 0.0  ;;  %v205_v9 = vmul.f32 %v1512_v48, %v1952_v5  ;;  %v208_v14 = vmul.f32 %v1517_v55, %v1952_v5  ;;  %v339_v3 = vmax.f32 %v275_v59, 0.0 }
  0x37   :  { %v338_v18 = vmax.f32 %v274_v57, 0.0  ;;  %v186_v20 = vmul.f32 %v1473_v0, %v1952_v5  ;;  %v377_v23 = vpack.c.bf16 %v337_v8, %v336_v4  ;;  %v278_v27 = vadd.f32 %v1963_v10, %v207_v13 }
  0x38   :  { %v374_v26 = vpack.c.bf16 %v331_v7, %v330_v11  ;;  %v206_v11 = vmul.f32 %v1513_v51, %v1952_v5  ;;  %v317_v7 = vmax.f32 %v253_v61, 0.0  ;;  %v276_v24 = vadd.f32 %v1963_v10, %v205_v9 }
  0x39   :  { %v279_v52 = vadd.f32 %v1963_v10, %v208_v14  ;;  %v378_v28 = vpack.c.bf16 %v339_v3, %v338_v18  ;;  %v257_v33 = vadd.f32 %v1963_v10, %v186_v20  ;;  %v342_v2 = vmax.f32 %v278_v27, 0.0 }
  0x3a   :  { %1829 = vmatmul.mubr.bf16.gmra.mrb[12].mxu0 %v2062_v58  ;;  %v1711_v58 = vld [vmem:[%s2518_s0 + $0x70] sm:$0xff]   ;;  %1856 = vmatprep.mubr.bf16.mxu1 %v374_v26  ;;  %v1520_v26 = vunpack.c.l.bf16 %v1724_v15  ;;  %v340_v50 = vmax.f32 %v276_v24, 0.0  ;;  %v1532_v51 = vunpack.c.l.bf16 %v1727_v41  ;;  %v1533_v54 = vunpack.c.h.bf16 %v1727_v41 }
  0x3b   :  { %1832 = vmatprep.mubr.bf16.mxu0 %v2067_v60  ;;  %v271_v60 = vadd.f32 %v1963_v10, %v200_v17  ;;  %v1468_v29 = vunpack.c.l.bf16 %v1711_v58  ;;  %v1469_v30 = vunpack.c.h.bf16 %v1711_v58  ;;  %1857 = vmatmul.mubr.bf16.gmra.mrb[8].mxu1 %v375_v49  ;;  %v185_v17 = vmul.f32 %v1472_v44, %v1952_v5 }
  0x3c   :  { %v316_v58 = vmax.f32 %v252_v56, 0.0  ;;  %v343_v6 = vmax.f32 %v279_v52, 0.0  ;;  %v321_v40 = vmax.f32 %v257_v33, 0.0  ;;  %v216_v0 = vmul.f32 %v1533_v54, %v1952_v5 }
  0x3d   :  { %v335_v37 = vmax.f32 %v271_v60, 0.0  ;;  %v183_v42 = vmul.f32 %v1468_v29, %v1952_v5  ;;  %v184_v43 = vmul.f32 %v1469_v30, %v1952_v5  ;;  %v277_v60 = vadd.f32 %v1963_v10, %v206_v11 }
  0x3e   :  { %v1524_v29 = vunpack.c.l.bf16 %v1725_v21  ;;  %v1525_v30 = vunpack.c.h.bf16 %v1725_v21  ;;  %v367_v31 = vpack.c.bf16 %v317_v7, %v316_v58  ;;  %v256_v32 = vadd.f32 %v1963_v10, %v185_v17 }
  0x3f   :  { %v254_v62 = vadd.f32 %v1963_v10, %v183_v42  ;;  %v255_v63 = vadd.f32 %v1963_v10, %v184_v43  ;;  %v341_v53 = vmax.f32 %v277_v60, 0.0  ;;  %v380_v45 = vpack.c.bf16 %v343_v6, %v342_v2 }
  0x40   :  { %v212_v38 = vmul.f32 %v1525_v30, %v1952_v5  ;;  %v320_v39 = vmax.f32 %v256_v32, 0.0  ;;  %v287_v17 = vadd.f32 %v1963_v10, %v216_v0 }
  0x41   :  { %v318_v19 = vmax.f32 %v254_v62, 0.0  ;;  %v319_v22 = vmax.f32 %v255_v63, 0.0  ;;  %v379_v44 = vpack.c.bf16 %v341_v53, %v340_v50  ;;  %v215_v63 = vmul.f32 %v1532_v51, %v1952_v5 }
  0x42   :  { %1833 = vmatmul.mubr.bf16.gmra.mrb[16].mxu0 %v2098_v25  ;;  %v376_v25 = vpack.c.bf16 %v335_v37, %v334_v36  ;;  %v1726_v36 = vld [vmem:[%s2518_s0 + $0xe8] sm:$0xff]   ;;  %v211_v37 = vmul.f32 %v1524_v29, %v1952_v5  ;;  %v283_v49 = vadd.f32 %v1963_v10, %v212_v38  ;;  %v369_v55 = vpack.c.bf16 %v321_v40, %v320_v39 }
  0x43   :  { %1836 = vmatprep.mubr.bf16.mxu0 %v364_v12  ;;  %v1521_v12 = vunpack.c.h.bf16 %v1724_v15  ;;  %v368_v34 = vpack.c.bf16 %v319_v22, %v318_v19  ;;  %v1528_v43 = vunpack.c.l.bf16 %v1726_v36  ;;  %v1529_v47 = vunpack.c.h.bf16 %v1726_v36 }
  0x44   :  { %1860 = vmatprep.mubr.bf16.mxu1 %v376_v25  ;;  %v282_v48 = vadd.f32 %v1963_v10, %v211_v37  ;;  %v347_v62 = vmax.f32 %v283_v49, 0.0  ;;  %v286_v15 = vadd.f32 %v1963_v10, %v215_v63  ;;  %v351_v20 = vmax.f32 %v287_v17, 0.0 }
  0x45   :  { %1861 = vmatmul.mubr.bf16.gmra.mrb[12].mxu1 %v377_v23  ;;  %v210_v16 = vmul.f32 %v1521_v12, %v1952_v5  ;;  %v213_v56 = vmul.f32 %v1528_v43, %v1952_v5  ;;  %v214_v59 = vmul.f32 %v1529_v47, %v1952_v5 }
  0x46   :  { %1864 = vmatprep.mubr.bf16.mxu1 %v378_v28  ;;  %v346_v61 = vmax.f32 %v282_v48, 0.0  ;;  %v350_v19 = vmax.f32 %v286_v15, 0.0 }
  0x47   :  { %v281_v46 = vadd.f32 %v1963_v10, %v210_v16  ;;  %v284_v4 = vadd.f32 %v1963_v10, %v213_v56  ;;  %v285_v9 = vadd.f32 %v1963_v10, %v214_v59 }
  0x48   :  { %v382_v14 = vpack.c.bf16 %v347_v62, %v346_v61  ;;  %v384_v24 = vpack.c.bf16 %v351_v20, %v350_v19 }
  0x49   :  { %v345_v57 = vmax.f32 %v281_v46, 0.0  ;;  %v348_v18 = vmax.f32 %v284_v4, 0.0  ;;  %v349_v3 = vmax.f32 %v285_v9, 0.0 }
  0x4a   :  { %1837 = vmatmul.mubr.bf16.gmra.mrb[20].mxu0 %v365_v35  ;;  %v209_v35 = vmul.f32 %v1520_v26, %v1952_v5 }
  0x4b   :  { %1840 = vmatprep.mubr.bf16.mxu0 %v366_v1  ;;  %v1728_v1 = vld [vmem:[%s2518_s0 + $0xf8] sm:$0xff]   ;;  %v383_v21 = vpack.c.bf16 %v349_v3, %v348_v18 }
  0x4c   :  { %v280_v42 = vadd.f32 %v1963_v10, %v209_v35  ;;  %v1536_v11 = vunpack.c.l.bf16 %v1728_v1  ;;  %v1537_v13 = vunpack.c.h.bf16 %v1728_v1 }
  0x4d   :  { %1865 = vmatmul.mubr.bf16.gmra.mrb[16].mxu1 %v379_v44 }
  0x4e   :  { %v344_v25 = vmax.f32 %v280_v42, 0.0  ;;  %1868 = vmatprep.mubr.bf16.mxu1 %v380_v45  ;;  %v217_v58 = vmul.f32 %v1536_v11, %v1952_v5  ;;  %v218_v7 = vmul.f32 %v1537_v13, %v1952_v5 }
  0x50   :  { %v381_v8 = vpack.c.bf16 %v345_v57, %v344_v25  ;;  %v288_v22 = vadd.f32 %v1963_v10, %v217_v58  ;;  %v289_v23 = vadd.f32 %v1963_v10, %v218_v7 }
  0x52   :  { %1841 = vmatmul.mubr.bf16.gmra.mrb[24].mxu0 %v367_v31  ;;  %v352_v26 = vmax.f32 %v288_v22, 0.0  ;;  %v353_v60 = vmax.f32 %v289_v23, 0.0 }
  0x53   :  { %1844 = vmatprep.mubr.bf16.mxu0 %v368_v34 }
  0x54   :  { %v385_v27 = vpack.c.bf16 %v353_v60, %v352_v26 }
  0x55   :  { %1869 = vmatmul.mubr.bf16.gmra.mrb[20].mxu1 %v381_v8 }
  0x56   :  { %1872 = vmatprep.mubr.bf16.mxu1 %v382_v14 }
  0x5a   :  { %1845 = vmatmul.mubr.bf16.gmra.mrb[28].mxu0 %v369_v55 }
  0x5d   :  { %1873 = vmatmul.mubr.bf16.gmra.mrb[24].mxu1 %v383_v21 }
  0x5e   :  { %1876 = vmatprep.mubr.bf16.mxu1 %v384_v24 }
  0x65   :  { %1877 = vmatmul.mubr.bf16.gmra.mrb[28].mxu1 %v385_v27 }
  0xf5   :  { %v1818_v52 = vpop.f32.mrb[0].mxu0 }
  0xf6   :  { %v484_v12 = vpop.f32.mrb[1].mxu0  ;;  %v1130_v10 = vmul.f32 %v1818_v52, %v1818_v52 }
  0xf7   :  { %v1819_v28 = vpop.f32.mrb[2].mxu0  ;;  %v1128_v30 = vmul.f32 %v484_v12, %v484_v12 }
  0xf8   :  { %v1546_v29 = vpack.c.bf16 %v1819_v28, %v1818_v52  ;;  %v487_v5 = vpop.f32.mrb[3].mxu0  ;;  %v1131_v35 = vmul.f32 %v1819_v28, %v1819_v28 }
  0xf9   :  { %v1541_v31 = vpack.c.bf16 %v487_v5, %v484_v12  ;;  %v1059_v32 = vadd.f32 %v487_v5, %v484_v12  ;;  %v1129_v33 = vmul.f32 %v487_v5, %v487_v5 }
  0xfa   :  { %1729 = vst [vmem:[%s2521_s4 + $0x8] sm:$0xff] %v1546_v29  }
  0xfb   :  { %1542 = vst [vmem:[%s2521_s4] sm:$0xff] %v1541_v31   ;;  %v1060_v34 = vadd.f32 %v1818_v52, %v1059_v32  ;;  %v1192_v50 = vadd.f32 %v1129_v33, %v1128_v30  ;;  %v2244_v14 = vpop.f32.mrb[0].mxu1 }
  0xfc   :  { %v2246_v15 = vpop.f32.mrb[1].mxu1 }
  0xfd   :  { %v1193_v53 = vadd.f32 %v1192_v50, %v1130_v10  ;;  %v1822_v2 = vpop.f32.mrb[4].mxu0  ;;  %v1061_v6 = vadd.f32 %v1819_v28, %v1060_v34  ;;  %v2248_v7 = vpop.f32.mrb[2].mxu1 }
  0xfe   :  { %v500_v16 = vpop.f32.mrb[5].mxu0  ;;  %v1134_v46 = vmul.f32 %v1822_v2, %v1822_v2  ;;  %v1626_v20 = vpack.c.bf16 %v2248_v7, %v2244_v14  ;;  %v2252_v21 = vpop.f32.mrb[3].mxu1 }
  0xff   :  { %v1062_v36 = vadd.f32 %v1061_v6, %v500_v16  ;;  %v1132_v37 = vmul.f32 %v500_v16, %v500_v16  ;;  %v1194_v38 = vadd.f32 %v1193_v53, %v1131_v35  ;;  %v1823_v39 = vpop.f32.mrb[6].mxu0  ;;  %v1621_v60 = vpack.c.bf16 %v2252_v21, %v2246_v15 }
 0x100   :  { %v1556_v40 = vpack.c.bf16 %v1823_v39, %v1822_v2  ;;  %v503_v41 = vpop.f32.mrb[7].mxu0  ;;  %v1135_v49 = vmul.f32 %v1823_v39, %v1823_v39  ;;  %1745 = vst [vmem:[%s2521_s4 + $0x88] sm:$0xff] %v1626_v20  }
 0x101   :  { %v1195_v42 = vadd.f32 %v1194_v38, %v1132_v37  ;;  %v1551_v43 = vpack.c.bf16 %v503_v41, %v500_v16  ;;  %v1063_v44 = vadd.f32 %v1062_v36, %v503_v41  ;;  %v1133_v45 = vmul.f32 %v503_v41, %v503_v41  ;;  %1744 = vst [vmem:[%s2521_s4 + $0x80] sm:$0xff] %v1621_v60  }
 0x102   :  { %1731 = vst [vmem:[%s2521_s4 + $0x18] sm:$0xff] %v1556_v40  }
 0x103   :  { %1730 = vst [vmem:[%s2521_s4 + $0x10] sm:$0xff] %v1551_v43   ;;  %v1064_v47 = vadd.f32 %v1822_v2, %v1063_v44  ;;  %v1196_v48 = vadd.f32 %v1195_v42, %v1133_v45 }
 0x105   :  { %v1197_v51 = vadd.f32 %v1196_v48, %v1134_v46  ;;  %v1826_v54 = vpop.f32.mrb[8].mxu0  ;;  %v1065_v55 = vadd.f32 %v1823_v39, %v1064_v47  ;;  %v2268_v33 = vpop.f32.mrb[4].mxu1 }
 0x106   :  { %v516_v56 = vpop.f32.mrb[9].mxu0  ;;  %v1138_v9 = vmul.f32 %v1826_v54, %v1826_v54  ;;  %v2270_v10 = vpop.f32.mrb[5].mxu1 }
 0x107   :  { %v1066_v25 = vadd.f32 %v1065_v55, %v516_v56  ;;  %v1136_v57 = vmul.f32 %v516_v56, %v516_v56  ;;  %v1198_v59 = vadd.f32 %v1197_v51, %v1135_v49  ;;  %v1827_v61 = vpop.f32.mrb[10].mxu0  ;;  %v2272_v2 = vpop.f32.mrb[6].mxu1 }
 0x108   :  { %v1566_v62 = vpack.c.bf16 %v1827_v61, %v1826_v54  ;;  %v519_v63 = vpop.f32.mrb[11].mxu0  ;;  %v1139_v17 = vmul.f32 %v1827_v61, %v1827_v61  ;;  %v1636_v16 = vpack.c.bf16 %v2272_v2, %v2268_v33  ;;  %v2276_v36 = vpop.f32.mrb[7].mxu1 }
 0x109   :  { %v1199_v0 = vadd.f32 %v1198_v59, %v1136_v57  ;;  %v1561_v1 = vpack.c.bf16 %v519_v63, %v516_v56  ;;  %v1067_v4 = vadd.f32 %v1066_v25, %v519_v63  ;;  %v1137_v8 = vmul.f32 %v519_v63, %v519_v63 }
 0x10a   :  { %1733 = vst [vmem:[%s2521_s4 + $0x28] sm:$0xff] %v1566_v62   ;;  %v1631_v41 = vpack.c.bf16 %v2276_v36, %v2270_v10  ;;  %1747 = vst [vmem:[%s2521_s4 + $0x98] sm:$0xff] %v1636_v16  }
 0x10b   :  { %1732 = vst [vmem:[%s2521_s4 + $0x20] sm:$0xff] %v1561_v1   ;;  %v1068_v11 = vadd.f32 %v1826_v54, %v1067_v4  ;;  %v1200_v13 = vadd.f32 %v1199_v0, %v1137_v8 }
 0x10c   :  { %1746 = vst [vmem:[%s2521_s4 + $0x90] sm:$0xff] %v1631_v41  }
 0x10d   :  { %v1201_v18 = vadd.f32 %v1200_v13, %v1138_v9  ;;  %v1830_v3 = vpop.f32.mrb[12].mxu0  ;;  %v1069_v58 = vadd.f32 %v1827_v61, %v1068_v11 }
 0x10e   :  { %v532_v19 = vpop.f32.mrb[13].mxu0  ;;  %v1142_v30 = vmul.f32 %v1830_v3, %v1830_v3  ;;  %v2292_v54 = vpop.f32.mrb[8].mxu1 }
 0x10f   :  { %v1070_v22 = vadd.f32 %v1069_v58, %v532_v19  ;;  %v1140_v23 = vmul.f32 %v532_v19, %v532_v19  ;;  %v1202_v24 = vadd.f32 %v1201_v18, %v1139_v17  ;;  %v1831_v26 = vpop.f32.mrb[14].mxu0  ;;  %v2294_v55 = vpop.f32.mrb[9].mxu1 }
 0x110   :  { %v1576_v27 = vpack.c.bf16 %v1831_v26, %v1830_v3  ;;  %v535_v52 = vpop.f32.mrb[15].mxu0  ;;  %v1143_v34 = vmul.f32 %v1831_v26, %v1831_v26  ;;  %v2296_v61 = vpop.f32.mrb[10].mxu1 }
 0x111   :  { %v1203_v12 = vadd.f32 %v1202_v24, %v1140_v23  ;;  %v1571_v28 = vpack.c.bf16 %v535_v52, %v532_v19  ;;  %v1071_v29 = vadd.f32 %v1070_v22, %v535_v52  ;;  %v1141_v5 = vmul.f32 %v535_v52, %v535_v52  ;;  %v2300_v0 = vpop.f32.mrb[11].mxu1 }
 0x112   :  { %1735 = vst [vmem:[%s2521_s4 + $0x38] sm:$0xff] %v1576_v27   ;;  %v1646_v63 = vpack.c.bf16 %v2296_v61, %v2292_v54  ;;  %v1641_v11 = vpack.c.bf16 %v2300_v0, %v2294_v55 }
 0x113   :  { %1734 = vst [vmem:[%s2521_s4 + $0x30] sm:$0xff] %v1571_v28   ;;  %v1072_v31 = vadd.f32 %v1830_v3, %v1071_v29  ;;  %v1204_v32 = vadd.f32 %v1203_v12, %v1141_v5 }
 0x114   :  { %1749 = vst [vmem:[%s2521_s4 + $0xa8] sm:$0xff] %v1646_v63   ;;  %1748 = vst [vmem:[%s2521_s4 + $0xa0] sm:$0xff] %v1641_v11  }
 0x115   :  { %v1205_v50 = vadd.f32 %v1204_v32, %v1142_v30  ;;  %v1834_v35 = vpop.f32.mrb[16].mxu0  ;;  %v1073_v53 = vadd.f32 %v1831_v26, %v1072_v31 }
 0x116   :  { %v548_v6 = vpop.f32.mrb[17].mxu0  ;;  %v1146_v48 = vmul.f32 %v1834_v35, %v1834_v35 }
 0x117   :  { %v1074_v37 = vadd.f32 %v1073_v53, %v548_v6  ;;  %v1144_v38 = vmul.f32 %v548_v6, %v548_v6  ;;  %v1206_v39 = vadd.f32 %v1205_v50, %v1143_v34  ;;  %v1835_v40 = vpop.f32.mrb[18].mxu0 }
 0x118   :  { %v1586_v42 = vpack.c.bf16 %v1835_v40, %v1834_v35  ;;  %v551_v43 = vpop.f32.mrb[19].mxu0  ;;  %v1147_v56 = vmul.f32 %v1835_v40, %v1835_v40  ;;  %v2316_v24 = vpop.f32.mrb[12].mxu1 }
 0x119   :  { %v1207_v44 = vadd.f32 %v1206_v39, %v1144_v38  ;;  %v1581_v45 = vpack.c.bf16 %v551_v43, %v548_v6  ;;  %v1075_v46 = vadd.f32 %v1074_v37, %v551_v43  ;;  %v1145_v47 = vmul.f32 %v551_v43, %v551_v43  ;;  %v2318_v26 = vpop.f32.mrb[13].mxu1 }
 0x11a   :  { %1737 = vst [vmem:[%s2521_s4 + $0x48] sm:$0xff] %v1586_v42   ;;  %v2320_v28 = vpop.f32.mrb[14].mxu1 }
 0x11b   :  { %1736 = vst [vmem:[%s2521_s4 + $0x40] sm:$0xff] %v1581_v45   ;;  %v1076_v49 = vadd.f32 %v1834_v35, %v1075_v46  ;;  %v1208_v51 = vadd.f32 %v1207_v44, %v1145_v47  ;;  %v1656_v5 = vpack.c.bf16 %v2320_v28, %v2316_v24  ;;  %v2324_v30 = vpop.f32.mrb[15].mxu1 }
 0x11c   :  { %v1651_v35 = vpack.c.bf16 %v2324_v30, %v2318_v26 }
 0x11d   :  { %v1209_v25 = vadd.f32 %v1208_v51, %v1146_v48  ;;  %v1838_v57 = vpop.f32.mrb[20].mxu0  ;;  %v1077_v59 = vadd.f32 %v1835_v40, %v1076_v49  ;;  %1751 = vst [vmem:[%s2521_s4 + $0xb8] sm:$0xff] %v1656_v5  }
 0x11e   :  { %v564_v62 = vpop.f32.mrb[21].mxu0  ;;  %v1150_v20 = vmul.f32 %v1838_v57, %v1838_v57  ;;  %1750 = vst [vmem:[%s2521_s4 + $0xb0] sm:$0xff] %v1651_v35   ;;  %v1161_v35 = vmul.f32 %v2252_v21, %v2252_v21 }
 0x11f   :  { %v1078_v1 = vadd.f32 %v1077_v59, %v564_v62  ;;  %v1148_v4 = vmul.f32 %v564_v62, %v564_v62  ;;  %v1210_v8 = vadd.f32 %v1209_v25, %v1147_v56  ;;  %v1839_v9 = vpop.f32.mrb[22].mxu0 }
 0x120   :  { %v1596_v13 = vpack.c.bf16 %v1839_v9, %v1838_v57  ;;  %v567_v17 = vpop.f32.mrb[23].mxu0  ;;  %v1151_v60 = vmul.f32 %v1839_v9, %v1839_v9  ;;  %v2340_v43 = vpop.f32.mrb[16].mxu1 }
 0x121   :  { %v1211_v18 = vadd.f32 %v1210_v8, %v1148_v4  ;;  %v1591_v3 = vpack.c.bf16 %v567_v17, %v564_v62  ;;  %v1079_v58 = vadd.f32 %v1078_v1, %v567_v17  ;;  %v1149_v19 = vmul.f32 %v567_v17, %v567_v17  ;;  %v2342_v44 = vpop.f32.mrb[17].mxu1 }
 0x122   :  { %1739 = vst [vmem:[%s2521_s4 + $0x58] sm:$0xff] %v1596_v13   ;;  %v2344_v49 = vpop.f32.mrb[18].mxu1 }
 0x123   :  { %1738 = vst [vmem:[%s2521_s4 + $0x50] sm:$0xff] %v1591_v3   ;;  %v1080_v22 = vadd.f32 %v1838_v57, %v1079_v58  ;;  %v1212_v23 = vadd.f32 %v1211_v18, %v1149_v19  ;;  %v1666_v56 = vpack.c.bf16 %v2344_v49, %v2340_v43  ;;  %v2348_v25 = vpop.f32.mrb[19].mxu1 }
 0x124   :  { %v1661_v1 = vpack.c.bf16 %v2348_v25, %v2342_v44 }
 0x125   :  { %v1213_v27 = vadd.f32 %v1212_v23, %v1150_v20  ;;  %v1842_v52 = vpop.f32.mrb[24].mxu0  ;;  %v1081_v12 = vadd.f32 %v1839_v9, %v1080_v22  ;;  %1753 = vst [vmem:[%s2521_s4 + $0xc8] sm:$0xff] %v1666_v56  }
 0x126   :  { %v580_v29 = vpop.f32.mrb[25].mxu0  ;;  %v1154_v40 = vmul.f32 %v1842_v52, %v1842_v52  ;;  %1752 = vst [vmem:[%s2521_s4 + $0xc0] sm:$0xff] %v1661_v1  }
 0x127   :  { %v1082_v31 = vadd.f32 %v1081_v12, %v580_v29  ;;  %v1152_v32 = vmul.f32 %v580_v29, %v580_v29  ;;  %v1214_v34 = vadd.f32 %v1213_v27, %v1151_v60  ;;  %v1843_v50 = vpop.f32.mrb[26].mxu0  ;;  %v1160_v27 = vmul.f32 %v2246_v15, %v2246_v15 }
 0x128   :  { %v1606_v53 = vpack.c.bf16 %v1843_v50, %v1842_v52  ;;  %v583_v6 = vpop.f32.mrb[27].mxu0  ;;  %v1155_v45 = vmul.f32 %v1843_v50, %v1843_v50  ;;  %v2364_v19 = vpop.f32.mrb[20].mxu1 }
 0x129   :  { %v1215_v16 = vadd.f32 %v1214_v34, %v1152_v32  ;;  %v1601_v37 = vpack.c.bf16 %v583_v6, %v580_v29  ;;  %v1083_v38 = vadd.f32 %v1082_v31, %v583_v6  ;;  %v1153_v39 = vmul.f32 %v583_v6, %v583_v6  ;;  %v2366_v20 = vpop.f32.mrb[21].mxu1 }
 0x12a   :  { %1741 = vst [vmem:[%s2521_s4 + $0x68] sm:$0xff] %v1606_v53  }
 0x12b   :  { %1740 = vst [vmem:[%s2521_s4 + $0x60] sm:$0xff] %v1601_v37   ;;  %v1084_v41 = vadd.f32 %v1842_v52, %v1083_v38  ;;  %v1216_v42 = vadd.f32 %v1215_v16, %v1153_v39  ;;  %v2370_v52 = vpop.f32.mrb[22].mxu1  ;;  %v1163_v38 = vmul.f32 %v2248_v7, %v2248_v7 }
 0x12c   :  { %v1676_v12 = vpack.c.bf16 %v2370_v52, %v2364_v19  ;;  %v2374_v29 = vpop.f32.mrb[23].mxu1 }
 0x12d   :  { %v1217_v46 = vadd.f32 %v1216_v42, %v1154_v40  ;;  %v1846_v47 = vpop.f32.mrb[28].mxu0  ;;  %v1085_v48 = vadd.f32 %v1843_v50, %v1084_v41  ;;  %v1671_v32 = vpack.c.bf16 %v2374_v29, %v2366_v20  ;;  %v1164_v40 = vmul.f32 %v2270_v10, %v2270_v10 }
 0x12e   :  { %v596_v51 = vpop.f32.mrb[29].mxu0  ;;  %v1158_v18 = vmul.f32 %v1846_v47, %v1846_v47  ;;  %1755 = vst [vmem:[%s2521_s4 + $0xd8] sm:$0xff] %v1676_v12   ;;  %v1172_v12 = vmul.f32 %v2318_v26, %v2318_v26 }
 0x12f   :  { %v1086_v57 = vadd.f32 %v1085_v48, %v596_v51  ;;  %v1156_v59 = vmul.f32 %v596_v51, %v596_v51  ;;  %v1218_v62 = vadd.f32 %v1217_v46, %v1155_v45  ;;  %v1847_v63 = vpop.f32.mrb[30].mxu0  ;;  %1754 = vst [vmem:[%s2521_s4 + $0xd0] sm:$0xff] %v1671_v32  }
 0x130   :  { %v1616_v4 = vpack.c.bf16 %v1847_v63, %v1846_v47  ;;  %v599_v8 = vpop.f32.mrb[31].mxu0  ;;  %v1159_v22 = vmul.f32 %v1847_v63, %v1847_v63  ;;  %v2391_v16 = vpop.f32.mrb[24].mxu1 }
 0x131   :  { %v1219_v9 = vadd.f32 %v1218_v62, %v1156_v59  ;;  %v1611_v11 = vpack.c.bf16 %v599_v8, %v596_v51  ;;  %v1087_v13 = vadd.f32 %v1086_v57, %v599_v8  ;;  %v1157_v17 = vmul.f32 %v599_v8, %v599_v8  ;;  %v2393_v37 = vpop.f32.mrb[25].mxu1 }
 0x132   :  { %1743 = vst [vmem:[%s2521_s4 + $0x78] sm:$0xff] %v1616_v4   ;;  %v2400_v41 = vpop.f32.mrb[26].mxu1  ;;  %v1165_v51 = vmul.f32 %v2276_v36, %v2276_v36  ;;  %v1168_v4 = vmul.f32 %v2294_v55, %v2294_v55 }
 0x133   :  { %1742 = vst [vmem:[%s2521_s4 + $0x70] sm:$0xff] %v1611_v11   ;;  %v1088_v3 = vadd.f32 %v1846_v47, %v1087_v13  ;;  %v1220_v58 = vadd.f32 %v1219_v9, %v1157_v17  ;;  %v1686_v42 = vpack.c.bf16 %v2400_v41, %v2391_v16 }
 0x135   :  { %v1221_v23 = vadd.f32 %v1220_v58, %v1158_v18  ;;  %v1089_v60 = vadd.f32 %v1847_v63, %v1088_v3  ;;  %1757 = vst [vmem:[%s2521_s4 + $0xe8] sm:$0xff] %v1686_v42   ;;  %v1167_v63 = vmul.f32 %v2272_v2, %v2272_v2  ;;  %v1169_v3 = vmul.f32 %v2300_v0, %v2300_v0 }
 0x137   :  { %v1090_v5 = vadd.f32 %v1089_v60, %v2246_v15  ;;  %v1222_v31 = vadd.f32 %v1221_v23, %v1159_v22  ;;  %v1162_v15 = vmul.f32 %v2244_v14, %v2244_v14  ;;  %v1171_v23 = vmul.f32 %v2296_v61, %v2296_v61 }
 0x139   :  { %v1223_v34 = vadd.f32 %v1222_v31, %v1160_v27  ;;  %v1091_v50 = vadd.f32 %v1090_v5, %v2252_v21 }
 0x13b   :  { %v1092_v53 = vadd.f32 %v2244_v14, %v1091_v50  ;;  %v1224_v6 = vadd.f32 %v1223_v34, %v1161_v35  ;;  %v2404_v14 = vpop.f32.mrb[27].mxu1  ;;  %v1173_v34 = vmul.f32 %v2324_v30, %v2324_v30 }
 0x13c   :  { %v1681_v47 = vpack.c.bf16 %v2404_v14, %v2393_v37  ;;  %v2421_v59 = vpop.f32.mrb[28].mxu1 }
 0x13d   :  { %v1225_v39 = vadd.f32 %v1224_v6, %v1162_v15  ;;  %v1093_v21 = vadd.f32 %v2248_v7, %v1092_v53  ;;  %v2423_v62 = vpop.f32.mrb[29].mxu1 }
 0x13e   :  { %1756 = vst [vmem:[%s2521_s4 + $0xe0] sm:$0xff] %v1681_v47   ;;  %v2430_v8 = vpop.f32.mrb[30].mxu1 }
 0x13f   :  { %v1094_v45 = vadd.f32 %v1093_v21, %v2270_v10  ;;  %v1226_v46 = vadd.f32 %v1225_v39, %v1163_v38  ;;  %v1166_v10 = vmul.f32 %v2268_v33, %v2268_v33  ;;  %v1696_v9 = vpack.c.bf16 %v2430_v8, %v2421_v59 }
 0x140   :  { %v1177_v21 = vmul.f32 %v2348_v25, %v2348_v25 }
 0x141   :  { %v1227_v7 = vadd.f32 %v1226_v46, %v1164_v40  ;;  %v1095_v48 = vadd.f32 %v1094_v45, %v2276_v36  ;;  %1759 = vst [vmem:[%s2521_s4 + $0xf8] sm:$0xff] %v1696_v9   ;;  %v1185_v9 = vmul.f32 %v2404_v14, %v2404_v14 }
 0x143   :  { %v1096_v56 = vadd.f32 %v2268_v33, %v1095_v48  ;;  %v1228_v57 = vadd.f32 %v1227_v7, %v1165_v51  ;;  %v2434_v33 = vpop.f32.mrb[31].mxu1  ;;  %v1181_v51 = vmul.f32 %v2374_v29, %v2374_v29 }
 0x144   :  { %v1691_v17 = vpack.c.bf16 %v2434_v33, %v2423_v62 }
 0x145   :  { %v1229_v1 = vadd.f32 %v1228_v57, %v1166_v10  ;;  %v1097_v36 = vadd.f32 %v2272_v2, %v1096_v56 }
 0x146   :  { %1758 = vst [vmem:[%s2521_s4 + $0xf0] sm:$0xff] %v1691_v17  }
 0x147   :  { %v1098_v11 = vadd.f32 %v1097_v36, %v2294_v55  ;;  %v1230_v13 = vadd.f32 %v1229_v1, %v1167_v63  ;;  %v1170_v55 = vmul.f32 %v2292_v54, %v2292_v54 }
 0x149   :  { %v1231_v2 = vadd.f32 %v1230_v13, %v1168_v4  ;;  %v1099_v18 = vadd.f32 %v1098_v11, %v2300_v0 }
 0x14b   :  { %v1100_v58 = vadd.f32 %v2292_v54, %v1099_v18  ;;  %v1232_v22 = vadd.f32 %v1231_v2, %v1169_v3  ;;  %v1174_v54 = vmul.f32 %v2316_v24, %v2316_v24 }
 0x14d   :  { %v1233_v60 = vadd.f32 %v1232_v22, %v1170_v55  ;;  %v1101_v27 = vadd.f32 %v2296_v61, %v1100_v58  ;;  %v1175_v61 = vmul.f32 %v2320_v28, %v2320_v28  ;;  %v1189_v58 = vmul.f32 %v2434_v33, %v2434_v33 }
 0x14f   :  { %v1102_v0 = vadd.f32 %v1101_v27, %v2318_v26  ;;  %v1234_v5 = vadd.f32 %v1233_v60, %v1171_v23  ;;  %v1176_v26 = vmul.f32 %v2342_v44, %v2342_v44 }
 0x151   :  { %v1235_v31 = vadd.f32 %v1234_v5, %v1172_v12  ;;  %v1103_v32 = vadd.f32 %v1102_v0, %v2324_v30 }
 0x153   :  { %v1104_v50 = vadd.f32 %v2316_v24, %v1103_v32  ;;  %v1236_v35 = vadd.f32 %v1235_v31, %v1173_v34  ;;  %v1178_v24 = vmul.f32 %v2340_v43, %v2340_v43 }
 0x155   :  { %v1237_v15 = vadd.f32 %v1236_v35, %v1174_v54  ;;  %v1105_v53 = vadd.f32 %v2320_v28, %v1104_v50  ;;  %v1179_v28 = vmul.f32 %v2344_v49, %v2344_v49 }
 0x157   :  { %v1106_v6 = vadd.f32 %v1105_v53, %v2342_v44  ;;  %v1238_v38 = vadd.f32 %v1237_v15, %v1175_v61  ;;  %v1180_v44 = vmul.f32 %v2366_v20, %v2366_v20 }
 0x159   :  { %v1239_v39 = vadd.f32 %v1238_v38, %v1176_v26  ;;  %v1107_v30 = vadd.f32 %v1106_v6, %v2348_v25 }
 0x15b   :  { %v1108_v40 = vadd.f32 %v2340_v43, %v1107_v30  ;;  %v1240_v42 = vadd.f32 %v1239_v39, %v1177_v21  ;;  %v1182_v43 = vmul.f32 %v2364_v19, %v2364_v19 }
 0x15d   :  { %v1241_v45 = vadd.f32 %v1240_v42, %v1178_v24  ;;  %v1109_v46 = vadd.f32 %v2344_v49, %v1108_v40  ;;  %v1183_v49 = vmul.f32 %v2370_v52, %v2370_v52 }
 0x15f   :  { %v1110_v47 = vadd.f32 %v1109_v46, %v2366_v20  ;;  %v1242_v7 = vadd.f32 %v1241_v45, %v1179_v28  ;;  %v1184_v20 = vmul.f32 %v2393_v37, %v2393_v37 }
 0x161   :  { %v1243_v48 = vadd.f32 %v1242_v7, %v1180_v44  ;;  %v1111_v25 = vadd.f32 %v1110_v47, %v2374_v29 }
 0x163   :  { %v1112_v10 = vadd.f32 %v2364_v19, %v1111_v25  ;;  %v1244_v56 = vadd.f32 %v1243_v48, %v1181_v51  ;;  %v1186_v19 = vmul.f32 %v2391_v16, %v2391_v16 }
 0x165   :  { %v1245_v57 = vadd.f32 %v1244_v56, %v1182_v43  ;;  %v1113_v63 = vadd.f32 %v2370_v52, %v1112_v10  ;;  %v1187_v52 = vmul.f32 %v2400_v41, %v2400_v41 }
 0x167   :  { %v1114_v1 = vadd.f32 %v1113_v63, %v2393_v37  ;;  %v1246_v36 = vadd.f32 %v1245_v57, %v1183_v49  ;;  %v1188_v37 = vmul.f32 %v2423_v62, %v2423_v62 }
 0x169   :  { %v1247_v4 = vadd.f32 %v1246_v36, %v1184_v20  ;;  %v1115_v29 = vadd.f32 %v1114_v1, %v2404_v14 }
 0x16b   :  { %v1116_v11 = vadd.f32 %v2391_v16, %v1115_v29  ;;  %v1248_v13 = vadd.f32 %v1247_v4, %v1185_v9  ;;  %v1190_v16 = vmul.f32 %v2421_v59, %v2421_v59 }
 0x16d   :  { %v1249_v17 = vadd.f32 %v1248_v13, %v1186_v19  ;;  %v1117_v2 = vadd.f32 %v2400_v41, %v1116_v11  ;;  %v1191_v41 = vmul.f32 %v2430_v8, %v2430_v8 }
 0x16f   :  { %v1118_v18 = vadd.f32 %v1117_v2, %v2423_v62  ;;  %v1250_v3 = vadd.f32 %v1249_v17, %v1187_v52 }
 0x171   :  { %v1251_v55 = vadd.f32 %v1250_v3, %v1188_v37  ;;  %v1119_v14 = vadd.f32 %v1118_v18, %v2434_v33 }
 0x173   :  { %v1120_v22 = vadd.f32 %v2421_v59, %v1119_v14  ;;  %v1252_v23 = vadd.f32 %v1251_v55, %v1189_v58 }
 0x175   :  { %v1121_v60 = vadd.f32 %v2430_v8, %v1120_v22  ;;  %v1253_v27 = vadd.f32 %v1252_v23, %v1190_v16 }
 0x177   :  { %v1122_v62 = vrot.slane %v1121_v60, 4  ;;  %v1254_v12 = vadd.f32 %v1253_v27, %v1191_v41 }
 0x179   :  { %v1123_v0 = vadd.f32 %v1122_v62, %v1121_v60  ;;  %v1255_v5 = vrot.slane %v1254_v12, 4 }
 0x17b   :  { %v1124_v31 = vrot.slane %v1123_v0, 2  ;;  %v1256_v32 = vadd.f32 %v1255_v5, %v1254_v12 }
 0x17d   :  { %v1125_v34 = vadd.f32 %v1124_v31, %v1123_v0  ;;  %v1257_v33 = vrot.slane %v1256_v32, 2 }
 0x17f   :  { %v1126_v54 = vrot.slane %v1125_v34, 1  ;;  %v1258_v50 = vadd.f32 %v1257_v33, %v1256_v32 }
 0x181   :  { %v1259_v35 = vrot.slane %v1258_v50, 1  ;;  %v1127_v59 = vadd.f32 %v1126_v54, %v1125_v34 }
 0x183   :  { %v1260_v61 = vadd.f32 %v1259_v35, %v1258_v50 }
 0x185   :  { %v1262_v15 = vsel %vm1261_vm0, %v1127_v59, %v1260_v61 }
 0x186   :  { %1263 = vst [vmem:[%s2522_s5] sm:$0x3] %v1262_v15 }

// kernel: bottleneck_forward.5
= control target key start
LH: loop header
LB: loop body
LE: loop exit
PB: predicated region body
PF: predicated region fallthrough
CT: control target
= control target key end

     0   :  { %s3693_s24 = smov 0   ;;  %s3695_s25 = smov 0   ;;  %s4595_s0 = inlined_call_operand.vmem [shape: bf16[512,128], index: 0, kind: input, shape index: {}, may-alias: {0,1,2}]   ;;  %s4596_s1 = inlined_call_operand.vmem [shape: bf16[512,128], index: 1, kind: input, shape index: {}, may-alias: {0,1,2}]   ;;  %s4597_s2 = inlined_call_operand.vmem [shape: bf16[512,128], index: 2, kind: input, shape index: {}, may-alias: {0,1,2}]   ;;  %s4598_s3 = inlined_call_operand.vmem [shape: f32[1,128], index: 3, kind: input, shape index: {}]   ;;  %s4599_s4 = inlined_call_operand.vmem [shape: f32[1,128], index: 4, kind: input, shape index: {}]   ;;  %s4600_s5 = inlined_call_operand.vmem [shape: bf16[3,384,128], index: 5, kind: input, shape index: {}]   ;;  %s4601_s6 = inlined_call_operand.vmem [shape: bf16[512,128], index: 6, kind: output, shape index: {0}]   ;;  %s4602_s7 = inlined_call_operand.vmem [shape: f32[2,2,2,128], index: 7, kind: output, shape index: {1}]  }
   0x1   :  { %s3697_s26 = smov 0   ;;  %s3699_s27 = smov 0  }
   0x2   :  { %s3701_s28 = smov 0  }
   0x3 LB: > { %s27_s29 = sadd.s32 1, %s3643_s26  ;;  %s30_s30 = sadd.s32 1, %s3647_s27  ;;  %s3651_s28 = sphi %s3701_s28, %s18_s28   ;;  %s3647_s27 = sphi %s3699_s27, %s4617_s27   ;;  %s3643_s26 = sphi %s3697_s26, %s4616_s26   ;;  %s3639_s25 = sphi %s3695_s25, %s4615_s25   ;;  %s3635_s24 = sphi %s3693_s24, %s4614_s24  }
   0x4   : > { %p28_p0 = scmp.ge.s32.totalorder %s27_s29, 2  ;;  %p2763_p1 = scmp.ge.s32.totalorder %s3651_s28, 1 }
   0x5   : > { %p337_p2 = scmp.lt.s32.totalorder %s3651_s28, 5 }
   0x6   : > { %s4619_s29 = smov (%p28_p0, %s27_s29), 0  ;;  %s4621_s30 = smov (!%p28_p0, %s30_s30), %s3647_s27 }
   0x7   : > { %p338_p3 = pnand %p2763_p1, %p337_p2  ;;  %p32_p4 = scmp.ge.s32.totalorder %s4621_s30, 2 }
   0x8   : > { %v3517_v0 = vld [vmem:[%s4600_s5 + $0x140] sm:$0xff] (!%p338_p3)   ;;  %s2764_s14 = sshll.u32 (!%p338_p3), %s3639_s25, 1  ;;  %v3520_v3 = vld [vmem:[%s4600_s5 + $0x148] sm:$0xff] (!%p338_p3)   ;;  %v3523_v6 = vld [vmem:[%s4600_s5 + $0x150] sm:$0xff] (!%p338_p3)   ;;  %vm514_vm0 = vcmask (!%p338_p3), 1040384   ;;  %vm606_vm6 = vcmask (!%p338_p3), 1043456  }
   0x9   : > { %s4623_s30 = smov (%p32_p4, %s4621_s30), 0  ;;  %341 = sbr.rel (%p338_p3) target bundleno = 460 (0x1cc), region = 44 }
   0xa   : > { %v3518_v1 = vld [vmem:[%s4600_s5 + $0x100] sm:$0xff] (!%p338_p3)   ;;  %3285 = vmatprep.subr.bf16.mxu1 (!%p338_p3), %v3517_v0  ;;  %v3521_v4 = vld [vmem:[%s4600_s5 + $0x108] sm:$0xff] (!%p338_p3)   ;;  %s3747_s21 = sadd.s32 (!%p338_p3), %s3635_s24, %s2764_s14  ;;  %v3524_v7 = vld [vmem:[%s4600_s5 + $0x110] sm:$0xff] (!%p338_p3)   ;;  %vm515_vm1 = vsmask.f32 (!%p338_p3), 256  ;;  %vm1344_vm9 = vcmask (!%p338_p3), 1046528  }
   0xb   : > { %v3519_v2 = vld [vmem:[%s4600_s5 + $0xc0] sm:$0xff] (!%p338_p3)   ;;  %3286 = vmatpush3.bf16.msra.mxu1 (!%p338_p3), %v3517_v0  ;;  %3045 = vmatprep.subr.bf16.mxu0 (!%p338_p3), %v3518_v1  ;;  %v3522_v5 = vld [vmem:[%s4600_s5 + $0xc8] sm:$0xff] (!%p338_p3)   ;;  %v3525_v8 = vld [vmem:[%s4600_s5 + $0xd0] sm:$0xff] (!%p338_p3)   ;;  %s2765_s12 = sshll.u32 (!%p338_p3), %s3747_s21, 4  ;;  %vm547_vm3 = vsmask.f32 (!%p338_p3), 7938 }
   0xc   : > { %3046 = vmatpush3.bf16.msra.mxu0 (!%p338_p3), %v3519_v2  ;;  %3287 = vmatprep.subr.bf16.mxu1 (!%p338_p3), %v3520_v3  ;;  %v3526_v9 = vld [vmem:[%s4600_s5 + $0x158] sm:$0xff] (!%p338_p3)   ;;  %p406_p5 = scmp.lt.s32.totalorder (!%p338_p3), %s2765_s12, 63  ;;  %v3529_v12 = vld [vmem:[%s4600_s5 + $0x160] sm:$0xff] (!%p338_p3)   ;;  %v3532_v15 = vld [vmem:[%s4600_s5 + $0x168] sm:$0xff] (!%p338_p3)   ;;  %vm584_vm5 = vsmask.f32 (!%p338_p3), 4368 }
   0xd   : > { %3047 = vmatprep.subr.bf16.mxu0 (!%p338_p3), %v3521_v4  ;;  %v3527_v10 = vld [vmem:[%s4600_s5 + $0x118] sm:$0xff] (!%p338_p3)   ;;  %v3530_v13 = vld [vmem:[%s4600_s5 + $0x120] sm:$0xff] (!%p338_p3)   ;;  %v3533_v16 = vld [vmem:[%s4600_s5 + $0x128] sm:$0xff] (!%p338_p3)   ;;  %s2768_s15 = sshll.u32 (!%p338_p3), %s3747_s21, 3  ;;  %vm1239_vm10 = vsmask.f32 (!%p338_p3), 7424 }
   0xe   : > { %v3528_v11 = vld [vmem:[%s4600_s5 + $0xd8] sm:$0xff] (!%p338_p3)   ;;  %v3531_v14 = vld [vmem:[%s4600_s5 + $0xe0] sm:$0xff] (!%p338_p3)   ;;  %v3534_v17 = vld [vmem:[%s4600_s5 + $0xe8] sm:$0xff] (!%p338_p3)   ;;  %s3868_s16 = sadd.s32 (!%p338_p3), 4294967295, %s2768_s15  ;;  %p470_p7 = scmp.gt.s32.totalorder (!%p338_p3), %s3635_s24, 0 }
   0xf   : > { %3288 = vmatpush3.bf16.msra.mxu1 (!%p338_p3), %v3520_v3  ;;  %v3535_v18 = vld [vmem:[%s4600_s5 + $0x170] sm:$0xff] (!%p338_p3)   ;;  %v3538_v21 = vld [vmem:[%s4600_s5 + $0x178] sm:$0xff] (!%p338_p3)   ;;  %v3814_v23 = vld [vmem:[%s4598_s3] ss:$0 sm:$0xff] (!%p338_p3)  ;;  %p417_p6 = scmp.gt.s32.totalorder (!%p338_p3), %s3868_s16, 0  ;;  %p461_p11 = scmp.lt.s32.totalorder (!%p338_p3), %s3635_s24, 1 }
  0x10   : > { %3048 = vmatpush3.bf16.msra.mxu0 %v3522_v5  ;;  %3289 = vmatprep.subr.bf16.mxu1 %v3523_v6  ;;  %s4625_s12 = smov (!%p406_p5, %s2765_s12), 63  ;;  %v3536_v19 = vld [vmem:[%s4600_s5 + $0x130] sm:$0xff]   ;;  %v3539_v22 = vld [vmem:[%s4600_s5 + $0x138] sm:$0xff]   ;;  %vm3818_vm2 = vmand %vm514_vm0, %vm515_vm1  ;;  %p459_p12 = scmp.lt.s32.totalorder %s3639_s25, 1 }
  0x11   : > { %3049 = vmatprep.subr.bf16.mxu0 %v3524_v7  ;;  %s2766_s17 = sshll.u32 %s4625_s12, 2  ;;  %v3537_v20 = vld [vmem:[%s4600_s5 + $0xf0] sm:$0xff]   ;;  %v520_v25 = vld [vmem:[#allocation2 + $0xc] sm:$0x1]  ;;  %vm3826_vm4 = vmand %vm514_vm0, %vm547_vm3  ;;  %s4627_s16 = smov (!%p417_p6, %s3868_s16), 0 }
  0x12   : > { %s3803_s11 = scalar_lea.vmem %s4595_s0, %s2766_s17  ;;  %v552_v26 = vld [vmem:[#allocation2 + $0x14] sm:$0x1]  ;;  %v521_v27 = vsel %vm3818_vm2, 0, %v520_v25  ;;  %v3834_v30 = vld [vmem:[%s4599_s4] ss:$0 sm:$0xff]  ;;  %v3542_v34 = vld [vmem:[%s4600_s5 + $0xf8] sm:$0xff]  }
  0x13   : > { %3290 = vmatpush3.bf16.msra.mxu1 %v3523_v6  ;;  %v2960_v29 = vld [vmem:[%s3803_s11] sm:$0xff]   ;;  %522 = vst [vmem:[#allocation2 + $0xc] sm:$0x1] %v521_v27  ;;  %v553_v31 = vsel %vm3826_vm4, 0, %v552_v26  ;;  %v523_v35 = vld [vmem:[#allocation2 + $0x18] sm:$0x1]  ;;  %vm3872_vm7 = vmor %vm515_vm1, %vm584_vm5 }
  0x14   : > { %3050 = vmatpush3.bf16.msra.mxu0 %v3525_v8  ;;  %3291 = vmatprep.subr.bf16.mxu1 %v3526_v9  ;;  %v2961_v32 = vunpack.c.l.bf16 %v2960_v29  ;;  %v2962_v33 = vunpack.c.h.bf16 %v2960_v29  ;;  %554 = vst [vmem:[#allocation2 + $0x14] sm:$0x1] %v553_v31  ;;  %v555_v36 = vld [vmem:[#allocation2 + $0x20] sm:$0x1]  ;;  %v524_v39 = vsel %vm3818_vm2, 0, %v523_v35  ;;  %v3031_v41 = vld [vmem:[%s3803_s11 + $0x8] sm:$0xff]   ;;  %vm3878_vm8 = vmand %vm606_vm6, %vm547_vm3 }
  0x15   : > { %3051 = vmatprep.subr.bf16.mxu0 %v3527_v10  ;;  %v556_v40 = vsel %vm3826_vm4, 0, %v555_v36  ;;  %v3545_v42 = vld [vmem:[%s4600_s5 + $0x40] sm:$0xff]   ;;  %525 = vst [vmem:[#allocation2 + $0x18] sm:$0x1] %v524_v39  ;;  %v2965_v43 = vunpack.c.l.bf16 %v3031_v41  ;;  %v2966_v44 = vunpack.c.h.bf16 %v3031_v41  ;;  %v558_v59 = vld [vmem:[#allocation2 + $0x2c] sm:$0x1] }
  0x16   : > { %v680_v37 = vmul.f32 %v2961_v32, %v3814_v23  ;;  %v681_v38 = vmul.f32 %v2962_v33, %v3814_v23  ;;  %557 = vst [vmem:[#allocation2 + $0x20] sm:$0x1] %v556_v40  ;;  %v3547_v49 = vld [vmem:[%s4600_s5 + $0x1c0] sm:$0xff]   ;;  %v559_v4 = vsel %vm3826_vm4, 0, %v558_v59  ;;  %v3032_v5 = vld [vmem:[%s3803_s11 + $0x10] sm:$0xff]   ;;  %s2770_s18 = sshll.u32 %s4627_s16, 1 }
  0x17   : > { %3292 = vmatpush3.bf16.msra.mxu1 %v3526_v9  ;;  %v682_v47 = vmul.f32 %v2965_v43, %v3814_v23  ;;  %v683_v48 = vmul.f32 %v2966_v44, %v3814_v23  ;;  %v526_v58 = vld [vmem:[#allocation2 + $0x24] sm:$0x1]  ;;  %560 = vst [vmem:[#allocation2 + $0x2c] sm:$0x1] %v559_v4  ;;  %v2969_v10 = vunpack.c.l.bf16 %v3032_v5  ;;  %v561_v27 = vld [vmem:[#allocation2 + $0x38] sm:$0x1] }
  0x18   : > { %3052 = vmatpush3.bf16.msra.mxu0 %v3528_v11  ;;  %3293 = vmatprep.subr.bf16.mxu1 %v3529_v12  ;;  %v696_v45 = vadd.f32 %v3834_v30, %v680_v37  ;;  %v697_v46 = vadd.f32 %v3834_v30, %v681_v38  ;;  %v527_v3 = vsel %vm3818_vm2, 0, %v526_v58  ;;  %v2970_v11 = vunpack.c.h.bf16 %v3032_v5  ;;  %p3957_p8 = scmp.lt.s32.totalorder %s2770_s18, 63  ;;  %v3593_v28 = vld [vmem:[%s4600_s5 + $0x90] sm:$0xff]   ;;  %v3602_v24 = vld [vmem:[%s4600_s5 + $0xb8] sm:$0xff]   ;;  %v4387_v6 = vld [vmem:[%s4600_s5 + $0x220] sm:$0xff]   ;;  %s4635_s25 = smov (!%p459_p12, %s3639_s25), 1 }
  0x19   : > { %3053 = vmatprep.subr.bf16.mxu0 %v3530_v13  ;;  %v698_v52 = vadd.f32 %v3834_v30, %v682_v47  ;;  %v699_v53 = vadd.f32 %v3834_v30, %v683_v48  ;;  %528 = vst [vmem:[#allocation2 + $0x24] sm:$0x1] %v527_v3  ;;  %v684_v32 = vmul.f32 %v2969_v10, %v3814_v23  ;;  %v562_v44 = vsel %vm3826_vm4, 0, %v561_v27  ;;  %s4044_s13 = scalar_select %p470_p7, 1, 0  ;;  %v3604_v13 = vld [vmem:[%s4600_s5 + $0x228] sm:$0xff]  }
  0x1a   : > { %v712_v50 = vmax.f32 %v696_v45, 0.0  ;;  %v713_v51 = vmax.f32 %v697_v46, 0.0  ;;  %v937_v0 = vld [vmem:[#allocation2 + $0xc] sm:$0xf]  ;;  %v685_v33 = vmul.f32 %v2970_v11, %v3814_v23  ;;  %563 = vst [vmem:[#allocation2 + $0x38] sm:$0x1] %v562_v44 }
  0x1b   : > { %3294 = vmatpush3.bf16.msra.mxu1 %v3529_v12  ;;  %v714_v56 = vmax.f32 %v698_v52, 0.0  ;;  %v715_v57 = vmax.f32 %v699_v53, 0.0  ;;  %v941_v9 = vld [vmem:[#allocation2 + $0x14] sm:$0x1]  ;;  %v529_v12 = vld [vmem:[#allocation2 + $0x30] sm:$0x1] }
  0x1c   : > { %3054 = vmatpush3.bf16.msra.mxu0 %v3531_v14  ;;  %3295 = vmatprep.subr.bf16.mxu1 %v3532_v15  ;;  %v2919_v54 = vpack.c.bf16 %v712_v50, %v712_v50  ;;  %v2920_v55 = vpack.c.bf16 %v713_v51, %v713_v51  ;;  %v944_v25 = vld [vmem:[#allocation2 + $0x18] sm:$0xf]  ;;  %v530_v37 = vsel %vm3818_vm2, 0, %v529_v12  ;;  %v701_v43 = vadd.f32 %v3834_v30, %v685_v33  ;;  %s4629_s18 = smov (!%p3957_p8, %s2770_s18), 63  ;;  %s4637_s24 = smov (!%p461_p11, %s3635_s24), 1 }
  0x1d   : > { %3055 = vmatprep.subr.bf16.mxu0 %v3533_v16  ;;  %v2921_v1 = vpack.c.bf16 %v714_v56, %v714_v56  ;;  %v2922_v2 = vpack.c.bf16 %v715_v57, %v715_v57  ;;  %v948_v26 = vld [vmem:[#allocation2 + $0x20] sm:$0x1]  ;;  %531 = vst [vmem:[#allocation2 + $0x30] sm:$0x1] %v530_v37  ;;  %s2771_s22 = sshll.u32 %s4629_s18, 2  ;;  %s2779_s12 = sshll.u32 %s4635_s25, 1 }
  0x1e   : > { %v777_v60 = vshrl.u32 %v2919_v54, 16  ;;  %v780_v61 = vshll.u32 %v2919_v54, 16  ;;  %v785_v62 = vshrl.u32 %v2920_v55, 16  ;;  %v788_v63 = vshll.u32 %v2920_v55, 16  ;;  %v532_v54 = vld [vmem:[#allocation2 + $0x3c] sm:$0x1]  ;;  %s423_s14 = scalar_lea.vmem %s4596_s1, %s2771_s22 }
  0x1f   : > { %3296 = vmatpush3.bf16.msra.mxu1 %v3532_v15  ;;  %v794_v14 = vshrl.u32 %v2921_v1, 16  ;;  %v797_v15 = vshll.u32 %v2921_v1, 16  ;;  %v802_v16 = vshrl.u32 %v2922_v2, 16  ;;  %v717_v51 = vmax.f32 %v701_v43, 0.0  ;;  %v564_v55 = vld [vmem:[#allocation2 + $0x44] sm:$0x1] }
  0x20   : > { %3056 = vmatpush3.bf16.msra.mxu0 %v3534_v17  ;;  %3297 = vmatprep.subr.bf16.mxu1 %v3535_v18  ;;  %v779_v7 = vrot.slane %v777_v60, 7  ;;  %v787_v8 = vrot.slane %v785_v62, 7  ;;  %v805_v17 = vshll.u32 %v2922_v2, 16  ;;  %v533_v59 = vsel %vm3818_vm2, 0, %v532_v54  ;;  %v3034_v60 = vld [vmem:[%s3803_s11 + $0x20] sm:$0xff]   ;;  %v3035_v1 = vld [vmem:[%s3803_s11 + $0x28] sm:$0xff]  }
  0x21   : > { %3057 = vmatprep.subr.bf16.mxu0 %v3536_v19  ;;  %v796_v29 = vrot.slane %v794_v14, 7  ;;  %v804_v31 = vrot.slane %v802_v16, 7  ;;  %v2924_v57 = vpack.c.bf16 %v717_v51, %v717_v51  ;;  %534 = vst [vmem:[#allocation2 + $0x3c] sm:$0x1] %v533_v59  ;;  %v565_v62 = vsel %vm3826_vm4, 0, %v564_v55  ;;  %v3555_v59 = vld [vmem:[%s4600_s5 + $0x50] sm:$0xff]  }
  0x22   : > { %v782_v19 = vor.u32 %v780_v61, %v779_v7  ;;  %566 = vst [vmem:[#allocation2 + $0x44] sm:$0x1] %v565_v62  ;;  %v2981_v2 = vunpack.c.l.bf16 %v3035_v1  ;;  %v2982_v3 = vunpack.c.h.bf16 %v3035_v1  ;;  %v955_v43 = vld [vmem:[#allocation2 + $0x2c] sm:$0x1]  ;;  %v567_v54 = vld [vmem:[#allocation2 + $0x50] sm:$0x1] }
  0x23   : > { %3298 = vmatpush3.bf16.msra.mxu1 %v3535_v18  ;;  %v3033_v18 = vld [vmem:[%s3803_s11 + $0x18] sm:$0xff]   ;;  %v799_v38 = vor.u32 %v797_v15, %v796_v29  ;;  %v800_v39 = vrot.slane %v796_v29, 4  ;;  %v807_v40 = vor.u32 %v805_v17, %v804_v31  ;;  %v809_v41 = vrot.slane %v804_v31, 4  ;;  %v3546_v31 = vld [vmem:[%s4600_s5] sm:$0xff]   ;;  %s510_s22 = scalar_select %p461_p11, 1, 0 }
  0x24   : > { %3058 = vmatpush3.bf16.msra.mxu0 %v3537_v20  ;;  %3299 = vmatprep.subr.bf16.mxu1 %v3538_v21  ;;  %v783_v20 = vrot.slane %v779_v7, 4  ;;  %v938_v35 = vsel %vm3878_vm8, %v782_v19, %v937_v0  ;;  %v2973_v45 = vunpack.c.l.bf16 %v3033_v18  ;;  %v2978_v0 = vunpack.c.h.bf16 %v3034_v60 }
  0x25   : > { %3059 = vmatprep.subr.bf16.mxu0 %v3539_v22  ;;  %v792_v22 = vrot.slane %v787_v8, 4  ;;  %939 = vst [vmem:[#allocation2 + $0xc] sm:$0xf] %v938_v35  ;;  %v808_v46 = vsel %vm3872_vm7, %v800_v39, %v807_v40  ;;  %v945_v47 = vsel %vm3878_vm8, %v799_v38, %v944_v25  ;;  %v949_v48 = vsel %vm3818_vm2, %v809_v41, %v948_v26  ;;  %v3548_v35 = vld [vmem:[%s4600_s5 + $0x48] sm:$0xff]   ;;  %v951_v40 = vld [vmem:[#allocation2 + $0x24] sm:$0xf] }
  0x26   : > { %946 = vst [vmem:[#allocation2 + $0x18] sm:$0xf] %v945_v47  ;;  %947 = vst [vmem:[#allocation2 + $0x1c] sm:$0xf] %v808_v46  ;;  %v686_v52 = vmul.f32 %v2973_v45, %v3814_v23  ;;  %v689_v10 = vmul.f32 %v2978_v0, %v3814_v23  ;;  %v819_v11 = vshrl.u32 %v2924_v57, 16  ;;  %v822_v12 = vshll.u32 %v2924_v57, 16 }
  0x27   : > { %3300 = vmatpush3.bf16.msra.mxu1 %v3538_v21  ;;  %v790_v21 = vor.u32 %v788_v63, %v787_v8  ;;  %v942_v36 = vsel %vm3818_vm2, %v792_v22, %v941_v9  ;;  %950 = vst [vmem:[#allocation2 + $0x20] sm:$0x1] %v949_v48  ;;  %v2977_v63 = vunpack.c.l.bf16 %v3034_v60  ;;  %v3939_v26 = vmul.f32 %v2981_v2, %v3814_v23  ;;  %v3549_v47 = vld [vmem:[%s4600_s5 + $0x180] sm:$0xff]   ;;  %v3550_v48 = vld [vmem:[%s4600_s5 + $0x8] sm:$0xff]  }
  0x28   : > { %3060 = vmatpush3.bf16.msra.mxu0 %v3542_v34  ;;  %3125 = vmatprep.subr.bf16.mxu1 %v3545_v42  ;;  %943 = vst [vmem:[#allocation2 + $0x14] sm:$0x1] %v942_v36  ;;  %v700_v42 = vadd.f32 %v3834_v30, %v684_v32  ;;  %v702_v58 = vadd.f32 %v3834_v30, %v686_v52  ;;  %v821_v39 = vrot.slane %v819_v11, 7  ;;  %v958_v52 = vld [vmem:[#allocation2 + $0x30] sm:$0xf] }
  0x29   : > { %3205 = vmatprep.subr.bf16.mxu0 %v3547_v49  ;;  %v791_v34 = vsel %vm3872_vm7, %v783_v20, %v790_v21  ;;  %v2974_v49 = vunpack.c.h.bf16 %v3033_v18  ;;  %v688_v9 = vmul.f32 %v2977_v63, %v3814_v23  ;;  %v3930_v19 = vadd.f32 %v3834_v30, %v689_v10 }
  0x2a   : > { %940 = vst [vmem:[#allocation2 + $0x10] sm:$0xf] %v791_v34  ;;  %v716_v50 = vmax.f32 %v700_v42, 0.0  ;;  %v718_v14 = vmax.f32 %v702_v58, 0.0  ;;  %v3942_v27 = vmul.f32 %v2982_v3, %v3814_v23  ;;  %v824_v51 = vor.u32 %v822_v12, %v821_v39 }
  0x2b   : > { %v687_v53 = vmul.f32 %v2974_v49, %v3814_v23  ;;  %v3927_v18 = vadd.f32 %v3834_v30, %v688_v9 }
  0x2c   : > { %v2923_v56 = vpack.c.bf16 %v716_v50, %v716_v50  ;;  %v2925_v22 = vpack.c.bf16 %v718_v14, %v718_v14  ;;  %v3556_v14 = vld [vmem:[%s4600_s5 + $0x10] sm:$0xff]  }
  0x2d   : > { %v703_v61 = vadd.f32 %v3834_v30, %v687_v53  ;;  %v3932_v20 = vld [vmem:[#allocation2 + $0x18] sm:$0xff]   ;;  %v535_v53 = vld [vmem:[#allocation2 + $0x48] sm:$0x1]  ;;  %v720_v11 = vmax.f32 %v3927_v18, 0.0 }
  0x2e   : > { %v811_v7 = vshrl.u32 %v2923_v56, 16  ;;  %v814_v8 = vshll.u32 %v2923_v56, 16  ;;  %v3934_v21 = vld [vmem:[#allocation2 + $0x20] ss:$0 sps:$4 sm:$0x11]   ;;  %v1351_v36 = vrot.slane %v3932_v20, 1 }
  0x2f   : > { %v3541_v5 = vld [vmem:[#allocation2 + $0x14] ss:$0 sps:$4 sm:$0x11]   ;;  %v719_v15 = vmax.f32 %v703_v61, 0.0  ;;  %v1352_v37 = vrot.slane %v3934_v21, 1  ;;  %v828_v44 = vshrl.u32 %v2925_v22, 16 }
  0x30   : > { %v1349_v17 = vrot.slane %v3541_v5, 1  ;;  %v1260_v34 = vshll.u32 %v3541_v5, 16  ;;  %v813_v38 = vrot.slane %v811_v7, 7  ;;  %v831_v45 = vshll.u32 %v2925_v22, 16  ;;  %v962_v5 = vld [vmem:[#allocation2 + $0x38] sm:$0x1] }
  0x31   : > { %v3919_v4 = vld [vmem:[#allocation2 + $0xc] sm:$0xff]   ;;  %v3936_v25 = vpack.c.bf16 %v719_v15, %v719_v15  ;;  %v3965_v46 = vsel %vm1344_vm9, %v1351_v36, %v1352_v37  ;;  %v826_v56 = vrot.slane %v821_v39, 4  ;;  %v830_v57 = vrot.slane %v828_v44, 7 }
  0x32   : > { %v1348_v16 = vrot.slane %v3919_v4, 1  ;;  %v1253_v32 = vshrl.u32 %v3919_v4, 16  ;;  %v1255_v33 = vshll.u32 %v3919_v4, 16  ;;  %v1262_v42 = vrot.slane %v1260_v34, 1  ;;  %v3557_v7 = vld [vmem:[%s4600_s5 + $0x1c8] sm:$0xff]   ;;  %v4016_v34 = vld [vmem:[%s3803_s11 + $0x30] sm:$0xff]  }
  0x33   : > { %v816_v49 = vor.u32 %v814_v8, %v813_v38  ;;  %v817_v50 = vrot.slane %v813_v38, 4  ;;  %v836_v58 = vshrl.u32 %v3936_v25, 16  ;;  %v839_v62 = vshll.u32 %v3936_v25, 16  ;;  %v3558_v25 = vld [vmem:[%s4600_s5 + $0x58] sm:$0xff]   ;;  %v3567_v39 = vld [vmem:[%s4600_s5 + $0x1d0] sm:$0xff]  }
  0x34   : > { %v3945_v29 = vsel %vm1344_vm9, %v1348_v16, %v1349_v17  ;;  %v1257_v41 = vrot.slane %v1255_v33, 1  ;;  %v1265_v63 = vshrl.u32 %v3932_v20, 16  ;;  %v956_v1 = vsel %vm3818_vm2, %v826_v56, %v955_v43  ;;  %v3560_v38 = vld [vmem:[%s4600_s5 + $0x18] sm:$0xff]  }
  0x35   : > { %3301 = vmatprep.mubr.bf16.mxu1 %v3945_v29  ;;  %v825_v60 = vsel %vm3872_vm7, %v817_v50, %v824_v51  ;;  %v952_v61 = vsel %vm3878_vm8, %v816_v49, %v951_v40  ;;  %v833_v2 = vor.u32 %v831_v45, %v830_v57  ;;  %v834_v3 = vrot.slane %v830_v57, 4  ;;  %957 = vst [vmem:[#allocation2 + $0x2c] sm:$0x1] %v956_v1  ;;  %v3569_v40 = vld [vmem:[%s4600_s5 + $0x190] sm:$0xff]   ;;  %v965_v49 = vld [vmem:[#allocation2 + $0x3c] sm:$0xf] }
  0x36   : > { %3302 = vmatmul.mubr.bf16.vlgmr.msra.gmra.mrb[0].mxu1 %v3965_v46  ;;  %v1258_v55 = vor.u32 %v1257_v41, %v1253_v32  ;;  %953 = vst [vmem:[#allocation2 + $0x24] sm:$0xf] %v952_v61  ;;  %954 = vst [vmem:[#allocation2 + $0x28] sm:$0xf] %v825_v60  ;;  %v838_v8 = vrot.slane %v836_v58, 7  ;;  %v1267_v9 = vshll.u32 %v3932_v20, 16  ;;  %v706_v33 = vadd.f32 %v3834_v30, %v3939_v26 }
  0x37   : > { %3126 = vmatpush3.bf16.msra.mxu1 %v3546_v31  ;;  %v1272_v10 = vshll.u32 %v3934_v21, 16  ;;  %v959_v12 = vsel %vm3878_vm8, %v833_v2, %v958_v52  ;;  %v721_v15 = vmax.f32 %v3930_v19, 0.0  ;;  %v536_v16 = vsel %vm3818_vm2, 0, %v535_v53  ;;  %v3559_v19 = vld [vmem:[%s4600_s5 + $0x188] sm:$0xff]   ;;  %v4040_v41 = vld [vmem:[%s3803_s11 + $0x38] sm:$0xff]   ;;  %v3566_v2 = vld [vmem:[%s4600_s5 + $0x20] sm:$0xff]  }
  0x38   : > { %v3985_v0 = vsel %vm1239_vm10, %v1258_v55, %v1262_v42  ;;  %3127 = vmatprep.subr.bf16.mxu1 %v3548_v35  ;;  %v568_v17 = vsel %vm3826_vm4, 0, %v567_v54  ;;  %v843_v18 = vrot.slane %v838_v8, 4  ;;  %960 = vst [vmem:[#allocation2 + $0x30] sm:$0xf] %v959_v12  ;;  %v1269_v21 = vrot.slane %v1267_v9, 1 }
  0x39   : > { %1579 = vmatprep.mubr.bf16.mxu0 %v3985_v0  ;;  %v1274_v22 = vrot.slane %v1272_v10, 1  ;;  %537 = vst [vmem:[#allocation2 + $0x48] sm:$0x1] %v536_v16  ;;  %569 = vst [vmem:[#allocation2 + $0x50] sm:$0x1] %v568_v17  ;;  %v2927_v31 = vpack.c.bf16 %v720_v11, %v720_v11  ;;  %v2928_v32 = vpack.c.bf16 %v721_v15, %v721_v15  ;;  %v722_v50 = vmax.f32 %v706_v33, 0.0 }
  0x3a   : > { %1580 = vmatmul.mubr.bf16.vlgmr.msra.gmra.mrb[0].mxu0 %v3919_v4  ;;  %v841_v4 = vor.u32 %v839_v62, %v838_v8  ;;  %v963_v36 = vsel %vm3818_vm2, %v843_v18, %v962_v5  ;;  %v1270_v37 = vor.u32 %v1269_v21, %v1265_v63  ;;  %v707_v26 = vadd.f32 %v3834_v30, %v3942_v27  ;;  %v3565_v27 = vld [vmem:[%s4600_s5 + $0x60] sm:$0xff]   ;;  %v538_v10 = vld [vmem:[#allocation2 + $0x54] sm:$0x1]  ;;  %v3568_v16 = vld [vmem:[%s4600_s5 + $0x68] sm:$0xff]  }
  0x3b   : > { %3206 = vmatpush3.bf16.msra.mxu0 %v3549_v47  ;;  %3128 = vmatpush3.bf16.msra.mxu1 %v3550_v48  ;;  %964 = vst [vmem:[#allocation2 + $0x38] sm:$0x1] %v963_v36  ;;  %v845_v42 = vshrl.u32 %v2927_v31, 16  ;;  %v848_v43 = vshll.u32 %v2927_v31, 16  ;;  %v853_v44 = vshrl.u32 %v2928_v32, 16  ;;  %v856_v45 = vshll.u32 %v2928_v32, 16 }
  0x3c   : > { %3129 = vmatprep.subr.bf16.mxu1 %v3555_v59  ;;  %3207 = vmatprep.subr.bf16.mxu0 %v3557_v7  ;;  %v842_v35 = vsel %vm3872_vm7, %v834_v3, %v841_v4  ;;  %v4052_v48 = vsel %vm1239_vm10, %v1270_v37, %v1274_v22  ;;  %v2985_v51 = vunpack.c.l.bf16 %v4016_v34  ;;  %v4055_v52 = vld [vmem:[#allocation2 + $0x2c] ss:$0 sps:$4 sm:$0x11]   ;;  %v969_v54 = vld [vmem:[#allocation2 + $0x44] sm:$0x1]  ;;  %v2986_v55 = vunpack.c.h.bf16 %v4016_v34  ;;  %v3577_v4 = vld [vmem:[%s4600_s5 + $0x1d8] sm:$0xff]  }
  0x3d   : > { %961 = vst [vmem:[#allocation2 + $0x34] sm:$0xf] %v842_v35  ;;  %v4049_v47 = vld [vmem:[#allocation2 + $0x24] sm:$0xff]   ;;  %1587 = vmatprep.mubr.bf16.mxu0 %v4052_v48  ;;  %v847_v53 = vrot.slane %v845_v42, 7  ;;  %v2989_v56 = vunpack.c.l.bf16 %v4040_v41  ;;  %v2990_v57 = vunpack.c.h.bf16 %v4040_v41  ;;  %v855_v59 = vrot.slane %v853_v44, 7  ;;  %v3575_v44 = vld [vmem:[%s4600_s5 + $0x70] sm:$0xff]  }
  0x3e   : > { %v1354_v58 = vrot.slane %v4049_v47, 1  ;;  %v723_v60 = vmax.f32 %v707_v26, 0.0  ;;  %v2929_v61 = vpack.c.bf16 %v722_v50, %v722_v50  ;;  %v1355_v62 = vrot.slane %v4055_v52, 1  ;;  %v570_v17 = vld [vmem:[#allocation2 + $0x5c] sm:$0x1]  ;;  %v3570_v35 = vld [vmem:[%s4600_s5 + $0x28] sm:$0xff]  }
  0x3f   : > { %3130 = vmatpush3.bf16.msra.mxu1 %v3556_v14  ;;  %3208 = vmatpush3.bf16.msra.mxu0 %v3559_v19  ;;  %v850_v63 = vor.u32 %v848_v43, %v847_v53  ;;  %v851_v1 = vrot.slane %v847_v53, 4  ;;  %v692_v3 = vmul.f32 %v2985_v51, %v3814_v23  ;;  %v858_v5 = vor.u32 %v856_v45, %v855_v59  ;;  %v541_v37 = vld [vmem:[#allocation2 + $0x60] sm:$0x1] }
  0x40   : > { %3131 = vmatprep.subr.bf16.mxu1 %v3558_v25  ;;  %3209 = vmatprep.subr.bf16.mxu0 %v3567_v39  ;;  %v860_v7 = vrot.slane %v855_v59, 4  ;;  %v2930_v8 = vpack.c.bf16 %v723_v60, %v723_v60  ;;  %v862_v9 = vshrl.u32 %v2929_v61, 16  ;;  %v4070_v11 = vsel %vm1344_vm9, %v1354_v58, %v1355_v62  ;;  %v972_v14 = vld [vmem:[#allocation2 + $0x48] sm:$0xf]  ;;  %v976_v42 = vld [vmem:[#allocation2 + $0x50] sm:$0x1] }
  0x41   : > { %v865_v12 = vshll.u32 %v2929_v61, 16  ;;  %v1277_v15 = vshrl.u32 %v4049_v47, 16  ;;  %3305 = vmatprep.mubr.bf16.mxu1 %v4070_v11  ;;  %v859_v21 = vsel %vm3872_vm7, %v851_v1, %v858_v5  ;;  %v693_v25 = vmul.f32 %v2986_v55, %v3814_v23  ;;  %v3576_v61 = vld [vmem:[%s4600_s5 + $0x30] sm:$0xff]   ;;  %v3579_v62 = vld [vmem:[%s4600_s5 + $0x198] sm:$0xff]  }
  0x42   : > { %1588 = vmatmul.mubr.bf16.gmra.mrb[4].mxu0 %v3932_v20  ;;  %v966_v20 = vsel %vm3878_vm8, %v850_v63, %v965_v49  ;;  %v970_v22 = vsel %vm3818_vm2, %v860_v7, %v969_v54  ;;  %v864_v19 = vrot.slane %v862_v9, 7  ;;  %v4089_v31 = vld [vmem:[#allocation2 + $0x38] ss:$0 sps:$4 sm:$0x11]   ;;  %968 = vst [vmem:[#allocation2 + $0x40] sm:$0xf] %v859_v21  ;;  %v708_v36 = vadd.f32 %v3834_v30, %v692_v3 }
  0x43   : > { %3132 = vmatpush3.bf16.msra.mxu1 %v3560_v38  ;;  %3210 = vmatpush3.bf16.msra.mxu0 %v3569_v40  ;;  %967 = vst [vmem:[#allocation2 + $0x3c] sm:$0xf] %v966_v20  ;;  %971 = vst [vmem:[#allocation2 + $0x44] sm:$0x1] %v970_v22  ;;  %v870_v32 = vshrl.u32 %v2930_v8, 16  ;;  %v873_v33 = vshll.u32 %v2930_v8, 16  ;;  %v709_v54 = vadd.f32 %v3834_v30, %v693_v25 }
  0x44   : > { %3133 = vmatprep.subr.bf16.mxu1 %v3565_v27  ;;  %v4082_v18 = vld [vmem:[#allocation2 + $0x30] sm:$0xff]   ;;  %v1279_v34 = vshll.u32 %v4049_v47, 16  ;;  %v573_v38 = vld [vmem:[#allocation2 + $0x68] sm:$0x1]  ;;  %3211 = vmatprep.subr.bf16.mxu0 %v3577_v4  ;;  %v867_v39 = vor.u32 %v865_v12, %v864_v19  ;;  %v868_v40 = vrot.slane %v864_v19, 4  ;;  %v1284_v43 = vshll.u32 %v4055_v52, 16 }
  0x45   : > { %v1357_v26 = vrot.slane %v4082_v18, 1  ;;  %v1358_v45 = vrot.slane %v4089_v31, 1  ;;  %v872_v27 = vrot.slane %v870_v32, 7  ;;  %v539_v50 = vsel %vm3818_vm2, 0, %v538_v10  ;;  %v3578_v10 = vld [vmem:[%s4600_s5 + $0x78] sm:$0xff]   ;;  %v2952_v22 = vld [vmem:[%s423_s14] sm:$0xff]  }
  0x46   : > { %v1281_v49 = vrot.slane %v1279_v34, 1  ;;  %v973_v51 = vsel %vm3878_vm8, %v867_v39, %v972_v14  ;;  %v1286_v53 = vrot.slane %v1284_v43, 1  ;;  %540 = vst [vmem:[#allocation2 + $0x54] sm:$0x1] %v539_v50  ;;  %v571_v52 = vsel %vm3826_vm4, 0, %v570_v17 }
  0x47   : > { %3134 = vmatpush3.bf16.msra.mxu1 %v3566_v2  ;;  %v4110_v55 = vsel %vm1344_vm9, %v1357_v26, %v1358_v45  ;;  %v875_v58 = vor.u32 %v873_v33, %v872_v27  ;;  %v877_v59 = vrot.slane %v872_v27, 4  ;;  %974 = vst [vmem:[#allocation2 + $0x48] sm:$0xf] %v973_v51  ;;  %572 = vst [vmem:[#allocation2 + $0x5c] sm:$0x1] %v571_v52  ;;  %v724_v63 = vmax.f32 %v708_v36, 0.0 }
  0x48   : > { %3135 = vmatprep.subr.bf16.mxu1 %v3568_v16  ;;  %v1282_v60 = vor.u32 %v1281_v49, %v1277_v15  ;;  %3306 = vmatmul.mubr.bf16.gmra.mrb[4].mxu1 %v4110_v55  ;;  %v725_v1 = vmax.f32 %v709_v54, 0.0  ;;  %v542_v2 = vsel %vm3818_vm2, 0, %v541_v37  ;;  %v574_v3 = vsel %vm3826_vm4, 0, %v573_v38  ;;  %v3580_v37 = vld [vmem:[%s4600_s5 + $0x38] sm:$0xff]   ;;  %v517_v54 = vld [vmem:[#allocation2] sm:$0x1] }
  0x49   : > { %v876_v5 = vsel %vm3872_vm7, %v868_v40, %v875_v58  ;;  %v977_v7 = vsel %vm3818_vm2, %v877_v59, %v976_v42  ;;  %543 = vst [vmem:[#allocation2 + $0x60] sm:$0x1] %v542_v2  ;;  %575 = vst [vmem:[#allocation2 + $0x68] sm:$0x1] %v574_v3  ;;  %v694_v9 = vmul.f32 %v2989_v56, %v3814_v23  ;;  %v1289_v56 = vshrl.u32 %v4082_v18, 16 }
  0x4a   : > { %v4133_v8 = vsel %vm1239_vm10, %v1282_v60, %v1286_v53  ;;  %v4141_v20 = vld [vmem:[#allocation2 + $0x3c] sm:$0xff]   ;;  %975 = vst [vmem:[#allocation2 + $0x4c] sm:$0xf] %v876_v5  ;;  %978 = vst [vmem:[#allocation2 + $0x50] sm:$0x1] %v977_v7  ;;  %v2931_v12 = vpack.c.bf16 %v724_v63, %v724_v63  ;;  %v2932_v14 = vpack.c.bf16 %v725_v1, %v725_v1  ;;  %v1291_v4 = vshll.u32 %v4082_v18, 16 }
  0x4b   : > { %3136 = vmatpush3.bf16.msra.mxu1 %v3570_v35  ;;  %1595 = vmatprep.mubr.bf16.mxu0 %v4133_v8  ;;  %v695_v15 = vmul.f32 %v2990_v57, %v3814_v23  ;;  %v4148_v16 = vld [vmem:[#allocation2 + $0x44] ss:$0 sps:$4 sm:$0x11]   ;;  %v710_v17 = vadd.f32 %v3834_v30, %v694_v9  ;;  %v1296_v21 = vshll.u32 %v4089_v31, 16  ;;  %v495_v19 = vstv %s4044_s13  ;;  %s4166_s13 = sadd.s32 8, %s2768_s15  ;;  %v3589_v63 = vld [vmem:[%s4600_s5 + $0x1b0] sm:$0xff]  }
  0x4c   : > { %3137 = vmatprep.subr.bf16.mxu1 %v3575_v44  ;;  %1596 = vmatmul.mubr.bf16.gmra.mrb[8].mxu0 %v4049_v47  ;;  %v1360_v25 = vrot.slane %v4141_v20, 1  ;;  %v879_v41 = vshrl.u32 %v2931_v12, 16  ;;  %v882_v57 = vshll.u32 %v2931_v12, 16  ;;  %v887_v32 = vshrl.u32 %v2932_v14, 16  ;;  %v3583_v31 = vld [vmem:[%s4600_s5 + $0x1e0] sm:$0xff]   ;;  %p435_p9 = scmp.lt.s32.totalorder %s4166_s13, 31 }
  0x4d   : > { %3212 = vmatpush3.bf16.msra.mxu0 %v3579_v62  ;;  %v1361_v33 = vrot.slane %v4148_v16, 1  ;;  %v890_v34 = vshll.u32 %v2932_v14, 16  ;;  %v711_v35 = vadd.f32 %v3834_v30, %v695_v15  ;;  %v726_v36 = vmax.f32 %v710_v17, 0.0  ;;  %v979_v39 = vld [vmem:[#allocation2 + $0x54] sm:$0xf] }
  0x4e   : > { %v881_v38 = vrot.slane %v879_v41, 7  ;;  %v889_v26 = vrot.slane %v887_v32, 7  ;;  %v2953_v40 = vunpack.c.l.bf16 %v2952_v22  ;;  %v2954_v42 = vunpack.c.h.bf16 %v2952_v22  ;;  %v983_v44 = vld [vmem:[#allocation2 + $0x5c] sm:$0x1]  ;;  %3213 = vmatprep.subr.bf16.mxu0 %v3583_v31  ;;  %v3584_v41 = vld [vmem:[%s4600_s5 + $0x1a0] sm:$0xff]   ;;  %s4631_s13 = smov (!%p435_p9, %s4166_s13), 31 }
  0x4f   : > { %3138 = vmatpush3.bf16.msra.mxu1 %v3576_v61  ;;  %v4169_v43 = vsel %vm1344_vm9, %v1360_v25, %v1361_v33  ;;  %v727_v45 = vmax.f32 %v711_v35, 0.0  ;;  %v2933_v27 = vpack.c.bf16 %v726_v36, %v726_v36  ;;  %v1293_v49 = vrot.slane %v1291_v4, 1  ;;  %s2774_s10 = sshll.u32 %s4631_s13, 1 }
  0x50   : > { %3139 = vmatprep.subr.bf16.mxu1 %v3578_v10  ;;  %3309 = vmatprep.mubr.bf16.mxu1 %v4169_v43  ;;  %v884_v50 = vor.u32 %v882_v57, %v881_v38  ;;  %v885_v51 = vrot.slane %v881_v38, 4  ;;  %v892_v53 = vor.u32 %v890_v34, %v889_v26  ;;  %v894_v52 = vrot.slane %v889_v26, 4  ;;  %v986_v9 = vld [vmem:[#allocation2 + $0x60] sm:$0xf]  ;;  %v549_v10 = vld [vmem:[#allocation2 + $0x8] sm:$0x1] }
  0x51   : > { %v4173_v58 = vld [vmem:[#allocation2 + $0x48] sm:$0xff]   ;;  %v2934_v59 = vpack.c.bf16 %v727_v45, %v727_v45  ;;  %v896_v60 = vshrl.u32 %v2933_v27, 16  ;;  %v1294_v61 = vor.u32 %v1293_v49, %v1289_v56  ;;  %v481_v62 = vmul.f32 %v2953_v40, %v3814_v23  ;;  %v4180_v1 = vld [vmem:[#allocation2 + $0x50] ss:$0 sps:$4 sm:$0x11]   ;;  %3214 = vmatpush3.bf16.msra.mxu0 %v3584_v41  ;;  %v4213_v38 = vld [vmem:[%s4600_s5 + $0x80] sm:$0xff]  }
  0x52   : > { %vm4176_vm11 = vcmp.eq.s32.totalorder %v495_v19, 1  ;;  %v893_v2 = vsel %vm3872_vm7, %v885_v51, %v892_v53  ;;  %v980_v3 = vsel %vm3878_vm8, %v884_v50, %v979_v39  ;;  %v984_v5 = vsel %vm3818_vm2, %v894_v52, %v983_v44  ;;  %v990_v4 = vld [vmem:[#allocation2 + $0x68] sm:$0x1]  ;;  %p438_p10 = scmp.lt.s32.totalorder %s2774_s10, 63 }
  0x53   : > { %3140 = vmatpush3.bf16.msra.mxu1 %v3580_v37  ;;  %v899_v7 = vshll.u32 %v2933_v27, 16  ;;  %v1363_v12 = vrot.slane %v4173_v58, 1  ;;  %981 = vst [vmem:[#allocation2 + $0x54] sm:$0xf] %v980_v3  ;;  %982 = vst [vmem:[#allocation2 + $0x58] sm:$0xf] %v893_v2  ;;  %v482_v19 = vmul.f32 %v2954_v42, %v3814_v23  ;;  %v489_v25 = vadd.f32 %v3834_v30, %v481_v62 }
  0x54   : > { %985 = vst [vmem:[#allocation2 + $0x5c] sm:$0x1] %v984_v5  ;;  %v898_v14 = vrot.slane %v896_v60, 7  ;;  %v904_v15 = vshrl.u32 %v2934_v59, 16  ;;  %v907_v56 = vshll.u32 %v2934_v59, 16  ;;  %v1364_v17 = vrot.slane %v4180_v1, 1  ;;  %3317 = vmatprep.subr.bf16.mxu1 %v4213_v38 }
  0x55   : > { %v1298_v22 = vrot.slane %v1296_v21, 1  ;;  %v3585_v57 = vld [vmem:[%s4600_s5 + $0x1e8] sm:$0xff]   ;;  %v518_v35 = vsel %vm3818_vm2, 0, %v517_v54  ;;  %v490_v37 = vadd.f32 %v3834_v30, %v482_v19  ;;  %v491_v31 = vmax.f32 %v489_v25, 0.0  ;;  %v3588_v3 = vld [vmem:[%s4600_s5 + $0x1f0] sm:$0xff]   ;;  %v3591_v19 = vld [vmem:[%s4600_s5 + $0x1f8] sm:$0xff]  }
  0x56   : > { %v901_v32 = vor.u32 %v899_v7, %v898_v14  ;;  %v902_v33 = vrot.slane %v898_v14, 4  ;;  %v906_v34 = vrot.slane %v904_v15, 7  ;;  %v3586_v23 = vld [vmem:[%s4600_s5 + $0x1a8] sm:$0xff]   ;;  %v4204_v21 = vsel %vm1344_vm9, %v1363_v12, %v1364_v17  ;;  %519 = vst [vmem:[#allocation2] sm:$0x1] %v518_v35  ;;  %3215 = vmatprep.subr.bf16.mxu0 %v3585_v57  ;;  %s4633_s10 = smov (!%p438_p10, %s2774_s10), 63 }
  0x57   : > { %v4207_v36 = vsel %vm1239_vm10, %v1294_v61, %v1298_v22  ;;  %3310 = vmatmul.mubr.bf16.gmra.mrb[8].mxu1 %v4204_v21  ;;  %v550_v30 = vsel %vm3826_vm4, 0, %v549_v10  ;;  %v492_v42 = vmax.f32 %v490_v37, 0.0  ;;  %v1301_v44 = vshrl.u32 %v4141_v20, 16  ;;  %3216 = vmatpush3.bf16.msra.mxu0 %v3586_v23  ;;  %s2775_s8 = sshll.u32 %s4633_s10, 2  ;;  %s4553_s10 = scalar_lea.vmem %s4601_s6, %s2766_s17 }
  0x58   : > { %v909_v26 = vor.u32 %v907_v56, %v906_v34  ;;  %v911_v39 = vrot.slane %v906_v34, 4  ;;  %v987_v40 = vsel %vm3878_vm8, %v901_v32, %v986_v9  ;;  %1603 = vmatprep.mubr.bf16.mxu0 %v4207_v36  ;;  %551 = vst [vmem:[#allocation2 + $0x8] sm:$0x1] %v550_v30  ;;  %v1303_v45 = vshll.u32 %v4141_v20, 16  ;;  %3217 = vmatprep.subr.bf16.mxu0 %v3588_v3  ;;  %v4289_v3 = vld [vmem:[%s4600_s5 + $0x200] sm:$0xff]   ;;  %s441_s19 = scalar_lea.vmem %s4597_s2, %s2775_s8  ;;  %s464_s17 = sadd.s32 %s2779_s12, %s4637_s24 }
  0x59   : > { %988 = vst [vmem:[#allocation2 + $0x60] sm:$0xf] %v987_v40  ;;  %1604 = vmatmul.mubr.bf16.gmra.mrb[12].mxu0 %v4082_v18  ;;  %v1308_v27 = vshll.u32 %v4148_v16, 16  ;;  %v1313_v51 = vshrl.u32 %v4173_v58, 16  ;;  %v1315_v53 = vshll.u32 %v4173_v58, 16  ;;  %v493_v52 = vpack.c.bf16 %v492_v42, %v491_v31  ;;  %s2780_s16 = sshll.u32 %s464_s17, 1 }
  0x5a   : > { %v910_v49 = vsel %vm3872_vm7, %v902_v33, %v909_v26  ;;  %v991_v50 = vsel %vm3818_vm2, %v911_v39, %v990_v4  ;;  %v4232_v54 = vld [vmem:[#allocation2 + $0x54] sm:$0xff]   ;;  %v1305_v59 = vrot.slane %v1303_v45, 1  ;;  %v1320_v2 = vshll.u32 %v4180_v1, 16  ;;  %s466_s14 = scalar_lea.vmem %s4602_s7, %s2780_s16 }
  0x5b   : > { %989 = vst [vmem:[#allocation2 + $0x64] sm:$0xf] %v910_v49  ;;  %992 = vst [vmem:[#allocation2 + $0x68] sm:$0x1] %v991_v50  ;;  %v1310_v60 = vrot.slane %v1308_v27, 1  ;;  %v497_v61 = vsel %vm4176_vm11, %v493_v52, 0  ;;  %3218 = vmatpush3.bf16.msra.mxu0 %v3589_v63 }
  0x5c   : > { %v3572_v16 = vld [vmem:[#allocation2 + $0x5c] ss:$0 sps:$4 sm:$0x11]   ;;  %v1317_v62 = vrot.slane %v1315_v53, 1  ;;  %v1366_v5 = vrot.slane %v4232_v54, 1  ;;  %v2783_v9 = vcombine.low %v497_v61, %v497_v61  ;;  %v2784_v10 = vcombine.high %v497_v61, %v497_v61  ;;  %3219 = vmatprep.subr.bf16.mxu0 %v3591_v19  ;;  %v2956_v19 = vld [vmem:[%s441_s19] sm:$0xff]  }
  0x5d   : > { %v1367_v7 = vrot.slane %v3572_v16, 1  ;;  %v1306_v12 = vor.u32 %v1305_v59, %v1301_v44  ;;  %v1322_v15 = vrot.slane %v1320_v2, 1  ;;  %v1325_v56 = vshrl.u32 %v4232_v54, 16  ;;  %v608_v41 = vld [vmem:[#allocation2] sm:$0xf]  ;;  %v3592_v44 = vld [vmem:[%s4600_s5 + $0x1b8] sm:$0xff]  }
  0x5e   : > { %v1318_v14 = vor.u32 %v1317_v62, %v1313_v51  ;;  %v587_v17 = vshrl.u32 %v2783_v9, 16  ;;  %v590_v4 = vshll.u32 %v2783_v9, 16  ;;  %v595_v22 = vshrl.u32 %v2784_v10, 16 }
  0x5f   : > { %v4251_v1 = vsel %vm1344_vm9, %v1366_v5, %v1367_v7  ;;  %v598_v25 = vshll.u32 %v2784_v10, 16  ;;  %v4258_v57 = vsel %vm1239_vm10, %v1306_v12, %v1310_v60  ;;  %v1327_v33 = vshll.u32 %v4232_v54, 16  ;;  %v612_v23 = vld [vmem:[#allocation2 + $0x8] sm:$0x1]  ;;  %3220 = vmatpush3.bf16.msra.mxu0 %v3592_v44 }
  0x60   : > { %3313 = vmatprep.mubr.bf16.mxu1 %v4251_v1  ;;  %v4261_v32 = vsel %vm1239_vm10, %v1318_v14, %v1322_v15  ;;  %v589_v35 = vrot.slane %v587_v17, 7  ;;  %1611 = vmatprep.mubr.bf16.mxu0 %v4258_v57  ;;  %v597_v31 = vrot.slane %v595_v22, 7  ;;  %v1332_v39 = vshll.u32 %v3572_v16, 16 }
  0x61   : > { %1612 = vmatmul.mubr.bf16.gmra.mrb[16].mxu0 %v4141_v20  ;;  %v1329_v26 = vrot.slane %v1327_v33, 1  ;;  %3349 = vmatprep.subr.bf16.mxu0 %v4289_v3  ;;  %v3590_v33 = vld [vmem:[%s4600_s5 + $0x88] sm:$0xff]  }
  0x62   : > { %v4264_v34 = vld [vmem:[#allocation2 + $0x60] sm:$0xff]   ;;  %v3574_v37 = vld [vmem:[#allocation2 + $0x68] ss:$0 sps:$4 sm:$0x11]   ;;  %v592_v30 = vor.u32 %v590_v4, %v589_v35  ;;  %v593_v42 = vrot.slane %v589_v35, 4  ;;  %1619 = vmatprep.mubr.bf16.mxu0 %v4261_v32  ;;  %v600_v27 = vor.u32 %v598_v25, %v597_v31  ;;  %v602_v49 = vrot.slane %v597_v31, 4 }
  0x63   : > { %v1399_v40 = vrot.slane %v4264_v34, 1  ;;  %v1400_v45 = vrot.slane %v3574_v37, 1  ;;  %v1330_v50 = vor.u32 %v1329_v26, %v1325_v56  ;;  %v1334_v53 = vrot.slane %v1332_v39, 1  ;;  %v544_v25 = vld [vmem:[#allocation2 + $0x6c] sm:$0x1] }
  0x64   : > { %v609_v51 = vsel %vm3878_vm8, %v592_v30, %v608_v41  ;;  %v1389_v52 = vshll.u32 %v4264_v34, 16  ;;  %v601_v59 = vsel %vm3872_vm7, %v593_v42, %v600_v27  ;;  %v613_v60 = vsel %vm3818_vm2, %v602_v49, %v612_v23  ;;  %v576_v31 = vld [vmem:[#allocation2 + $0x74] sm:$0x1]  ;;  %v3609_v39 = vld [vmem:[%s4598_s3] ss:$0 sm:$0xff] }
  0x65   : > { %v4278_v16 = vsel %vm1344_vm9, %v1399_v40, %v1400_v45  ;;  %610 = vst [vmem:[#allocation2] sm:$0xf] %v609_v51  ;;  %611 = vst [vmem:[#allocation2 + $0x4] sm:$0xf] %v601_v59  ;;  %v1387_v61 = vshrl.u32 %v4264_v34, 16  ;;  %v1394_v2 = vshll.u32 %v3574_v37, 16  ;;  %v4292_v5 = vsel %vm1239_vm10, %v1330_v50, %v1334_v53 }
  0x66   : > { %3314 = vmatmul.mubr.bf16.gmra.mrb[12].mxu1 %v4278_v16  ;;  %614 = vst [vmem:[#allocation2 + $0x8] sm:$0x1] %v613_v60  ;;  %v1391_v62 = vrot.slane %v1389_v52, 1  ;;  %v2957_v35 = vunpack.c.l.bf16 %v2956_v19  ;;  %v2958_v23 = vunpack.c.h.bf16 %v2956_v19  ;;  %v545_v37 = vsel %vm3818_vm2, 0, %v544_v25  ;;  %v3610_v42 = vld [vmem:[%s4599_s4] ss:$0 sm:$0xff] }
  0x67   : > { %v1396_v9 = vrot.slane %v1394_v2, 1  ;;  %546 = vst [vmem:[#allocation2 + $0x6c] sm:$0x1] %v545_v37  ;;  %v577_v26 = vsel %vm3826_vm4, 0, %v576_v31  ;;  %v511_v27 = vstv %s510_s22  ;;  %v3611_v51 = vld [vmem:[#allocation2 + $0xc] sm:$0xff]   ;;  %v3612_v60 = vld [vmem:[#allocation2 + $0x18] sm:$0xff]  }
  0x68   : > { %v1392_v7 = vor.u32 %v1391_v62, %v1387_v61  ;;  %v503_v40 = vmul.f32 %v3609_v39, %v2957_v35  ;;  %v504_v30 = vmul.f32 %v3609_v39, %v2958_v23  ;;  %578 = vst [vmem:[#allocation2 + $0x74] sm:$0x1] %v577_v26  ;;  %vm512_vm12 = vcmp.eq.s32.totalorder %v511_v27, 1  ;;  %v4344_v61 = vld [vmem:[%s4600_s5 + $0x208] sm:$0xff]   ;;  %v3597_v62 = vld [vmem:[%s4600_s5 + $0xa0] sm:$0xff]   ;;  %v3600_v31 = vld [vmem:[%s4600_s5 + $0xb0] sm:$0xff]  }
  0x69   : > { %1620 = vmatmul.mubr.bf16.gmra.mrb[20].mxu0 %v4173_v58 }
  0x6a   : > { %1627 = vmatprep.mubr.bf16.mxu0 %v4292_v5  ;;  %v4304_v56 = vsel %vm1239_vm10, %v1392_v7, %v1396_v9  ;;  %v505_v44 = vadd.f32 %v3610_v42, %v503_v40  ;;  %v506_v45 = vadd.f32 %v3610_v42, %v504_v30 }
  0x6c   : > { %v4297_v10 = vld [vmem:[#allocation2] sm:$0xff]   ;;  %v507_v49 = vmax.f32 %v505_v44, 0.0 }
  0x6d   : > { %v4299_v12 = vld [vmem:[#allocation2 + $0x8] ss:$0 sps:$4 sm:$0x11]   ;;  %v1241_v14 = vshrl.u32 %v4297_v10, 16  ;;  %v1243_v15 = vshll.u32 %v4297_v10, 16 }
  0x6e   : > { %v1248_v63 = vshll.u32 %v4299_v12, 16 }
  0x6f   : > { %v1245_v17 = vrot.slane %v1243_v15, 1 }
  0x70   : > { %v1250_v4 = vrot.slane %v1248_v63, 1 }
  0x71   : > { %1628 = vmatmul.mubr.bf16.gmra.mrb[24].mxu0 %v4232_v54  ;;  %v1246_v22 = vor.u32 %v1245_v17, %v1241_v14  ;;  %v4355_v14 = vld [vmem:[%s4600_s5 + $0x210] sm:$0xff]   ;;  %v3599_v17 = vld [vmem:[%s4600_s5 + $0xa8] sm:$0xff]  }
  0x72   : > { %1635 = vmatprep.mubr.bf16.mxu0 %v4304_v56 }
  0x73   : > { %v1251_v41 = vsel %vm1239_vm10, %v1246_v22, %v1250_v4  ;;  %v641_v4 = vld [vmem:[#allocation2 + $0x6c] sm:$0xf]  ;;  %v645_v22 = vld [vmem:[#allocation2 + $0x74] sm:$0x1] }
  0x74   : > { %1917 = vmatprep.mubr.bf16.mxu1 %v1251_v41 }
  0x75   : > { %1918 = vmatmul.mubr.bf16.vlgmr.msra.gmra.mrb[16].mxu1 %v4297_v10 }
  0x76   : > { %1925 = vmatprep.mubr.bf16.mxu1 %v3985_v0  ;;  %3318 = vmatpush3.bf16.msra.mxu1 %v4213_v38  ;;  %v508_v0 = vmax.f32 %v506_v45, 0.0  ;;  %v3595_v38 = vld [vmem:[%s4600_s5 + $0x98] sm:$0xff]  }
  0x77   : > { %3319 = vmatprep.subr.bf16.mxu1 %v3590_v33 }
  0x78   : > { %v509_v50 = vpack.c.bf16 %v508_v0, %v507_v49 }
  0x79   : > { %1636 = vmatmul.mubr.bf16.gmra.mrb[28].mxu0 %v4264_v34 }
  0x7a   : > { %2281 = vmatprep.mubr.bf16.mxu0 %v4052_v48  ;;  %3320 = vmatpush3.bf16.msra.mxu1 %v3590_v33  ;;  %v513_v53 = vsel %vm512_vm12, %v509_v50, 0 }
  0x7b   : > { %3321 = vmatprep.subr.bf16.mxu1 %v3593_v28  ;;  %v2785_v52 = vcombine.low %v513_v53, %v513_v53  ;;  %v2786_v59 = vcombine.high %v513_v53, %v513_v53 }
  0x7d   : > { %1926 = vmatmul.mubr.bf16.gmra.mrb[20].mxu1 %v3611_v51  ;;  %v624_v2 = vshll.u32 %v2785_v52, 16  ;;  %v629_v7 = vshrl.u32 %v2786_v59, 16  ;;  %v632_v9 = vshll.u32 %v2786_v59, 16 }
  0x7e   : > { %1933 = vmatprep.mubr.bf16.mxu1 %v4052_v48  ;;  %3322 = vmatpush3.bf16.msra.mxu1 %v3593_v28  ;;  %v621_v48 = vshrl.u32 %v2785_v52, 16  ;;  %v1345_v28 = vrot.slane %v4297_v10, 1 }
  0x7f   : > { %3323 = vmatprep.subr.bf16.mxu1 %v3595_v38  ;;  %v631_v63 = vrot.slane %v629_v7, 7 }
  0x80   : > { %v623_v15 = vrot.slane %v621_v48, 7 }
  0x81   : > { %2282 = vmatmul.mubr.bf16.vlgmr.msra.gmra.mrb[32].mxu0 %v3612_v60  ;;  %v634_v41 = vor.u32 %v632_v9, %v631_v63  ;;  %v636_v33 = vrot.slane %v631_v63, 4 }
  0x82   : > { %3350 = vmatpush3.bf16.msra.mxu0 %v4289_v3  ;;  %2289 = vmatprep.mubr.bf16.mxu0 %v4133_v8  ;;  %v626_v19 = vor.u32 %v624_v2, %v623_v15  ;;  %v627_v25 = vrot.slane %v623_v15, 4 }
  0x83   : > { %3351 = vmatprep.subr.bf16.mxu0 %v4344_v61  ;;  %3324 = vmatpush3.bf16.msra.mxu1 %v3595_v38  ;;  %v646_v37 = vsel %vm3818_vm2, %v636_v33, %v645_v22 }
  0x84   : > { %3325 = vmatprep.subr.bf16.mxu1 %v3597_v62  ;;  %v635_v35 = vsel %vm3872_vm7, %v627_v25, %v634_v41  ;;  %v642_v23 = vsel %vm3878_vm8, %v626_v19, %v641_v4  ;;  %647 = vst [vmem:[#allocation2 + $0x74] sm:$0x1] %v646_v37 }
  0x85   : > { %1934 = vmatmul.mubr.bf16.gmra.mrb[24].mxu1 %v3612_v60  ;;  %643 = vst [vmem:[#allocation2 + $0x6c] sm:$0xf] %v642_v23  ;;  %644 = vst [vmem:[#allocation2 + $0x70] sm:$0xf] %v635_v35 }
  0x86   : > { %3352 = vmatpush3.bf16.msra.mxu0 %v4344_v61  ;;  %1941 = vmatprep.mubr.bf16.mxu1 %v4133_v8  ;;  %v4376_v8 = vld [vmem:[%s4600_s5 + $0x218] sm:$0xff]  }
  0x87   : > { %3353 = vmatprep.subr.bf16.mxu0 %v4355_v14  ;;  %3326 = vmatpush3.bf16.msra.mxu1 %v3597_v62 }
  0x88   : > { %3327 = vmatprep.subr.bf16.mxu1 %v3599_v17 }
  0x89   : > { %2290 = vmatmul.mubr.bf16.gmra.mrb[36].mxu0 %v4049_v47 }
  0x8a   : > { %2297 = vmatprep.mubr.bf16.mxu0 %v4207_v36  ;;  %3354 = vmatpush3.bf16.msra.mxu0 %v4355_v14 }
  0x8b   : > { %3355 = vmatprep.subr.bf16.mxu0 %v4376_v8  ;;  %3328 = vmatpush3.bf16.msra.mxu1 %v3599_v17 }
  0x8c   : > { %3329 = vmatprep.subr.bf16.mxu1 %v3600_v31  ;;  %v3606_v26 = vld [vmem:[#allocation2 + $0x6c] sm:$0xff]  }
  0x8d   : > { %1942 = vmatmul.mubr.bf16.gmra.mrb[28].mxu1 %v4049_v47  ;;  %v3605_v47 = vld [vmem:[%s4600_s5 + $0x230] sm:$0xff]   ;;  %v2089_v39 = vshrl.u32 %v3606_v26, 16 }
  0x8e   : > { %3356 = vmatpush3.bf16.msra.mxu0 %v4376_v8  ;;  %1949 = vmatprep.mubr.bf16.mxu1 %v4207_v36  ;;  %v3608_v36 = vld [vmem:[%s4600_s5 + $0x238] sm:$0xff]  }
  0x8f   : > { %3357 = vmatprep.subr.bf16.mxu0 %v4387_v6  ;;  %3330 = vmatpush3.bf16.msra.mxu1 %v3600_v31 }
  0x90   : > { %3331 = vmatprep.subr.bf16.mxu1 %v3602_v24 }
  0x91   : > { %2298 = vmatmul.mubr.bf16.gmra.mrb[40].mxu0 %v4082_v18 }
  0x92   : > { %2305 = vmatprep.mubr.bf16.mxu0 %v4258_v57  ;;  %3358 = vmatpush3.bf16.msra.mxu0 %v4387_v6 }
  0x93   : > { %3359 = vmatprep.subr.bf16.mxu0 %v3604_v13  ;;  %3332 = vmatpush3.bf16.msra.mxu1 %v3602_v24 }
  0x94   : > { %3381 = vmatprep.subr.bf16.mxu1 %v4289_v3 }
  0x95   : > { %1950 = vmatmul.mubr.bf16.gmra.mrb[32].mxu1 %v4082_v18  ;;  %v3607_v18 = vld [vmem:[#allocation2 + $0x74] ss:$0 sps:$4 sm:$0x11]  }
  0x96   : > { %3360 = vmatpush3.bf16.msra.mxu0 %v3604_v13  ;;  %1957 = vmatprep.mubr.bf16.mxu1 %v4258_v57  ;;  %v2091_v57 = vshll.u32 %v3606_v26, 16  ;;  %v2096_v30 = vshll.u32 %v3607_v18, 16 }
  0x97   : > { %3361 = vmatprep.subr.bf16.mxu0 %v3605_v47 }
  0x98   : > { %v2093_v40 = vrot.slane %v2091_v57, 1  ;;  %v2098_v42 = vrot.slane %v2096_v30, 1 }
  0x99   : > { %2306 = vmatmul.mubr.bf16.gmra.mrb[44].mxu0 %v4141_v20 }
  0x9a   : > { %2313 = vmatprep.mubr.bf16.mxu0 %v4261_v32  ;;  %3362 = vmatpush3.bf16.msra.mxu0 %v3605_v47 }
  0x9b   : > { %3363 = vmatprep.subr.bf16.mxu0 %v3608_v36 }
  0x9d   : > { %1958 = vmatmul.mubr.bf16.gmra.mrb[36].mxu1 %v4141_v20  ;;  %v1346_v20 = vrot.slane %v4299_v12, 1 }
  0x9e   : > { %3364 = vmatpush3.bf16.msra.mxu0 %v3608_v36  ;;  %1965 = vmatprep.mubr.bf16.mxu1 %v4261_v32  ;;  %v2094_v32 = vor.u32 %v2093_v40, %v2089_v39 }
  0x9f   : > { %v1347_v44 = vsel %vm1344_vm9, %v1345_v28, %v1346_v20 }
  0xa1   : > { %2314 = vmatmul.mubr.bf16.gmra.mrb[48].mxu0 %v4173_v58 }
  0xa2   : > { %2321 = vmatprep.mubr.bf16.mxu0 %v4292_v5 }
  0xa5   : > { %1966 = vmatmul.mubr.bf16.gmra.mrb[40].mxu1 %v4173_v58  ;;  %v2099_v58 = vsel %vm1239_vm10, %v2094_v32, %v2098_v42 }
  0xa6   : > { %1973 = vmatprep.mubr.bf16.mxu1 %v4292_v5 }
  0xa9   : > { %2322 = vmatmul.mubr.bf16.gmra.mrb[52].mxu0 %v4232_v54 }
  0xaa   : > { %2329 = vmatprep.mubr.bf16.mxu0 %v4304_v56 }
  0xad   : > { %1974 = vmatmul.mubr.bf16.gmra.mrb[44].mxu1 %v4232_v54 }
  0xae   : > { %3333 = vmatprep.mubr.bf16.mxu1 %v1347_v44 }
  0xb1   : > { %2330 = vmatmul.mubr.bf16.gmra.mrb[56].mxu0 %v4264_v34 }
  0xb2   : > { %2337 = vmatprep.mubr.bf16.mxu0 %v2099_v58 }
  0xb5   : > { %3334 = vmatmul.mubr.bf16.vlgmr.msra.gmra.mrb[0].mxu1 %v3945_v29  ;;  %v2101_v29 = vrot.slane %v3606_v26, 1 }
  0xb6   : > { %3389 = vmatpush3.bf16.msra.mxu1 %v4289_v3  ;;  %3337 = vmatprep.mubr.bf16.mxu1 %v3965_v46 }
  0xb7   : > { %3382 = vmatprep.subr.bf16.mxu1 %v4344_v61 }
  0xb9   : > { %2338 = vmatmul.mubr.bf16.gmra.mrb[60].mxu0 %v3606_v26 }
  0xba   : > { %3365 = vmatprep.mubr.bf16.mxu0 %v3965_v46  ;;  %3390 = vmatpush3.bf16.msra.mxu1 %v4344_v61  ;;  %v2102_v46 = vrot.slane %v3607_v18, 1 }
  0xbb   : > { %3383 = vmatprep.subr.bf16.mxu1 %v4355_v14 }
  0xbd   : > { %3338 = vmatmul.mubr.bf16.gmra.mrb[4].mxu1 %v4070_v11 }
  0xbe   : > { %3391 = vmatpush3.bf16.msra.mxu1 %v4355_v14  ;;  %3341 = vmatprep.mubr.bf16.mxu1 %v4110_v55 }
  0xbf   : > { %3384 = vmatprep.subr.bf16.mxu1 %v4376_v8 }
  0xc1   : > { %3366 = vmatmul.mubr.bf16.vlgmr.msra.gmra.mrb[64].mxu0 %v4070_v11  ;;  %v2103_v11 = vsel %vm1344_vm9, %v2101_v29, %v2102_v46 }
  0xc2   : > { %3369 = vmatprep.mubr.bf16.mxu0 %v4110_v55  ;;  %3392 = vmatpush3.bf16.msra.mxu1 %v4376_v8 }
  0xc3   : > { %3385 = vmatprep.subr.bf16.mxu1 %v4387_v6 }
  0xc5   : > { %3342 = vmatmul.mubr.bf16.gmra.mrb[8].mxu1 %v4169_v43 }
  0xc6   : > { %3393 = vmatpush3.bf16.msra.mxu1 %v4387_v6  ;;  %3345 = vmatprep.mubr.bf16.mxu1 %v4204_v21 }
  0xc7   : > { %3386 = vmatprep.subr.bf16.mxu1 %v3604_v13 }
  0xc9   : > { %3370 = vmatmul.mubr.bf16.gmra.mrb[68].mxu0 %v4169_v43 }
  0xca   : > { %3394 = vmatpush3.bf16.msra.mxu1 %v3604_v13 }
  0xcb   : > { %3387 = vmatprep.subr.bf16.mxu1 %v3605_v47 }
  0xcd   : > { %3346 = vmatmul.mubr.bf16.gmra.mrb[12].mxu1 %v4251_v1 }
  0xce   : > { %3395 = vmatpush3.bf16.msra.mxu1 %v3605_v47  ;;  %3373 = vmatprep.mubr.bf16.mxu1 %v4204_v21 }
  0xcf   : > { %3388 = vmatprep.subr.bf16.mxu1 %v3608_v36 }
  0xd2   : > { %3396 = vmatpush3.bf16.msra.mxu1 %v3608_v36 }
  0xd5   : > { %3374 = vmatmul.mubr.bf16.vlgmr.msra.gmra.mrb[8].mxu1 %v4251_v1 }
  0xd6   : > { %3377 = vmatprep.mubr.bf16.mxu1 %v4278_v16 }
  0xdd   : > { %3378 = vmatmul.mubr.bf16.gmra.mrb[12].mxu1 %v2103_v11 }
 0x10d   : > { %v3061_v55 = vpop.f32.mrb[0].mxu0 }
 0x10e   : > { %v3062_v43 = vpop.f32.mrb[1].mxu0 }
 0x10f   : > { %v3063_v54 = vadd.f32 %v3062_v43, %v3061_v55  ;;  %v3064_v34 = vpop.f32.mrb[2].mxu0 }
 0x110   : > { %v3065_v3 = vpop.f32.mrb[3].mxu0 }
 0x111   : > { %v3066_v5 = vadd.f32 %v3065_v3, %v3064_v34 }
 0x115   : > { %v3067_v10 = vpop.f32.mrb[4].mxu0 }
 0x116   : > { %v3068_v12 = vpop.f32.mrb[5].mxu0 }
 0x117   : > { %v3069_v21 = vadd.f32 %v3068_v12, %v3067_v10  ;;  %v3070_v56 = vpop.f32.mrb[6].mxu0 }
 0x118   : > { %v3071_v45 = vpop.f32.mrb[7].mxu0 }
 0x119   : > { %v3072_v27 = vadd.f32 %v3071_v45, %v3070_v56 }
 0x11f   : > { %v3073_v1 = vpop.f32.mrb[8].mxu0 }
 0x120   : > { %v3074_v49 = vpop.f32.mrb[9].mxu0 }
 0x121   : > { %v4448_v16 = vadd.f32 %v3074_v49, %v3073_v1  ;;  %v3076_v0 = vpop.f32.mrb[10].mxu0 }
 0x122   : > { %v3077_v38 = vpop.f32.mrb[11].mxu0 }
 0x123   : > { %v4450_v50 = vadd.f32 %v3077_v38, %v3076_v0 }
 0x12c   : > { %v3079_v51 = vpop.f32.mrb[12].mxu0 }
 0x12d   : > { %v3080_v53 = vpop.f32.mrb[13].mxu0 }
 0x12e   : > { %v4452_v52 = vadd.f32 %v3080_v53, %v3079_v51  ;;  %v3082_v59 = vpop.f32.mrb[14].mxu0 }
 0x12f   : > { %v3083_v60 = vpop.f32.mrb[15].mxu0 }
 0x130   : > { %v4454_v61 = vadd.f32 %v3083_v60, %v3082_v59 }
 0x134   : > { %v3085_v62 = vpop.f32.mrb[16].mxu0 }
 0x135   : > { %v3086_v48 = vpop.f32.mrb[17].mxu0 }
 0x136   : > { %v4456_v2 = vadd.f32 %v3086_v48, %v3085_v62  ;;  %v3088_v7 = vpop.f32.mrb[18].mxu0 }
 0x137   : > { %v3089_v9 = vpop.f32.mrb[19].mxu0 }
 0x138   : > { %v4458_v14 = vadd.f32 %v3089_v9, %v3088_v7 }
 0x13c   : > { %v3091_v15 = vpop.f32.mrb[20].mxu0 }
 0x13d   : > { %v3092_v63 = vpop.f32.mrb[21].mxu0 }
 0x13e   : > { %v4460_v17 = vadd.f32 %v3092_v63, %v3091_v15  ;;  %v3094_v4 = vpop.f32.mrb[22].mxu0 }
 0x13f   : > { %v3095_v22 = vpop.f32.mrb[23].mxu0 }
 0x140   : > { %v4462_v19 = vadd.f32 %v3095_v22, %v3094_v4 }
 0x144   : > { %v3097_v25 = vpop.f32.mrb[24].mxu0 }
 0x145   : > { %v3098_v41 = vpop.f32.mrb[25].mxu0 }
 0x146   : > { %v4464_v33 = vadd.f32 %v3098_v41, %v3097_v25  ;;  %v3100_v35 = vpop.f32.mrb[26].mxu0 }
 0x147   : > { %v3101_v23 = vpop.f32.mrb[27].mxu0 }
 0x148   : > { %v4466_v37 = vadd.f32 %v3101_v23, %v3100_v35  ;;  %v3141_v31 = vpop.f32.mrb[16].mxu1 }
 0x149   : > { %v3142_v8 = vpop.f32.mrb[17].mxu1 }
 0x14a   : > { %v3143_v24 = vadd.f32 %v3142_v8, %v3141_v31  ;;  %v3144_v6 = vpop.f32.mrb[18].mxu1 }
 0x14b   : > { %v3145_v47 = vpop.f32.mrb[19].mxu1 }
 0x14c   : > { %v3103_v13 = vpop.f32.mrb[28].mxu0  ;;  %v3146_v26 = vadd.f32 %v3145_v47, %v3144_v6  ;;  %v4470_v39 = vadd.f32 %v3143_v24, %v3063_v54 }
 0x14d   : > { %v3104_v36 = vpop.f32.mrb[29].mxu0 }
 0x14e   : > { %v4468_v18 = vadd.f32 %v3104_v36, %v3103_v13  ;;  %v3106_v57 = vpop.f32.mrb[30].mxu0  ;;  %v4474_v28 = vadd.f32 %v3146_v26, %v3066_v5 }
 0x14f   : > { %v3107_v40 = vpop.f32.mrb[31].mxu0 }
 0x150   : > { %v4472_v30 = vadd.f32 %v3107_v40, %v3106_v57  ;;  %v3147_v20 = vpop.f32.mrb[20].mxu1 }
 0x151   : > { %v3148_v32 = vpop.f32.mrb[21].mxu1 }
 0x152   : > { %v3149_v42 = vadd.f32 %v3148_v32, %v3147_v20  ;;  %v3150_v44 = vpop.f32.mrb[22].mxu1 }
 0x153   : > { %v3151_v29 = vpop.f32.mrb[23].mxu1 }
 0x154   : > { %v3221_v58 = vpop.f32.mrb[32].mxu0  ;;  %v3152_v11 = vadd.f32 %v3151_v29, %v3150_v44  ;;  %v4478_v34 = vadd.f32 %v3149_v42, %v3069_v21 }
 0x155   : > { %v3222_v46 = vpop.f32.mrb[33].mxu0 }
 0x156   : > { %v4476_v55 = vadd.f32 %v3222_v46, %v3221_v58  ;;  %v3224_v43 = vpop.f32.mrb[34].mxu0  ;;  %v4482_v10 = vadd.f32 %v3152_v11, %v3072_v27 }
 0x157   : > { %v3225_v54 = vpop.f32.mrb[35].mxu0 }
 0x158   : > { %v4480_v3 = vadd.f32 %v3225_v54, %v3224_v43  ;;  %v3153_v5 = vpop.f32.mrb[24].mxu1 }
 0x159   : > { %v3154_v12 = vpop.f32.mrb[25].mxu1 }
 0x15a   : > { %v3155_v56 = vadd.f32 %v3154_v12, %v3153_v5  ;;  %v3156_v45 = vpop.f32.mrb[26].mxu1 }
 0x15b   : > { %v3157_v49 = vpop.f32.mrb[27].mxu1 }
 0x15c   : > { %v3227_v1 = vpop.f32.mrb[36].mxu0  ;;  %v3158_v38 = vadd.f32 %v3157_v49, %v3156_v45  ;;  %v4487_v59 = vadd.f32 %v3155_v56, %v4448_v16 }
 0x15d   : > { %v3228_v0 = vpop.f32.mrb[37].mxu0 }
 0x15e   : > { %v4484_v51 = vadd.f32 %v3228_v0, %v3227_v1  ;;  %v3230_v53 = vpop.f32.mrb[38].mxu0  ;;  %v4492_v27 = vadd.f32 %v3158_v38, %v4450_v50 }
 0x15f   : > { %v3231_v21 = vpop.f32.mrb[39].mxu0 }
 0x160   : > { %v4489_v60 = vadd.f32 %v3231_v21, %v3230_v53  ;;  %v3159_v62 = vpop.f32.mrb[28].mxu1 }
 0x161   : > { %v3160_v48 = vpop.f32.mrb[29].mxu1 }
 0x162   : > { %v3161_v7 = vadd.f32 %v3160_v48, %v3159_v62  ;;  %v3162_v9 = vpop.f32.mrb[30].mxu1 }
 0x163   : > { %v3163_v63 = vpop.f32.mrb[31].mxu1 }
 0x164   : > { %v3233_v15 = vpop.f32.mrb[40].mxu0  ;;  %v3164_v22 = vadd.f32 %v3163_v63, %v3162_v9  ;;  %v4497_v16 = vadd.f32 %v3161_v7, %v4452_v52 }
 0x165   : > { %v3234_v4 = vpop.f32.mrb[41].mxu0 }
 0x166   : > { %v4494_v25 = vadd.f32 %v3234_v4, %v3233_v15  ;;  %v3236_v41 = vpop.f32.mrb[42].mxu0  ;;  %v4502_v50 = vadd.f32 %v3164_v22, %v4454_v61 }
 0x167   : > { %v3237_v35 = vpop.f32.mrb[43].mxu0 }
 0x168   : > { %v4499_v23 = vadd.f32 %v3237_v35, %v3236_v41  ;;  %v3165_v31 = vpop.f32.mrb[32].mxu1 }
 0x169   : > { %v3166_v8 = vpop.f32.mrb[33].mxu1 }
 0x16a   : > { %v3167_v24 = vadd.f32 %v3166_v8, %v3165_v31  ;;  %v3168_v6 = vpop.f32.mrb[34].mxu1 }
 0x16b   : > { %v3169_v47 = vpop.f32.mrb[35].mxu1 }
 0x16c   : > { %v3239_v13 = vpop.f32.mrb[44].mxu0  ;;  %v3432_v26 = vadd.f32 %v3167_v24, %v4456_v2  ;;  %v3170_v57 = vadd.f32 %v3169_v47, %v3168_v6 }
 0x16d   : > { %v3240_v36 = vpop.f32.mrb[45].mxu0 }
 0x16e   : > { %v4505_v40 = vadd.f32 %v3240_v36, %v3239_v13  ;;  %v3242_v52 = vpop.f32.mrb[46].mxu0  ;;  %v3438_v32 = vadd.f32 %v3170_v57, %v4458_v14 }
 0x16f   : > { %v3243_v20 = vpop.f32.mrb[47].mxu0 }
 0x170   : > { %v4508_v42 = vadd.f32 %v3243_v20, %v3242_v52  ;;  %v3171_v61 = vpop.f32.mrb[36].mxu1 }
 0x171   : > { %v3172_v44 = vpop.f32.mrb[37].mxu1 }
 0x172   : > { %v3173_v58 = vadd.f32 %v3172_v44, %v3171_v61  ;;  %v3174_v29 = vpop.f32.mrb[38].mxu1 }
 0x173   : > { %v3175_v11 = vpop.f32.mrb[39].mxu1 }
 0x174   : > { %v3245_v46 = vpop.f32.mrb[48].mxu0  ;;  %v3429_v54 = vadd.f32 %v3173_v58, %v4460_v17  ;;  %v3176_v5 = vadd.f32 %v3175_v11, %v3174_v29 }
 0x175   : > { %v3246_v43 = vpop.f32.mrb[49].mxu0 }
 0x176   : > { %v3247_v2 = vadd.f32 %v3246_v43, %v3245_v46  ;;  %v3248_v12 = vpop.f32.mrb[50].mxu0  ;;  %v3435_v45 = vadd.f32 %v3176_v5, %v4462_v19 }
 0x177   : > { %v3249_v56 = vpop.f32.mrb[51].mxu0 }
 0x178   : > { %v3250_v1 = vadd.f32 %v3249_v56, %v3248_v12  ;;  %v4512_v49 = vadd.f32 %v3432_v26, %v3247_v2  ;;  %v3177_v14 = vpop.f32.mrb[40].mxu1 }
 0x179   : > { %v3178_v38 = vpop.f32.mrb[41].mxu1 }
 0x17a   : > { %v4514_v0 = vadd.f32 %v3438_v32, %v3250_v1  ;;  %v3179_v53 = vadd.f32 %v3178_v38, %v3177_v14  ;;  %v3180_v21 = vpop.f32.mrb[42].mxu1 }
 0x17b   : > { %v3181_v48 = vpop.f32.mrb[43].mxu1 }
 0x17c   : > { %v3251_v62 = vpop.f32.mrb[52].mxu0  ;;  %v3444_v17 = vadd.f32 %v3179_v53, %v4464_v33  ;;  %v3182_v9 = vadd.f32 %v3181_v48, %v3180_v21 }
 0x17d   : > { %v3252_v7 = vpop.f32.mrb[53].mxu0 }
 0x17e   : > { %v3253_v15 = vadd.f32 %v3252_v7, %v3251_v62  ;;  %v3254_v63 = vpop.f32.mrb[54].mxu0  ;;  %v3450_v19 = vadd.f32 %v3182_v9, %v4466_v37 }
 0x17f   : > { %v3255_v4 = vpop.f32.mrb[55].mxu0 }
 0x180   : > { %v3256_v22 = vadd.f32 %v3255_v4, %v3254_v63  ;;  %v4518_v41 = vadd.f32 %v3429_v54, %v3253_v15  ;;  %v3183_v35 = vpop.f32.mrb[44].mxu1 }
 0x181   : > { %v3184_v8 = vpop.f32.mrb[45].mxu1 }
 0x182   : > { %v4520_v31 = vadd.f32 %v3435_v45, %v3256_v22  ;;  %v3185_v24 = vadd.f32 %v3184_v8, %v3183_v35  ;;  %v3186_v6 = vpop.f32.mrb[46].mxu1 }
 0x183   : > { %v3187_v47 = vpop.f32.mrb[47].mxu1 }
 0x184   : > { %v3257_v13 = vpop.f32.mrb[56].mxu0  ;;  %v3441_v33 = vadd.f32 %v3185_v24, %v4468_v18  ;;  %v3188_v26 = vadd.f32 %v3187_v47, %v3186_v6 }
 0x185   : > { %v3258_v36 = vpop.f32.mrb[57].mxu0 }
 0x186   : > { %v3259_v57 = vadd.f32 %v3258_v36, %v3257_v13  ;;  %v3260_v52 = vpop.f32.mrb[58].mxu0  ;;  %v3447_v37 = vadd.f32 %v3188_v26, %v4472_v30 }
 0x187   : > { %v3261_v20 = vpop.f32.mrb[59].mxu0 }
 0x188   : > { %v3262_v32 = vadd.f32 %v3261_v20, %v3260_v52  ;;  %v4524_v61 = vadd.f32 %v3444_v17, %v3259_v57  ;;  %v3335_v44 = vpop.f32.mrb[0].mxu1 }
 0x189   : > { %v3398_v29 = vadd.f32 %v4478_v34, %v3335_v44  ;;  %v2016_v46 = vpop.f32.mrb[1].mxu1 }
 0x18a   : > { %v4526_v58 = vadd.f32 %v3450_v19, %v3262_v32  ;;  %v3402_v11 = vadd.f32 %v4470_v39, %v2016_v46  ;;  %v3336_v43 = vpop.f32.mrb[2].mxu1 }
 0x18b   : > { %v3406_v18 = vadd.f32 %v4482_v10, %v3336_v43  ;;  %v2019_v5 = vpop.f32.mrb[3].mxu1  ;;  %v3399_v12 = vadd.f32 %v3398_v29, %v4484_v51 }
 0x18c   : > { %v3263_v54 = vpop.f32.mrb[60].mxu0  ;;  %v3410_v30 = vadd.f32 %v4474_v28, %v2019_v5  ;;  %v3403_v1 = vadd.f32 %v3402_v11, %v4476_v55 }
 0x18d   : > { %v3264_v2 = vpop.f32.mrb[61].mxu0  ;;  %v3407_v34 = vadd.f32 %v3406_v18, %v4489_v60 }
 0x18e   : > { %v3265_v56 = vadd.f32 %v3264_v2, %v3263_v54  ;;  %v3266_v45 = vpop.f32.mrb[62].mxu0  ;;  %v3411_v39 = vadd.f32 %v3410_v30, %v4480_v3 }
 0x18f   : > { %v3267_v14 = vpop.f32.mrb[63].mxu0 }
 0x190   : > { %v3268_v38 = vadd.f32 %v3267_v14, %v3266_v45  ;;  %v4536_v53 = vadd.f32 %v3441_v33, %v3265_v56  ;;  %v3339_v21 = vpop.f32.mrb[4].mxu1 }
 0x191   : > { %v3414_v62 = vadd.f32 %v4497_v16, %v3339_v21  ;;  %v2032_v51 = vpop.f32.mrb[5].mxu1 }
 0x192   : > { %v4538_v10 = vadd.f32 %v3447_v37, %v3268_v38  ;;  %v3418_v28 = vadd.f32 %v4487_v59, %v2032_v51  ;;  %v3340_v48 = vpop.f32.mrb[6].mxu1 }
 0x193   : > { %v3422_v55 = vadd.f32 %v4502_v50, %v3340_v48  ;;  %v2035_v17 = vpop.f32.mrb[7].mxu1  ;;  %v3415_v3 = vadd.f32 %v3414_v62, %v4505_v40 }
 0x194   : > { %v3367_v7 = vpop.f32.mrb[64].mxu0  ;;  %v3426_v15 = vadd.f32 %v4492_v27, %v2035_v17  ;;  %v3419_v19 = vadd.f32 %v3418_v28, %v4494_v25 }
 0x195   : > { %v3400_v60 = vadd.f32 %v3399_v12, %v3367_v7  ;;  %v2380_v9 = vpop.f32.mrb[65].mxu0  ;;  %v3423_v59 = vadd.f32 %v3422_v55, %v4508_v42 }
 0x196   : > { %v3404_v63 = vadd.f32 %v3403_v1, %v2380_v9  ;;  %v3368_v4 = vpop.f32.mrb[66].mxu0  ;;  %v3427_v8 = vadd.f32 %v3426_v15, %v4499_v23 }
 0x197   : > { %v3408_v16 = vadd.f32 %v3407_v34, %v3368_v4  ;;  %v2383_v22 = vpop.f32.mrb[67].mxu0  ;;  %v2562_v6 = vmul.f32 %v3400_v60, %v3400_v60 }
 0x198   : > { %v3412_v35 = vadd.f32 %v3411_v39, %v2383_v22  ;;  %v2560_v27 = vmul.f32 %v3404_v63, %v3404_v63 }
 0x199   : > { %v2999_v24 = vpack.c.bf16 %v3408_v16, %v3400_v60  ;;  %v2563_v33 = vmul.f32 %v3408_v16, %v3408_v16 }
 0x19a   : > { %v2994_v50 = vpack.c.bf16 %v3412_v35, %v3404_v63  ;;  %v2539_v40 = vadd.f32 %v3412_v35, %v3404_v63  ;;  %v2561_v25 = vmul.f32 %v3412_v35, %v3412_v35 }
 0x19b   : > { %3038 = vst [vmem:[%s4553_s10 + $0x8] sm:$0xff] %v2999_v24  }
 0x19c   : > { %2995 = vst [vmem:[%s4553_s10] sm:$0xff] %v2994_v50   ;;  %v2540_v42 = vadd.f32 %v3400_v60, %v2539_v40  ;;  %v2576_v13 = vadd.f32 %v2561_v25, %v2560_v27  ;;  %v3371_v47 = vpop.f32.mrb[68].mxu0 }
 0x19d   : > { %v3416_v23 = vadd.f32 %v3415_v3, %v3371_v47  ;;  %v2396_v36 = vpop.f32.mrb[69].mxu0 }
 0x19e   : > { %v2577_v26 = vadd.f32 %v2576_v13, %v2562_v6  ;;  %v3420_v57 = vadd.f32 %v3419_v19, %v2396_v36  ;;  %v2541_v52 = vadd.f32 %v3408_v16, %v2540_v42  ;;  %v3372_v20 = vpop.f32.mrb[70].mxu0 }
 0x19f   : > { %v3424_v37 = vadd.f32 %v3423_v59, %v3372_v20  ;;  %v2399_v32 = vpop.f32.mrb[71].mxu0  ;;  %v2566_v12 = vmul.f32 %v3416_v23, %v3416_v23 }
 0x1a0   : > { %v2542_v44 = vadd.f32 %v3420_v57, %v2541_v52  ;;  %v2564_v29 = vmul.f32 %v3420_v57, %v3420_v57  ;;  %v2578_v46 = vadd.f32 %v2577_v26, %v2563_v33  ;;  %v3428_v11 = vadd.f32 %v3427_v8, %v2399_v32 }
 0x1a1   : > { %v3009_v43 = vpack.c.bf16 %v3424_v37, %v3416_v23  ;;  %v2567_v45 = vmul.f32 %v3424_v37, %v3424_v37 }
 0x1a2   : > { %v2579_v54 = vadd.f32 %v2578_v46, %v2564_v29  ;;  %v3004_v18 = vpack.c.bf16 %v3428_v11, %v3420_v57  ;;  %v2543_v5 = vadd.f32 %v3428_v11, %v2542_v44  ;;  %v2565_v2 = vmul.f32 %v3428_v11, %v3428_v11 }
 0x1a3   : > { %3040 = vst [vmem:[%s4553_s10 + $0x18] sm:$0xff] %v3009_v43  }
 0x1a4   : > { %3039 = vst [vmem:[%s4553_s10 + $0x10] sm:$0xff] %v3004_v18   ;;  %v2544_v30 = vadd.f32 %v3416_v23, %v2543_v5  ;;  %v2580_v56 = vadd.f32 %v2579_v54, %v2565_v2 }
 0x1a6   : > { %v2545_v1 = vadd.f32 %v3424_v37, %v2544_v30  ;;  %v2581_v14 = vadd.f32 %v2580_v56, %v2566_v12 }
 0x1a8   : > { %v2582_v34 = vadd.f32 %v2581_v14, %v2567_v45  ;;  %v3375_v38 = vpop.f32.mrb[8].mxu1 }
 0x1a9   : > { %v3431_v39 = vadd.f32 %v4518_v41, %v3375_v38  ;;  %v2412_v21 = vpop.f32.mrb[9].mxu1 }
 0x1aa   : > { %v3434_v62 = vadd.f32 %v4512_v49, %v2412_v21  ;;  %v3376_v51 = vpop.f32.mrb[10].mxu1 }
 0x1ab   : > { %v3437_v28 = vadd.f32 %v4520_v31, %v3376_v51  ;;  %v2415_v48 = vpop.f32.mrb[11].mxu1  ;;  %v2570_v4 = vmul.f32 %v3431_v39, %v3431_v39 }
 0x1ac   : > { %v2568_v7 = vmul.f32 %v3434_v62, %v3434_v62  ;;  %v3440_v55 = vadd.f32 %v4514_v0, %v2415_v48  ;;  %v2546_v17 = vadd.f32 %v3434_v62, %v2545_v1 }
 0x1ad   : > { %v3019_v60 = vpack.c.bf16 %v3437_v28, %v3431_v39  ;;  %v2571_v31 = vmul.f32 %v3437_v28, %v3437_v28 }
 0x1ae   : > { %v3014_v9 = vpack.c.bf16 %v3440_v55, %v3434_v62  ;;  %v2569_v3 = vmul.f32 %v3440_v55, %v3440_v55  ;;  %v2547_v15 = vadd.f32 %v3440_v55, %v2546_v17  ;;  %v2583_v63 = vadd.f32 %v2582_v34, %v2568_v7 }
 0x1af   : > { %3042 = vst [vmem:[%s4553_s10 + $0x28] sm:$0xff] %v3019_v60  }
 0x1b0   : > { %3041 = vst [vmem:[%s4553_s10 + $0x20] sm:$0xff] %v3014_v9   ;;  %v3379_v41 = vpop.f32.mrb[12].mxu1  ;;  %v2548_v19 = vadd.f32 %v3431_v39, %v2547_v15  ;;  %v2584_v16 = vadd.f32 %v2583_v63, %v2569_v3 }
 0x1b1   : > { %v3443_v49 = vadd.f32 %v4536_v53, %v3379_v41  ;;  %v2428_v22 = vpop.f32.mrb[13].mxu1 }
 0x1b2   : > { %v3446_v59 = vadd.f32 %v4524_v61, %v2428_v22  ;;  %v3380_v0 = vpop.f32.mrb[14].mxu1  ;;  %v2549_v35 = vadd.f32 %v3437_v28, %v2548_v19  ;;  %v2585_v8 = vadd.f32 %v2584_v16, %v2570_v4 }
 0x1b3   : > { %v3449_v24 = vadd.f32 %v4538_v10, %v3380_v0  ;;  %v2431_v27 = vpop.f32.mrb[15].mxu1  ;;  %v2574_v23 = vmul.f32 %v3443_v49, %v3443_v49 }
 0x1b4   : > { %v2572_v50 = vmul.f32 %v3446_v59, %v3446_v59  ;;  %v3452_v40 = vadd.f32 %v4526_v58, %v2431_v27  ;;  %v2550_v25 = vadd.f32 %v3446_v59, %v2549_v35  ;;  %v2586_v6 = vadd.f32 %v2585_v8, %v2571_v31 }
 0x1b5   : > { %v3029_v53 = vpack.c.bf16 %v3449_v24, %v3443_v49  ;;  %v2575_v33 = vmul.f32 %v3449_v24, %v3449_v24 }
 0x1b6   : > { %v3024_v42 = vpack.c.bf16 %v3452_v40, %v3446_v59  ;;  %v2573_v13 = vmul.f32 %v3452_v40, %v3452_v40  ;;  %v2551_v61 = vadd.f32 %v3452_v40, %v2550_v25  ;;  %v2587_v47 = vadd.f32 %v2586_v6, %v2572_v50 }
 0x1b7   : > { %3044 = vst [vmem:[%s4553_s10 + $0x38] sm:$0xff] %v3029_v53  }
 0x1b8   : > { %3043 = vst [vmem:[%s4553_s10 + $0x30] sm:$0xff] %v3024_v42   ;;  %v2552_v36 = vadd.f32 %v3443_v49, %v2551_v61  ;;  %v2588_v10 = vadd.f32 %v2587_v47, %v2573_v13 }
 0x1ba   : > { %v2553_v26 = vadd.f32 %v3449_v24, %v2552_v36  ;;  %v2589_v57 = vadd.f32 %v2588_v10, %v2574_v23 }
 0x1bc   : > { %v2554_v58 = vrot.slane %v2553_v26, 4  ;;  %v2590_v52 = vadd.f32 %v2589_v57, %v2575_v33 }
 0x1be   : > { %v2555_v20 = vadd.f32 %v2554_v58, %v2553_v26  ;;  %v2591_v37 = vrot.slane %v2590_v52, 4 }
 0x1c0   : > { %v2556_v32 = vrot.slane %v2555_v20, 2  ;;  %v2592_v44 = vadd.f32 %v2591_v37, %v2590_v52 }
 0x1c2   : > { %v2557_v29 = vadd.f32 %v2556_v32, %v2555_v20  ;;  %v2593_v46 = vrot.slane %v2592_v44, 2 }
 0x1c4   : > { %v2558_v11 = vrot.slane %v2557_v29, 1  ;;  %v2594_v43 = vadd.f32 %v2593_v46, %v2592_v44 }
 0x1c6   : > { %v2595_v54 = vrot.slane %v2594_v43, 1  ;;  %v2559_v18 = vadd.f32 %v2558_v11, %v2557_v29 }
 0x1c8   : > { %v2596_v5 = vadd.f32 %v2595_v54, %v2594_v43 }
 0x1ca   : > { %v2598_v2 = vsel %vm514_vm0, %v2559_v18, %v2596_v5 }
 0x1cb   : > { %2599 = vst [vmem:[%s466_s14] sm:$0x3] %v2598_v2 }
 0x1cc PF: > { %s18_s28 = sadd.s32 1, %s3651_s28   ;;  %s4614_s24 = smov %s3643_s26 }
 0x1cd   : > { %p15_p13 = scmp.ge.s32.totalorder %s18_s28, 6   ;;  %s4615_s25 = smov %s3647_s27 }
 0x1ce   : > { %s4616_s26 = smov %s4619_s29  ;;  %s4617_s27 = smov %s4623_s30 }
 0x1cf   :  { %17 = sbr.rel (!%p15_p13) target bundleno = 3 (0x3), region = 94 }

</bundles_post_ra>
